<compile_context>
chip_gen: v7x
topology: tpu7x:2x2x1
jax: 0.10.0
libtpu: 0.0.40
codegen_flags: <defaults>
</compile_context>

<pallas_src>
import jax
import jax.numpy as jnp
from jax import lax
from jax.experimental import pallas as pl
from jax.experimental.pallas import tpu as pltpu


def _lstm_tag_kernel(ids_ref, l_ref,
                     emb_hbm, wih_ref, whh_ref, b_ref, wlin_ref, blin_ref,
                     out_ref,
                     x_vmem, xw_vmem, sems):
    # ids_ref : (B_pad*T,) int32 SMEM (scalar prefetch), row-major (b, t)
    # l_ref   : (BB, 1)   int32  effective lengths (select h at t == l-1)
    # emb_hbm : (V, E)    f32    embedding table in HBM (DMA row-gathered)
    # wih_ref : (E, 4H)   matmul dtype ; whh_ref: (H, 4H) f32 ; b_ref: (1, 4H) f32 (b_ih+b_hh)
    # wlin_ref: (1, H)    f32    ; blin_ref: (1, 1) f32 in SMEM
    # out_ref : (BB, 128) f32    lane-dense output block (result broadcast over lanes)
    # x_vmem  : (T*BB, E) f32    gathered embeddings, time-major rows
    # xw_vmem : (T*BB, 4H) f32   hoisted input projection (+ bias)
    # sems    : (T, BB)   DMA semaphores (one per gathered row)
    BB = l_ref.shape[0]
    H = whh_ref.shape[0]
    TBB, _ = x_vmem.shape
    T = TBB // BB

    # (0) Fused embedding gather: one row DMA per token, HBM -> VMEM, time-major layout.
    boff = pl.program_id(0) * BB
    copies = []
    for t in range(T):
        for i in range(BB):
            row = ids_ref[(boff + i) * T + t]
            cp = pltpu.make_async_copy(
                emb_hbm.at[pl.ds(row, 1), :],
                x_vmem.at[pl.ds(t * BB + i, 1), :],
                sems.at[t, i])
            cp.start()
            copies.append(cp)
    for cp in copies:
        cp.wait()

    # (1) Hoisted input projection as ONE MXU matmul over all T steps, bias added once,
    #     staged in VMEM scratch so T*BB*4H values are not held live in vregs.
    x_all = x_vmem[...]
    if x_all.dtype != wih_ref.dtype:                       # bf16 only for this big matmul
        x_all = x_all.astype(wih_ref.dtype)
    xw_vmem[...] = (jnp.dot(x_all, wih_ref[...], preferred_element_type=jnp.float32)
                    + b_ref[...])

    # (2) Recurrence with value-carried state, fully statically unrolled; only the f32
    #     h @ W_hh matmul sits on the serial critical path.
    w_hh = whh_ref[...]                                    # f32 (no per-step cast)
    lengths = l_ref[...]                                   # (BB, 1) int32
    h = jnp.zeros((BB, H), jnp.float32)
    c = jnp.zeros((BB, H), jnp.float32)
    sel = jnp.zeros((BB, H), jnp.float32)
    for t in range(T):
        gates = xw_vmem[pl.ds(t * BB, BB), :] + jnp.dot(
            h, w_hh, preferred_element_type=jnp.float32)   # (BB, 4H) f32
        sig = jax.nn.sigmoid(gates)                        # single full-vreg EUP pass
        i_g = sig[:, 0:H]
        f_g = sig[:, H:2 * H]
        o_g = sig[:, 3 * H:4 * H]
        g_g = jnp.tanh(gates[:, 2 * H:3 * H])
        c = f_g * c + i_g * g_g
        h = o_g * jnp.tanh(c)
        sel = jnp.where(lengths == (t + 1), h, sel)        # grab h_t where t == l-1

    # (3) Linear(H, 1): VPU multiply + lane reduction (no 1-wide MXU drain); scalar bias from
    #     SMEM; store lane-dense (full-vreg) output block.
    logits = jnp.sum(sel * wlin_ref[...], axis=-1, keepdims=True) + blin_ref[0, 0]
    out_ref[...] = jnp.broadcast_to(logits, out_ref.shape)


def init_params(key, num_embeddings, embedding_dim=32, hidden_size=32):
    """Deterministic synthetic parameters matching the PyTorch module's shapes."""
    k = jax.random.split(key, 7)
    H, E = hidden_size, embedding_dim
    emb = 0.1 * jax.random.normal(k[0], (num_embeddings, E), jnp.float32)
    emb = emb.at[0].set(0.0)                               # padding_idx=0 -> zero row
    s = 1.0 / jnp.sqrt(jnp.float32(H))
    w_ih = jax.random.uniform(k[1], (4 * H, E), jnp.float32, -s, s)
    w_hh = jax.random.uniform(k[2], (4 * H, H), jnp.float32, -s, s)
    b_ih = jax.random.uniform(k[3], (4 * H,), jnp.float32, -s, s)
    b_hh = jax.random.uniform(k[4], (4 * H,), jnp.float32, -s, s)
    w_lin = jax.random.uniform(k[5], (1, H), jnp.float32, -s, s)
    b_lin = jax.random.uniform(k[6], (1,), jnp.float32, -s, s)
    return {
        "emb": emb,
        "w_ih_T": jnp.transpose(w_ih),                     # (E, 4H)
        "w_hh_T": jnp.transpose(w_hh),                     # (H, 4H)
        "b": (b_ih + b_hh).reshape(1, 4 * H),
        "w_lin_row": w_lin,                                # (1, H) == nn.Linear(H,1).weight
        "b_lin": b_lin.reshape(1, 1),
    }


def sequence_tagging_forward(params, x_ids, l=None, *, matmul_dtype=jnp.float32):
    """Pallas-backed forward. x_ids: (B, T) int32; l: optional (B,) int32 lengths."""
    emb_w = params["emb"]                                  # (V, E) f32, stays in HBM
    B, T = x_ids.shape
    E = emb_w.shape[1]
    H = params["w_hh_T"].shape[0]

    # Adaptive batch block: multiple of 8 sublanes, capped so the per-block row-DMA gather
    # (and its semaphore array) stays bounded; large B yields nb >= 2 blocks for v7x dual-TC.
    B8 = 8 * pl.cdiv(B, 8)
    bb = min(B8, 32)
    B_pad = bb * pl.cdiv(B8, bb)
    nb = B_pad // bb

    ids = jnp.asarray(x_ids, jnp.int32)
    if B_pad != B:
        ids = jnp.pad(ids, ((0, B_pad - B), (0, 0)))       # pad rows hit padding_idx 0
    ids_flat = ids.reshape(B_pad * T)                      # 1D SMEM prefetch (avoids 2D padding)

    if l is None:
        l_vec = jnp.full((B,), T, dtype=jnp.int32)         # x[:, -1, :] == h at t = T-1
    else:
        l_vec = jnp.asarray(l, jnp.int32)
        # l == 0 wraps to the last step (torch x[:, l-1] with l-1 == -1); clamp l > T.
        l_vec = jnp.where(l_vec < 1, T, jnp.minimum(l_vec, T))
    l_pad = jnp.pad(l_vec, (0, B_pad - B), constant_values=T).reshape(B_pad, 1)

    w_ih = params["w_ih_T"].astype(matmul_dtype)           # bf16 only for the hoisted matmul
    w_hh = params["w_hh_T"]                                # f32 on the serial recurrence path

    grid_spec = pltpu.PrefetchScalarGridSpec(
        num_scalar_prefetch=1,                             # token ids -> SMEM
        grid=(nb,),
        in_specs=[
            pl.BlockSpec((bb, 1), lambda b, ids: (b, 0)),              # lengths
            pl.BlockSpec(memory_space=pl.ANY),                         # emb table (HBM)
            pl.BlockSpec((E, 4 * H), lambda b, ids: (0, 0)),           # W_ih^T
            pl.BlockSpec((H, 4 * H), lambda b, ids: (0, 0)),           # W_hh^T (f32)
            pl.BlockSpec((1, 4 * H), lambda b, ids: (0, 0)),           # gate bias
            pl.BlockSpec((1, H), lambda b, ids: (0, 0)),               # linear weight row
            pl.BlockSpec(memory_space=pltpu.MemorySpace.SMEM),         # linear bias scalar
        ],
        out_specs=pl.BlockSpec((bb, 128), lambda b, ids: (b, 0)),
        scratch_shapes=[
            pltpu.VMEM((T * bb, E), jnp.float32),          # gathered embeddings
            pltpu.VMEM((T * bb, 4 * H), jnp.float32),      # staged input projection
            pltpu.SemaphoreType.DMA((T, bb)),              # one sem per gathered row
        ],
    )

    out = pl.pallas_call(
        _lstm_tag_kernel,
        out_shape=jax.ShapeDtypeStruct((B_pad, 128), jnp.float32),
        grid_spec=grid_spec,
        compiler_params=pltpu.CompilerParams(
            dimension_semantics=("parallel",)),            # batch blocks -> both TCs on v7x
    )(ids_flat, l_pad, emb_w, w_ih, w_hh, params["b"],
      params["w_lin_row"], params["b_lin"])

    return out[:B, 0]                                      # slice away padding; .squeeze()


def reference_forward(params, x_ids, l=None):
    """Pure-JAX f32 reference reproducing the PyTorch forward semantics."""
    B, T = x_ids.shape
    H = params["w_hh_T"].shape[0]
    x = params["emb"][x_ids]                               # (B, T, E)

    def step(carry, x_t):
        h, c = carry
        gates = x_t @ params["w_ih_T"] + h @ params["w_hh_T"] + params["b"]
        i = jax.nn.sigmoid(gates[:, :H])
        f = jax.nn.sigmoid(gates[:, H:2 * H])
        g = jnp.tanh(gates[:, 2 * H:3 * H])
        o = jax.nn.sigmoid(gates[:, 3 * H:])
        c = f * c + i * g
        h = o * jnp.tanh(c)
        return (h, c), h

    init = (jnp.zeros((B, H), jnp.float32), jnp.zeros((B, H), jnp.float32))
    _, hs = lax.scan(step, init, jnp.transpose(x, (1, 0, 2)))
    hs = jnp.transpose(hs, (1, 0, 2))                      # (B, T, H)
    if l is not None:
        h_last = hs[jnp.arange(B), l - 1, :]
    else:
        h_last = hs[:, -1, :]
    return (h_last @ params["w_lin_row"].T + params["b_lin"]).reshape(B)


if __name__ == "__main__":
    key = jax.random.PRNGKey(0)
    pkey, xkey = jax.random.split(key, 2)

    num_embeddings, B, T, E, H = 100, 2, 8, 32, 32
    params = init_params(pkey, num_embeddings, embedding_dim=E, hidden_size=H)

    x_ids = jax.random.randint(xkey, (B, T), 0, num_embeddings, dtype=jnp.int32)
    lengths = jnp.array([T, T - 3], dtype=jnp.int32)

    # path 1: l=None (output at last timestep)
    out_none = jax.block_until_ready(sequence_tagging_forward(params, x_ids, l=None))
    ref_none = reference_forward(params, x_ids, l=None)

    # path 2: explicit lengths l (output at t = l-1 per example)
    out_len = jax.block_until_ready(sequence_tagging_forward(params, x_ids, l=lengths))
    ref_len = reference_forward(params, x_ids, l=lengths)

    assert out_none.shape == (B,) and out_len.shape == (B,)
    assert jnp.allclose(out_none, ref_none, atol=1e-5, rtol=1e-5), (out_none, ref_none)
    assert jnp.allclose(out_len, ref_len, atol=1e-5, rtol=1e-5), (out_len, ref_len)

    # bf16 MXU path (v6e/v7x): bf16 only on the hoisted x@W_ih matmul; recurrence stays f32.
    out_bf16 = jax.block_until_ready(
        sequence_tagging_forward(params, x_ids, l=lengths, matmul_dtype=jnp.bfloat16))
    assert jnp.allclose(out_bf16, ref_len, atol=5e-2, rtol=5e-2), (out_bf16, ref_len)

    print("KERNEL_OK")
</pallas_src>

<mosaic_0001>
module attributes {stable_mosaic.version = 11 : i64} {
  func.func @_lstm_tag_kernel(%arg0: i32, %arg1: memref<64xi32, #tpu.memory_space<smem>>, %arg2: memref<8x1xi32, #tpu.memory_space<vmem>>, %arg3: memref<100x32xf32, #tpu.memory_space<any>>, %arg4: memref<32x128xf32, #tpu.memory_space<vmem>>, %arg5: memref<32x128xf32, #tpu.memory_space<vmem>>, %arg6: memref<1x128xf32, #tpu.memory_space<vmem>>, %arg7: memref<1x32xf32, #tpu.memory_space<vmem>>, %arg8: memref<1x1xf32, #tpu.memory_space<smem>>, %arg9: memref<8x128xf32, #tpu.memory_space<vmem>>, %arg10: memref<64x32xf32, #tpu.memory_space<vmem>>, %arg11: memref<64x128xf32, #tpu.memory_space<vmem>>, %arg12: memref<8x8x!tpu.dma_semaphore, #tpu.memory_space<semaphore_mem>>) attributes {dimension_semantics = [#tpu.dimension_semantics<parallel>], iteration_bounds = array<i64: 1>, scalar_prefetch = 1 : i64, scratch_operands = 3 : i64, tpu.core_type = #tpu.core_type<tc>, window_params = [{transform_indices = @transform_0, window_bounds = array<i64: 8, 1>}, {}, {pipeline_mode = #tpu.pipeline_mode<synchronous>, transform_indices = @transform_2, window_bounds = array<i64: 32, 128>}, {pipeline_mode = #tpu.pipeline_mode<synchronous>, transform_indices = @transform_3, window_bounds = array<i64: 32, 128>}, {pipeline_mode = #tpu.pipeline_mode<synchronous>, transform_indices = @transform_4, window_bounds = array<i64: 1, 128>}, {pipeline_mode = #tpu.pipeline_mode<synchronous>, transform_indices = @transform_5, window_bounds = array<i64: 1, 32>}, {transform_indices = @transform_6, window_bounds = array<i64: 1, 1>}, {transform_indices = @transform_7, window_bounds = array<i64: 8, 128>}]} {
    %c8_i32 = arith.constant 8 : i32
    %0 = arith.muli %arg0, %c8_i32 : i32
    %c0_i32 = arith.constant 0 : i32
    %1 = arith.addi %0, %c0_i32 : i32
    %c8_i32_0 = arith.constant 8 : i32
    %2 = arith.muli %1, %c8_i32_0 : i32
    %c0_i32_1 = arith.constant 0 : i32
    %3 = arith.addi %2, %c0_i32_1 : i32
    %4 = arith.index_cast %3 : i32 to index
    %5 = memref.load %arg1[%4] : memref<64xi32, #tpu.memory_space<smem>>
    %c0_i32_2 = arith.constant 0 : i32
    %c0_i32_3 = arith.constant 0 : i32
    %c0_i32_4 = arith.constant 0 : i32
    %6 = tpu.memref_slice %arg3[%5, %c0_i32_4] : memref<100x32xf32, #tpu.memory_space<any>> -> memref<1x32xf32, #tpu.memory_space<any>>
    %c0_i32_5 = arith.constant 0 : i32
    %c0_i32_6 = arith.constant 0 : i32
    %7 = tpu.memref_slice %arg10[%c0_i32_5, %c0_i32_6] : memref<64x32xf32, #tpu.memory_space<vmem>> -> memref<1x32xf32, #tpu.memory_space<vmem>>
    %8 = tpu.memref_slice %arg12[%c0_i32_2, %c0_i32_3] : memref<8x8x!tpu.dma_semaphore, #tpu.memory_space<semaphore_mem>> -> memref<1x1x!tpu.dma_semaphore, #tpu.memory_space<semaphore_mem>>
    %9 = tpu.memref_squeeze %8 : memref<1x1x!tpu.dma_semaphore, #tpu.memory_space<semaphore_mem>> -> memref<!tpu.dma_semaphore, #tpu.memory_space<semaphore_mem>>
    tpu.enqueue_dma source(%6 : memref<1x32xf32, #tpu.memory_space<any>>) target(%7 : memref<1x32xf32, #tpu.memory_space<vmem>>) target_semaphore(%9 : memref<!tpu.dma_semaphore, #tpu.memory_space<semaphore_mem>>)
    %c1_i32 = arith.constant 1 : i32
    %10 = arith.addi %0, %c1_i32 : i32
    %c8_i32_7 = arith.constant 8 : i32
    %11 = arith.muli %10, %c8_i32_7 : i32
    %c0_i32_8 = arith.constant 0 : i32
    %12 = arith.addi %11, %c0_i32_8 : i32
    %13 = arith.index_cast %12 : i32 to index
    %14 = memref.load %arg1[%13] : memref<64xi32, #tpu.memory_space<smem>>
    %c0_i32_9 = arith.constant 0 : i32
    %c1_i32_10 = arith.constant 1 : i32
    %c0_i32_11 = arith.constant 0 : i32
    %15 = tpu.memref_slice %arg3[%14, %c0_i32_11] : memref<100x32xf32, #tpu.memory_space<any>> -> memref<1x32xf32, #tpu.memory_space<any>>
    %c1_i32_12 = arith.constant 1 : i32
    %c0_i32_13 = arith.constant 0 : i32
    %16 = tpu.memref_slice %arg10[%c1_i32_12, %c0_i32_13] : memref<64x32xf32, #tpu.memory_space<vmem>> -> memref<1x32xf32, #tpu.memory_space<vmem>>
    %17 = tpu.memref_slice %arg12[%c0_i32_9, %c1_i32_10] : memref<8x8x!tpu.dma_semaphore, #tpu.memory_space<semaphore_mem>> -> memref<1x1x!tpu.dma_semaphore, #tpu.memory_space<semaphore_mem>>
    %18 = tpu.memref_squeeze %17 : memref<1x1x!tpu.dma_semaphore, #tpu.memory_space<semaphore_mem>> -> memref<!tpu.dma_semaphore, #tpu.memory_space<semaphore_mem>>
    tpu.enqueue_dma source(%15 : memref<1x32xf32, #tpu.memory_space<any>>) target(%16 : memref<1x32xf32, #tpu.memory_space<vmem>>) target_semaphore(%18 : memref<!tpu.dma_semaphore, #tpu.memory_space<semaphore_mem>>)
    %c2_i32 = arith.constant 2 : i32
    %19 = arith.addi %0, %c2_i32 : i32
    %c8_i32_14 = arith.constant 8 : i32
    %20 = arith.muli %19, %c8_i32_14 : i32
    %c0_i32_15 = arith.constant 0 : i32
    %21 = arith.addi %20, %c0_i32_15 : i32
    %22 = arith.index_cast %21 : i32 to index
    %23 = memref.load %arg1[%22] : memref<64xi32, #tpu.memory_space<smem>>
    %c0_i32_16 = arith.constant 0 : i32
    %c2_i32_17 = arith.constant 2 : i32
    %c0_i32_18 = arith.constant 0 : i32
    %24 = tpu.memref_slice %arg3[%23, %c0_i32_18] : memref<100x32xf32, #tpu.memory_space<any>> -> memref<1x32xf32, #tpu.memory_space<any>>
    %c2_i32_19 = arith.constant 2 : i32
    %c0_i32_20 = arith.constant 0 : i32
    %25 = tpu.memref_slice %arg10[%c2_i32_19, %c0_i32_20] : memref<64x32xf32, #tpu.memory_space<vmem>> -> memref<1x32xf32, #tpu.memory_space<vmem>>
    %26 = tpu.memref_slice %arg12[%c0_i32_16, %c2_i32_17] : memref<8x8x!tpu.dma_semaphore, #tpu.memory_space<semaphore_mem>> -> memref<1x1x!tpu.dma_semaphore, #tpu.memory_space<semaphore_mem>>
    %27 = tpu.memref_squeeze %26 : memref<1x1x!tpu.dma_semaphore, #tpu.memory_space<semaphore_mem>> -> memref<!tpu.dma_semaphore, #tpu.memory_space<semaphore_mem>>
    tpu.enqueue_dma source(%24 : memref<1x32xf32, #tpu.memory_space<any>>) target(%25 : memref<1x32xf32, #tpu.memory_space<vmem>>) target_semaphore(%27 : memref<!tpu.dma_semaphore, #tpu.memory_space<semaphore_mem>>)
    %c3_i32 = arith.constant 3 : i32
    %28 = arith.addi %0, %c3_i32 : i32
    %c8_i32_21 = arith.constant 8 : i32
    %29 = arith.muli %28, %c8_i32_21 : i32
    %c0_i32_22 = arith.constant 0 : i32
    %30 = arith.addi %29, %c0_i32_22 : i32
    %31 = arith.index_cast %30 : i32 to index
    %32 = memref.load %arg1[%31] : memref<64xi32, #tpu.memory_space<smem>>
    %c0_i32_23 = arith.constant 0 : i32
    %c3_i32_24 = arith.constant 3 : i32
    %c0_i32_25 = arith.constant 0 : i32
    %33 = tpu.memref_slice %arg3[%32, %c0_i32_25] : memref<100x32xf32, #tpu.memory_space<any>> -> memref<1x32xf32, #tpu.memory_space<any>>
    %c3_i32_26 = arith.constant 3 : i32
    %c0_i32_27 = arith.constant 0 : i32
    %34 = tpu.memref_slice %arg10[%c3_i32_26, %c0_i32_27] : memref<64x32xf32, #tpu.memory_space<vmem>> -> memref<1x32xf32, #tpu.memory_space<vmem>>
    %35 = tpu.memref_slice %arg12[%c0_i32_23, %c3_i32_24] : memref<8x8x!tpu.dma_semaphore, #tpu.memory_space<semaphore_mem>> -> memref<1x1x!tpu.dma_semaphore, #tpu.memory_space<semaphore_mem>>
    %36 = tpu.memref_squeeze %35 : memref<1x1x!tpu.dma_semaphore, #tpu.memory_space<semaphore_mem>> -> memref<!tpu.dma_semaphore, #tpu.memory_space<semaphore_mem>>
    tpu.enqueue_dma source(%33 : memref<1x32xf32, #tpu.memory_space<any>>) target(%34 : memref<1x32xf32, #tpu.memory_space<vmem>>) target_semaphore(%36 : memref<!tpu.dma_semaphore, #tpu.memory_space<semaphore_mem>>)
    %c4_i32 = arith.constant 4 : i32
    %37 = arith.addi %0, %c4_i32 : i32
    %c8_i32_28 = arith.constant 8 : i32
    %38 = arith.muli %37, %c8_i32_28 : i32
    %c0_i32_29 = arith.constant 0 : i32
    %39 = arith.addi %38, %c0_i32_29 : i32
    %40 = arith.index_cast %39 : i32 to index
    %41 = memref.load %arg1[%40] : memref<64xi32, #tpu.memory_space<smem>>
    %c0_i32_30 = arith.constant 0 : i32
    %c4_i32_31 = arith.constant 4 : i32
    %c0_i32_32 = arith.constant 0 : i32
    %42 = tpu.memref_slice %arg3[%41, %c0_i32_32] : memref<100x32xf32, #tpu.memory_space<any>> -> memref<1x32xf32, #tpu.memory_space<any>>
    %c4_i32_33 = arith.constant 4 : i32
    %c0_i32_34 = arith.constant 0 : i32
    %43 = tpu.memref_slice %arg10[%c4_i32_33, %c0_i32_34] : memref<64x32xf32, #tpu.memory_space<vmem>> -> memref<1x32xf32, #tpu.memory_space<vmem>>
    %44 = tpu.memref_slice %arg12[%c0_i32_30, %c4_i32_31] : memref<8x8x!tpu.dma_semaphore, #tpu.memory_space<semaphore_mem>> -> memref<1x1x!tpu.dma_semaphore, #tpu.memory_space<semaphore_mem>>
    %45 = tpu.memref_squeeze %44 : memref<1x1x!tpu.dma_semaphore, #tpu.memory_space<semaphore_mem>> -> memref<!tpu.dma_semaphore, #tpu.memory_space<semaphore_mem>>
    tpu.enqueue_dma source(%42 : memref<1x32xf32, #tpu.memory_space<any>>) target(%43 : memref<1x32xf32, #tpu.memory_space<vmem>>) target_semaphore(%45 : memref<!tpu.dma_semaphore, #tpu.memory_space<semaphore_mem>>)
    %c5_i32 = arith.constant 5 : i32
    %46 = arith.addi %0, %c5_i32 : i32
    %c8_i32_35 = arith.constant 8 : i32
    %47 = arith.muli %46, %c8_i32_35 : i32
    %c0_i32_36 = arith.constant 0 : i32
    %48 = arith.addi %47, %c0_i32_36 : i32
    %49 = arith.index_cast %48 : i32 to index
    %50 = memref.load %arg1[%49] : memref<64xi32, #tpu.memory_space<smem>>
    %c0_i32_37 = arith.constant 0 : i32
    %c5_i32_38 = arith.constant 5 : i32
    %c0_i32_39 = arith.constant 0 : i32
    %51 = tpu.memref_slice %arg3[%50, %c0_i32_39] : memref<100x32xf32, #tpu.memory_space<any>> -> memref<1x32xf32, #tpu.memory_space<any>>
    %c5_i32_40 = arith.constant 5 : i32
    %c0_i32_41 = arith.constant 0 : i32
    %52 = tpu.memref_slice %arg10[%c5_i32_40, %c0_i32_41] : memref<64x32xf32, #tpu.memory_space<vmem>> -> memref<1x32xf32, #tpu.memory_space<vmem>>
    %53 = tpu.memref_slice %arg12[%c0_i32_37, %c5_i32_38] : memref<8x8x!tpu.dma_semaphore, #tpu.memory_space<semaphore_mem>> -> memref<1x1x!tpu.dma_semaphore, #tpu.memory_space<semaphore_mem>>
    %54 = tpu.memref_squeeze %53 : memref<1x1x!tpu.dma_semaphore, #tpu.memory_space<semaphore_mem>> -> memref<!tpu.dma_semaphore, #tpu.memory_space<semaphore_mem>>
    tpu.enqueue_dma source(%51 : memref<1x32xf32, #tpu.memory_space<any>>) target(%52 : memref<1x32xf32, #tpu.memory_space<vmem>>) target_semaphore(%54 : memref<!tpu.dma_semaphore, #tpu.memory_space<semaphore_mem>>)
    %c6_i32 = arith.constant 6 : i32
    %55 = arith.addi %0, %c6_i32 : i32
    %c8_i32_42 = arith.constant 8 : i32
    %56 = arith.muli %55, %c8_i32_42 : i32
    %c0_i32_43 = arith.constant 0 : i32
    %57 = arith.addi %56, %c0_i32_43 : i32
    %58 = arith.index_cast %57 : i32 to index
    %59 = memref.load %arg1[%58] : memref<64xi32, #tpu.memory_space<smem>>
    %c0_i32_44 = arith.constant 0 : i32
    %c6_i32_45 = arith.constant 6 : i32
    %c0_i32_46 = arith.constant 0 : i32
    %60 = tpu.memref_slice %arg3[%59, %c0_i32_46] : memref<100x32xf32, #tpu.memory_space<any>> -> memref<1x32xf32, #tpu.memory_space<any>>
    %c6_i32_47 = arith.constant 6 : i32
    %c0_i32_48 = arith.constant 0 : i32
    %61 = tpu.memref_slice %arg10[%c6_i32_47, %c0_i32_48] : memref<64x32xf32, #tpu.memory_space<vmem>> -> memref<1x32xf32, #tpu.memory_space<vmem>>
    %62 = tpu.memref_slice %arg12[%c0_i32_44, %c6_i32_45] : memref<8x8x!tpu.dma_semaphore, #tpu.memory_space<semaphore_mem>> -> memref<1x1x!tpu.dma_semaphore, #tpu.memory_space<semaphore_mem>>
    %63 = tpu.memref_squeeze %62 : memref<1x1x!tpu.dma_semaphore, #tpu.memory_space<semaphore_mem>> -> memref<!tpu.dma_semaphore, #tpu.memory_space<semaphore_mem>>
    tpu.enqueue_dma source(%60 : memref<1x32xf32, #tpu.memory_space<any>>) target(%61 : memref<1x32xf32, #tpu.memory_space<vmem>>) target_semaphore(%63 : memref<!tpu.dma_semaphore, #tpu.memory_space<semaphore_mem>>)
    %c7_i32 = arith.constant 7 : i32
    %64 = arith.addi %0, %c7_i32 : i32
    %c8_i32_49 = arith.constant 8 : i32
    %65 = arith.muli %64, %c8_i32_49 : i32
    %c0_i32_50 = arith.constant 0 : i32
    %66 = arith.addi %65, %c0_i32_50 : i32
    %67 = arith.index_cast %66 : i32 to index
    %68 = memref.load %arg1[%67] : memref<64xi32, #tpu.memory_space<smem>>
    %c0_i32_51 = arith.constant 0 : i32
    %c7_i32_52 = arith.constant 7 : i32
    %c0_i32_53 = arith.constant 0 : i32
    %69 = tpu.memref_slice %arg3[%68, %c0_i32_53] : memref<100x32xf32, #tpu.memory_space<any>> -> memref<1x32xf32, #tpu.memory_space<any>>
    %c7_i32_54 = arith.constant 7 : i32
    %c0_i32_55 = arith.constant 0 : i32
    %70 = tpu.memref_slice %arg10[%c7_i32_54, %c0_i32_55] : memref<64x32xf32, #tpu.memory_space<vmem>> -> memref<1x32xf32, #tpu.memory_space<vmem>>
    %71 = tpu.memref_slice %arg12[%c0_i32_51, %c7_i32_52] : memref<8x8x!tpu.dma_semaphore, #tpu.memory_space<semaphore_mem>> -> memref<1x1x!tpu.dma_semaphore, #tpu.memory_space<semaphore_mem>>
    %72 = tpu.memref_squeeze %71 : memref<1x1x!tpu.dma_semaphore, #tpu.memory_space<semaphore_mem>> -> memref<!tpu.dma_semaphore, #tpu.memory_space<semaphore_mem>>
    tpu.enqueue_dma source(%69 : memref<1x32xf32, #tpu.memory_space<any>>) target(%70 : memref<1x32xf32, #tpu.memory_space<vmem>>) target_semaphore(%72 : memref<!tpu.dma_semaphore, #tpu.memory_space<semaphore_mem>>)
    %c0_i32_56 = arith.constant 0 : i32
    %73 = arith.addi %0, %c0_i32_56 : i32
    %c8_i32_57 = arith.constant 8 : i32
    %74 = arith.muli %73, %c8_i32_57 : i32
    %c1_i32_58 = arith.constant 1 : i32
    %75 = arith.addi %74, %c1_i32_58 : i32
    %76 = arith.index_cast %75 : i32 to index
    %77 = memref.load %arg1[%76] : memref<64xi32, #tpu.memory_space<smem>>
    %c1_i32_59 = arith.constant 1 : i32
    %c0_i32_60 = arith.constant 0 : i32
    %c0_i32_61 = arith.constant 0 : i32
    %78 = tpu.memref_slice %arg3[%77, %c0_i32_61] : memref<100x32xf32, #tpu.memory_space<any>> -> memref<1x32xf32, #tpu.memory_space<any>>
    %c8_i32_62 = arith.constant 8 : i32
    %c0_i32_63 = arith.constant 0 : i32
    %79 = tpu.memref_slice %arg10[%c8_i32_62, %c0_i32_63] : memref<64x32xf32, #tpu.memory_space<vmem>> -> memref<1x32xf32, #tpu.memory_space<vmem>>
    %80 = tpu.memref_slice %arg12[%c1_i32_59, %c0_i32_60] : memref<8x8x!tpu.dma_semaphore, #tpu.memory_space<semaphore_mem>> -> memref<1x1x!tpu.dma_semaphore, #tpu.memory_space<semaphore_mem>>
    %81 = tpu.memref_squeeze %80 : memref<1x1x!tpu.dma_semaphore, #tpu.memory_space<semaphore_mem>> -> memref<!tpu.dma_semaphore, #tpu.memory_space<semaphore_mem>>
    tpu.enqueue_dma source(%78 : memref<1x32xf32, #tpu.memory_space<any>>) target(%79 : memref<1x32xf32, #tpu.memory_space<vmem>>) target_semaphore(%81 : memref<!tpu.dma_semaphore, #tpu.memory_space<semaphore_mem>>)
    %c1_i32_64 = arith.constant 1 : i32
    %82 = arith.addi %0, %c1_i32_64 : i32
    %c8_i32_65 = arith.constant 8 : i32
    %83 = arith.muli %82, %c8_i32_65 : i32
    %c1_i32_66 = arith.constant 1 : i32
    %84 = arith.addi %83, %c1_i32_66 : i32
    %85 = arith.index_cast %84 : i32 to index
    %86 = memref.load %arg1[%85] : memref<64xi32, #tpu.memory_space<smem>>
    %c1_i32_67 = arith.constant 1 : i32
    %c1_i32_68 = arith.constant 1 : i32
    %c0_i32_69 = arith.constant 0 : i32
    %87 = tpu.memref_slice %arg3[%86, %c0_i32_69] : memref<100x32xf32, #tpu.memory_space<any>> -> memref<1x32xf32, #tpu.memory_space<any>>
    %c9_i32 = arith.constant 9 : i32
    %c0_i32_70 = arith.constant 0 : i32
    %88 = tpu.memref_slice %arg10[%c9_i32, %c0_i32_70] : memref<64x32xf32, #tpu.memory_space<vmem>> -> memref<1x32xf32, #tpu.memory_space<vmem>>
    %89 = tpu.memref_slice %arg12[%c1_i32_67, %c1_i32_68] : memref<8x8x!tpu.dma_semaphore, #tpu.memory_space<semaphore_mem>> -> memref<1x1x!tpu.dma_semaphore, #tpu.memory_space<semaphore_mem>>
    %90 = tpu.memref_squeeze %89 : memref<1x1x!tpu.dma_semaphore, #tpu.memory_space<semaphore_mem>> -> memref<!tpu.dma_semaphore, #tpu.memory_space<semaphore_mem>>
    tpu.enqueue_dma source(%87 : memref<1x32xf32, #tpu.memory_space<any>>) target(%88 : memref<1x32xf32, #tpu.memory_space<vmem>>) target_semaphore(%90 : memref<!tpu.dma_semaphore, #tpu.memory_space<semaphore_mem>>)
    %c2_i32_71 = arith.constant 2 : i32
    %91 = arith.addi %0, %c2_i32_71 : i32
    %c8_i32_72 = arith.constant 8 : i32
    %92 = arith.muli %91, %c8_i32_72 : i32
    %c1_i32_73 = arith.constant 1 : i32
    %93 = arith.addi %92, %c1_i32_73 : i32
    %94 = arith.index_cast %93 : i32 to index
    %95 = memref.load %arg1[%94] : memref<64xi32, #tpu.memory_space<smem>>
    %c1_i32_74 = arith.constant 1 : i32
    %c2_i32_75 = arith.constant 2 : i32
    %c0_i32_76 = arith.constant 0 : i32
    %96 = tpu.memref_slice %arg3[%95, %c0_i32_76] : memref<100x32xf32, #tpu.memory_space<any>> -> memref<1x32xf32, #tpu.memory_space<any>>
    %c10_i32 = arith.constant 10 : i32
    %c0_i32_77 = arith.constant 0 : i32
    %97 = tpu.memref_slice %arg10[%c10_i32, %c0_i32_77] : memref<64x32xf32, #tpu.memory_space<vmem>> -> memref<1x32xf32, #tpu.memory_space<vmem>>
    %98 = tpu.memref_slice %arg12[%c1_i32_74, %c2_i32_75] : memref<8x8x!tpu.dma_semaphore, #tpu.memory_space<semaphore_mem>> -> memref<1x1x!tpu.dma_semaphore, #tpu.memory_space<semaphore_mem>>
    %99 = tpu.memref_squeeze %98 : memref<1x1x!tpu.dma_semaphore, #tpu.memory_space<semaphore_mem>> -> memref<!tpu.dma_semaphore, #tpu.memory_space<semaphore_mem>>
    tpu.enqueue_dma source(%96 : memref<1x32xf32, #tpu.memory_space<any>>) target(%97 : memref<1x32xf32, #tpu.memory_space<vmem>>) target_semaphore(%99 : memref<!tpu.dma_semaphore, #tpu.memory_space<semaphore_mem>>)
    %c3_i32_78 = arith.constant 3 : i32
    %100 = arith.addi %0, %c3_i32_78 : i32
    %c8_i32_79 = arith.constant 8 : i32
    %101 = arith.muli %100, %c8_i32_79 : i32
    %c1_i32_80 = arith.constant 1 : i32
    %102 = arith.addi %101, %c1_i32_80 : i32
    %103 = arith.index_cast %102 : i32 to index
    %104 = memref.load %arg1[%103] : memref<64xi32, #tpu.memory_space<smem>>
    %c1_i32_81 = arith.constant 1 : i32
    %c3_i32_82 = arith.constant 3 : i32
    %c0_i32_83 = arith.constant 0 : i32
    %105 = tpu.memref_slice %arg3[%104, %c0_i32_83] : memref<100x32xf32, #tpu.memory_space<any>> -> memref<1x32xf32, #tpu.memory_space<any>>
    %c11_i32 = arith.constant 11 : i32
    %c0_i32_84 = arith.constant 0 : i32
    %106 = tpu.memref_slice %arg10[%c11_i32, %c0_i32_84] : memref<64x32xf32, #tpu.memory_space<vmem>> -> memref<1x32xf32, #tpu.memory_space<vmem>>
    %107 = tpu.memref_slice %arg12[%c1_i32_81, %c3_i32_82] : memref<8x8x!tpu.dma_semaphore, #tpu.memory_space<semaphore_mem>> -> memref<1x1x!tpu.dma_semaphore, #tpu.memory_space<semaphore_mem>>
    %108 = tpu.memref_squeeze %107 : memref<1x1x!tpu.dma_semaphore, #tpu.memory_space<semaphore_mem>> -> memref<!tpu.dma_semaphore, #tpu.memory_space<semaphore_mem>>
    tpu.enqueue_dma source(%105 : memref<1x32xf32, #tpu.memory_space<any>>) target(%106 : memref<1x32xf32, #tpu.memory_space<vmem>>) target_semaphore(%108 : memref<!tpu.dma_semaphore, #tpu.memory_space<semaphore_mem>>)
    %c4_i32_85 = arith.constant 4 : i32
    %109 = arith.addi %0, %c4_i32_85 : i32
    %c8_i32_86 = arith.constant 8 : i32
    %110 = arith.muli %109, %c8_i32_86 : i32
    %c1_i32_87 = arith.constant 1 : i32
    %111 = arith.addi %110, %c1_i32_87 : i32
    %112 = arith.index_cast %111 : i32 to index
    %113 = memref.load %arg1[%112] : memref<64xi32, #tpu.memory_space<smem>>
    %c1_i32_88 = arith.constant 1 : i32
    %c4_i32_89 = arith.constant 4 : i32
    %c0_i32_90 = arith.constant 0 : i32
    %114 = tpu.memref_slice %arg3[%113, %c0_i32_90] : memref<100x32xf32, #tpu.memory_space<any>> -> memref<1x32xf32, #tpu.memory_space<any>>
    %c12_i32 = arith.constant 12 : i32
    %c0_i32_91 = arith.constant 0 : i32
    %115 = tpu.memref_slice %arg10[%c12_i32, %c0_i32_91] : memref<64x32xf32, #tpu.memory_space<vmem>> -> memref<1x32xf32, #tpu.memory_space<vmem>>
    %116 = tpu.memref_slice %arg12[%c1_i32_88, %c4_i32_89] : memref<8x8x!tpu.dma_semaphore, #tpu.memory_space<semaphore_mem>> -> memref<1x1x!tpu.dma_semaphore, #tpu.memory_space<semaphore_mem>>
    %117 = tpu.memref_squeeze %116 : memref<1x1x!tpu.dma_semaphore, #tpu.memory_space<semaphore_mem>> -> memref<!tpu.dma_semaphore, #tpu.memory_space<semaphore_mem>>
    tpu.enqueue_dma source(%114 : memref<1x32xf32, #tpu.memory_space<any>>) target(%115 : memref<1x32xf32, #tpu.memory_space<vmem>>) target_semaphore(%117 : memref<!tpu.dma_semaphore, #tpu.memory_space<semaphore_mem>>)
    %c5_i32_92 = arith.constant 5 : i32
    %118 = arith.addi %0, %c5_i32_92 : i32
    %c8_i32_93 = arith.constant 8 : i32
    %119 = arith.muli %118, %c8_i32_93 : i32
    %c1_i32_94 = arith.constant 1 : i32
    %120 = arith.addi %119, %c1_i32_94 : i32
    %121 = arith.index_cast %120 : i32 to index
    %122 = memref.load %arg1[%121] : memref<64xi32, #tpu.memory_space<smem>>
    %c1_i32_95 = arith.constant 1 : i32
    %c5_i32_96 = arith.constant 5 : i32
    %c0_i32_97 = arith.constant 0 : i32
    %123 = tpu.memref_slice %arg3[%122, %c0_i32_97] : memref<100x32xf32, #tpu.memory_space<any>> -> memref<1x32xf32, #tpu.memory_space<any>>
    %c13_i32 = arith.constant 13 : i32
    %c0_i32_98 = arith.constant 0 : i32
    %124 = tpu.memref_slice %arg10[%c13_i32, %c0_i32_98] : memref<64x32xf32, #tpu.memory_space<vmem>> -> memref<1x32xf32, #tpu.memory_space<vmem>>
    %125 = tpu.memref_slice %arg12[%c1_i32_95, %c5_i32_96] : memref<8x8x!tpu.dma_semaphore, #tpu.memory_space<semaphore_mem>> -> memref<1x1x!tpu.dma_semaphore, #tpu.memory_space<semaphore_mem>>
    %126 = tpu.memref_squeeze %125 : memref<1x1x!tpu.dma_semaphore, #tpu.memory_space<semaphore_mem>> -> memref<!tpu.dma_semaphore, #tpu.memory_space<semaphore_mem>>
    tpu.enqueue_dma source(%123 : memref<1x32xf32, #tpu.memory_space<any>>) target(%124 : memref<1x32xf32, #tpu.memory_space<vmem>>) target_semaphore(%126 : memref<!tpu.dma_semaphore, #tpu.memory_space<semaphore_mem>>)
    %c6_i32_99 = arith.constant 6 : i32
    %127 = arith.addi %0, %c6_i32_99 : i32
    %c8_i32_100 = arith.constant 8 : i32
    %128 = arith.muli %127, %c8_i32_100 : i32
    %c1_i32_101 = arith.constant 1 : i32
    %129 = arith.addi %128, %c1_i32_101 : i32
    %130 = arith.index_cast %129 : i32 to index
    %131 = memref.load %arg1[%130] : memref<64xi32, #tpu.memory_space<smem>>
    %c1_i32_102 = arith.constant 1 : i32
    %c6_i32_103 = arith.constant 6 : i32
    %c0_i32_104 = arith.constant 0 : i32
    %132 = tpu.memref_slice %arg3[%131, %c0_i32_104] : memref<100x32xf32, #tpu.memory_space<any>> -> memref<1x32xf32, #tpu.memory_space<any>>
    %c14_i32 = arith.constant 14 : i32
    %c0_i32_105 = arith.constant 0 : i32
    %133 = tpu.memref_slice %arg10[%c14_i32, %c0_i32_105] : memref<64x32xf32, #tpu.memory_space<vmem>> -> memref<1x32xf32, #tpu.memory_space<vmem>>
    %134 = tpu.memref_slice %arg12[%c1_i32_102, %c6_i32_103] : memref<8x8x!tpu.dma_semaphore, #tpu.memory_space<semaphore_mem>> -> memref<1x1x!tpu.dma_semaphore, #tpu.memory_space<semaphore_mem>>
    %135 = tpu.memref_squeeze %134 : memref<1x1x!tpu.dma_semaphore, #tpu.memory_space<semaphore_mem>> -> memref<!tpu.dma_semaphore, #tpu.memory_space<semaphore_mem>>
    tpu.enqueue_dma source(%132 : memref<1x32xf32, #tpu.memory_space<any>>) target(%133 : memref<1x32xf32, #tpu.memory_space<vmem>>) target_semaphore(%135 : memref<!tpu.dma_semaphore, #tpu.memory_space<semaphore_mem>>)
    %c7_i32_106 = arith.constant 7 : i32
    %136 = arith.addi %0, %c7_i32_106 : i32
    %c8_i32_107 = arith.constant 8 : i32
    %137 = arith.muli %136, %c8_i32_107 : i32
    %c1_i32_108 = arith.constant 1 : i32
    %138 = arith.addi %137, %c1_i32_108 : i32
    %139 = arith.index_cast %138 : i32 to index
    %140 = memref.load %arg1[%139] : memref<64xi32, #tpu.memory_space<smem>>
    %c1_i32_109 = arith.constant 1 : i32
    %c7_i32_110 = arith.constant 7 : i32
    %c0_i32_111 = arith.constant 0 : i32
    %141 = tpu.memref_slice %arg3[%140, %c0_i32_111] : memref<100x32xf32, #tpu.memory_space<any>> -> memref<1x32xf32, #tpu.memory_space<any>>
    %c15_i32 = arith.constant 15 : i32
    %c0_i32_112 = arith.constant 0 : i32
    %142 = tpu.memref_slice %arg10[%c15_i32, %c0_i32_112] : memref<64x32xf32, #tpu.memory_space<vmem>> -> memref<1x32xf32, #tpu.memory_space<vmem>>
    %143 = tpu.memref_slice %arg12[%c1_i32_109, %c7_i32_110] : memref<8x8x!tpu.dma_semaphore, #tpu.memory_space<semaphore_mem>> -> memref<1x1x!tpu.dma_semaphore, #tpu.memory_space<semaphore_mem>>
    %144 = tpu.memref_squeeze %143 : memref<1x1x!tpu.dma_semaphore, #tpu.memory_space<semaphore_mem>> -> memref<!tpu.dma_semaphore, #tpu.memory_space<semaphore_mem>>
    tpu.enqueue_dma source(%141 : memref<1x32xf32, #tpu.memory_space<any>>) target(%142 : memref<1x32xf32, #tpu.memory_space<vmem>>) target_semaphore(%144 : memref<!tpu.dma_semaphore, #tpu.memory_space<semaphore_mem>>)
    %c0_i32_113 = arith.constant 0 : i32
    %145 = arith.addi %0, %c0_i32_113 : i32
    %c8_i32_114 = arith.constant 8 : i32
    %146 = arith.muli %145, %c8_i32_114 : i32
    %c2_i32_115 = arith.constant 2 : i32
    %147 = arith.addi %146, %c2_i32_115 : i32
    %148 = arith.index_cast %147 : i32 to index
    %149 = memref.load %arg1[%148] : memref<64xi32, #tpu.memory_space<smem>>
    %c2_i32_116 = arith.constant 2 : i32
    %c0_i32_117 = arith.constant 0 : i32
    %c0_i32_118 = arith.constant 0 : i32
    %150 = tpu.memref_slice %arg3[%149, %c0_i32_118] : memref<100x32xf32, #tpu.memory_space<any>> -> memref<1x32xf32, #tpu.memory_space<any>>
    %c16_i32 = arith.constant 16 : i32
    %c0_i32_119 = arith.constant 0 : i32
    %151 = tpu.memref_slice %arg10[%c16_i32, %c0_i32_119] : memref<64x32xf32, #tpu.memory_space<vmem>> -> memref<1x32xf32, #tpu.memory_space<vmem>>
    %152 = tpu.memref_slice %arg12[%c2_i32_116, %c0_i32_117] : memref<8x8x!tpu.dma_semaphore, #tpu.memory_space<semaphore_mem>> -> memref<1x1x!tpu.dma_semaphore, #tpu.memory_space<semaphore_mem>>
    %153 = tpu.memref_squeeze %152 : memref<1x1x!tpu.dma_semaphore, #tpu.memory_space<semaphore_mem>> -> memref<!tpu.dma_semaphore, #tpu.memory_space<semaphore_mem>>
    tpu.enqueue_dma source(%150 : memref<1x32xf32, #tpu.memory_space<any>>) target(%151 : memref<1x32xf32, #tpu.memory_space<vmem>>) target_semaphore(%153 : memref<!tpu.dma_semaphore, #tpu.memory_space<semaphore_mem>>)
    %c1_i32_120 = arith.constant 1 : i32
    %154 = arith.addi %0, %c1_i32_120 : i32
    %c8_i32_121 = arith.constant 8 : i32
    %155 = arith.muli %154, %c8_i32_121 : i32
    %c2_i32_122 = arith.constant 2 : i32
    %156 = arith.addi %155, %c2_i32_122 : i32
    %157 = arith.index_cast %156 : i32 to index
    %158 = memref.load %arg1[%157] : memref<64xi32, #tpu.memory_space<smem>>
    %c2_i32_123 = arith.constant 2 : i32
    %c1_i32_124 = arith.constant 1 : i32
    %c0_i32_125 = arith.constant 0 : i32
    %159 = tpu.memref_slice %arg3[%158, %c0_i32_125] : memref<100x32xf32, #tpu.memory_space<any>> -> memref<1x32xf32, #tpu.memory_space<any>>
    %c17_i32 = arith.constant 17 : i32
    %c0_i32_126 = arith.constant 0 : i32
    %160 = tpu.memref_slice %arg10[%c17_i32, %c0_i32_126] : memref<64x32xf32, #tpu.memory_space<vmem>> -> memref<1x32xf32, #tpu.memory_space<vmem>>
    %161 = tpu.memref_slice %arg12[%c2_i32_123, %c1_i32_124] : memref<8x8x!tpu.dma_semaphore, #tpu.memory_space<semaphore_mem>> -> memref<1x1x!tpu.dma_semaphore, #tpu.memory_space<semaphore_mem>>
    %162 = tpu.memref_squeeze %161 : memref<1x1x!tpu.dma_semaphore, #tpu.memory_space<semaphore_mem>> -> memref<!tpu.dma_semaphore, #tpu.memory_space<semaphore_mem>>
    tpu.enqueue_dma source(%159 : memref<1x32xf32, #tpu.memory_space<any>>) target(%160 : memref<1x32xf32, #tpu.memory_space<vmem>>) target_semaphore(%162 : memref<!tpu.dma_semaphore, #tpu.memory_space<semaphore_mem>>)
    %c2_i32_127 = arith.constant 2 : i32
    %163 = arith.addi %0, %c2_i32_127 : i32
    %c8_i32_128 = arith.constant 8 : i32
    %164 = arith.muli %163, %c8_i32_128 : i32
    %c2_i32_129 = arith.constant 2 : i32
    %165 = arith.addi %164, %c2_i32_129 : i32
    %166 = arith.index_cast %165 : i32 to index
    %167 = memref.load %arg1[%166] : memref<64xi32, #tpu.memory_space<smem>>
    %c2_i32_130 = arith.constant 2 : i32
    %c2_i32_131 = arith.constant 2 : i32
    %c0_i32_132 = arith.constant 0 : i32
    %168 = tpu.memref_slice %arg3[%167, %c0_i32_132] : memref<100x32xf32, #tpu.memory_space<any>> -> memref<1x32xf32, #tpu.memory_space<any>>
    %c18_i32 = arith.constant 18 : i32
    %c0_i32_133 = arith.constant 0 : i32
    %169 = tpu.memref_slice %arg10[%c18_i32, %c0_i32_133] : memref<64x32xf32, #tpu.memory_space<vmem>> -> memref<1x32xf32, #tpu.memory_space<vmem>>
    %170 = tpu.memref_slice %arg12[%c2_i32_130, %c2_i32_131] : memref<8x8x!tpu.dma_semaphore, #tpu.memory_space<semaphore_mem>> -> memref<1x1x!tpu.dma_semaphore, #tpu.memory_space<semaphore_mem>>
    %171 = tpu.memref_squeeze %170 : memref<1x1x!tpu.dma_semaphore, #tpu.memory_space<semaphore_mem>> -> memref<!tpu.dma_semaphore, #tpu.memory_space<semaphore_mem>>
    tpu.enqueue_dma source(%168 : memref<1x32xf32, #tpu.memory_space<any>>) target(%169 : memref<1x32xf32, #tpu.memory_space<vmem>>) target_semaphore(%171 : memref<!tpu.dma_semaphore, #tpu.memory_space<semaphore_mem>>)
    %c3_i32_134 = arith.constant 3 : i32
    %172 = arith.addi %0, %c3_i32_134 : i32
    %c8_i32_135 = arith.constant 8 : i32
    %173 = arith.muli %172, %c8_i32_135 : i32
    %c2_i32_136 = arith.constant 2 : i32
    %174 = arith.addi %173, %c2_i32_136 : i32
    %175 = arith.index_cast %174 : i32 to index
    %176 = memref.load %arg1[%175] : memref<64xi32, #tpu.memory_space<smem>>
    %c2_i32_137 = arith.constant 2 : i32
    %c3_i32_138 = arith.constant 3 : i32
    %c0_i32_139 = arith.constant 0 : i32
    %177 = tpu.memref_slice %arg3[%176, %c0_i32_139] : memref<100x32xf32, #tpu.memory_space<any>> -> memref<1x32xf32, #tpu.memory_space<any>>
    %c19_i32 = arith.constant 19 : i32
    %c0_i32_140 = arith.constant 0 : i32
    %178 = tpu.memref_slice %arg10[%c19_i32, %c0_i32_140] : memref<64x32xf32, #tpu.memory_space<vmem>> -> memref<1x32xf32, #tpu.memory_space<vmem>>
    %179 = tpu.memref_slice %arg12[%c2_i32_137, %c3_i32_138] : memref<8x8x!tpu.dma_semaphore, #tpu.memory_space<semaphore_mem>> -> memref<1x1x!tpu.dma_semaphore, #tpu.memory_space<semaphore_mem>>
    %180 = tpu.memref_squeeze %179 : memref<1x1x!tpu.dma_semaphore, #tpu.memory_space<semaphore_mem>> -> memref<!tpu.dma_semaphore, #tpu.memory_space<semaphore_mem>>
    tpu.enqueue_dma source(%177 : memref<1x32xf32, #tpu.memory_space<any>>) target(%178 : memref<1x32xf32, #tpu.memory_space<vmem>>) target_semaphore(%180 : memref<!tpu.dma_semaphore, #tpu.memory_space<semaphore_mem>>)
    %c4_i32_141 = arith.constant 4 : i32
    %181 = arith.addi %0, %c4_i32_141 : i32
    %c8_i32_142 = arith.constant 8 : i32
    %182 = arith.muli %181, %c8_i32_142 : i32
    %c2_i32_143 = arith.constant 2 : i32
    %183 = arith.addi %182, %c2_i32_143 : i32
    %184 = arith.index_cast %183 : i32 to index
    %185 = memref.load %arg1[%184] : memref<64xi32, #tpu.memory_space<smem>>
    %c2_i32_144 = arith.constant 2 : i32
    %c4_i32_145 = arith.constant 4 : i32
    %c0_i32_146 = arith.constant 0 : i32
    %186 = tpu.memref_slice %arg3[%185, %c0_i32_146] : memref<100x32xf32, #tpu.memory_space<any>> -> memref<1x32xf32, #tpu.memory_space<any>>
    %c20_i32 = arith.constant 20 : i32
    %c0_i32_147 = arith.constant 0 : i32
    %187 = tpu.memref_slice %arg10[%c20_i32, %c0_i32_147] : memref<64x32xf32, #tpu.memory_space<vmem>> -> memref<1x32xf32, #tpu.memory_space<vmem>>
    %188 = tpu.memref_slice %arg12[%c2_i32_144, %c4_i32_145] : memref<8x8x!tpu.dma_semaphore, #tpu.memory_space<semaphore_mem>> -> memref<1x1x!tpu.dma_semaphore, #tpu.memory_space<semaphore_mem>>
    %189 = tpu.memref_squeeze %188 : memref<1x1x!tpu.dma_semaphore, #tpu.memory_space<semaphore_mem>> -> memref<!tpu.dma_semaphore, #tpu.memory_space<semaphore_mem>>
    tpu.enqueue_dma source(%186 : memref<1x32xf32, #tpu.memory_space<any>>) target(%187 : memref<1x32xf32, #tpu.memory_space<vmem>>) target_semaphore(%189 : memref<!tpu.dma_semaphore, #tpu.memory_space<semaphore_mem>>)
    %c5_i32_148 = arith.constant 5 : i32
    %190 = arith.addi %0, %c5_i32_148 : i32
    %c8_i32_149 = arith.constant 8 : i32
    %191 = arith.muli %190, %c8_i32_149 : i32
    %c2_i32_150 = arith.constant 2 : i32
    %192 = arith.addi %191, %c2_i32_150 : i32
    %193 = arith.index_cast %192 : i32 to index
    %194 = memref.load %arg1[%193] : memref<64xi32, #tpu.memory_space<smem>>
    %c2_i32_151 = arith.constant 2 : i32
    %c5_i32_152 = arith.constant 5 : i32
    %c0_i32_153 = arith.constant 0 : i32
    %195 = tpu.memref_slice %arg3[%194, %c0_i32_153] : memref<100x32xf32, #tpu.memory_space<any>> -> memref<1x32xf32, #tpu.memory_space<any>>
    %c21_i32 = arith.constant 21 : i32
    %c0_i32_154 = arith.constant 0 : i32
    %196 = tpu.memref_slice %arg10[%c21_i32, %c0_i32_154] : memref<64x32xf32, #tpu.memory_space<vmem>> -> memref<1x32xf32, #tpu.memory_space<vmem>>
    %197 = tpu.memref_slice %arg12[%c2_i32_151, %c5_i32_152] : memref<8x8x!tpu.dma_semaphore, #tpu.memory_space<semaphore_mem>> -> memref<1x1x!tpu.dma_semaphore, #tpu.memory_space<semaphore_mem>>
    %198 = tpu.memref_squeeze %197 : memref<1x1x!tpu.dma_semaphore, #tpu.memory_space<semaphore_mem>> -> memref<!tpu.dma_semaphore, #tpu.memory_space<semaphore_mem>>
    tpu.enqueue_dma source(%195 : memref<1x32xf32, #tpu.memory_space<any>>) target(%196 : memref<1x32xf32, #tpu.memory_space<vmem>>) target_semaphore(%198 : memref<!tpu.dma_semaphore, #tpu.memory_space<semaphore_mem>>)
    %c6_i32_155 = arith.constant 6 : i32
    %199 = arith.addi %0, %c6_i32_155 : i32
    %c8_i32_156 = arith.constant 8 : i32
    %200 = arith.muli %199, %c8_i32_156 : i32
    %c2_i32_157 = arith.constant 2 : i32
    %201 = arith.addi %200, %c2_i32_157 : i32
    %202 = arith.index_cast %201 : i32 to index
    %203 = memref.load %arg1[%202] : memref<64xi32, #tpu.memory_space<smem>>
    %c2_i32_158 = arith.constant 2 : i32
    %c6_i32_159 = arith.constant 6 : i32
    %c0_i32_160 = arith.constant 0 : i32
    %204 = tpu.memref_slice %arg3[%203, %c0_i32_160] : memref<100x32xf32, #tpu.memory_space<any>> -> memref<1x32xf32, #tpu.memory_space<any>>
    %c22_i32 = arith.constant 22 : i32
    %c0_i32_161 = arith.constant 0 : i32
    %205 = tpu.memref_slice %arg10[%c22_i32, %c0_i32_161] : memref<64x32xf32, #tpu.memory_space<vmem>> -> memref<1x32xf32, #tpu.memory_space<vmem>>
    %206 = tpu.memref_slice %arg12[%c2_i32_158, %c6_i32_159] : memref<8x8x!tpu.dma_semaphore, #tpu.memory_space<semaphore_mem>> -> memref<1x1x!tpu.dma_semaphore, #tpu.memory_space<semaphore_mem>>
    %207 = tpu.memref_squeeze %206 : memref<1x1x!tpu.dma_semaphore, #tpu.memory_space<semaphore_mem>> -> memref<!tpu.dma_semaphore, #tpu.memory_space<semaphore_mem>>
    tpu.enqueue_dma source(%204 : memref<1x32xf32, #tpu.memory_space<any>>) target(%205 : memref<1x32xf32, #tpu.memory_space<vmem>>) target_semaphore(%207 : memref<!tpu.dma_semaphore, #tpu.memory_space<semaphore_mem>>)
    %c7_i32_162 = arith.constant 7 : i32
    %208 = arith.addi %0, %c7_i32_162 : i32
    %c8_i32_163 = arith.constant 8 : i32
    %209 = arith.muli %208, %c8_i32_163 : i32
    %c2_i32_164 = arith.constant 2 : i32
    %210 = arith.addi %209, %c2_i32_164 : i32
    %211 = arith.index_cast %210 : i32 to index
    %212 = memref.load %arg1[%211] : memref<64xi32, #tpu.memory_space<smem>>
    %c2_i32_165 = arith.constant 2 : i32
    %c7_i32_166 = arith.constant 7 : i32
    %c0_i32_167 = arith.constant 0 : i32
    %213 = tpu.memref_slice %arg3[%212, %c0_i32_167] : memref<100x32xf32, #tpu.memory_space<any>> -> memref<1x32xf32, #tpu.memory_space<any>>
    %c23_i32 = arith.constant 23 : i32
    %c0_i32_168 = arith.constant 0 : i32
    %214 = tpu.memref_slice %arg10[%c23_i32, %c0_i32_168] : memref<64x32xf32, #tpu.memory_space<vmem>> -> memref<1x32xf32, #tpu.memory_space<vmem>>
    %215 = tpu.memref_slice %arg12[%c2_i32_165, %c7_i32_166] : memref<8x8x!tpu.dma_semaphore, #tpu.memory_space<semaphore_mem>> -> memref<1x1x!tpu.dma_semaphore, #tpu.memory_space<semaphore_mem>>
    %216 = tpu.memref_squeeze %215 : memref<1x1x!tpu.dma_semaphore, #tpu.memory_space<semaphore_mem>> -> memref<!tpu.dma_semaphore, #tpu.memory_space<semaphore_mem>>
    tpu.enqueue_dma source(%213 : memref<1x32xf32, #tpu.memory_space<any>>) target(%214 : memref<1x32xf32, #tpu.memory_space<vmem>>) target_semaphore(%216 : memref<!tpu.dma_semaphore, #tpu.memory_space<semaphore_mem>>)
    %c0_i32_169 = arith.constant 0 : i32
    %217 = arith.addi %0, %c0_i32_169 : i32
    %c8_i32_170 = arith.constant 8 : i32
    %218 = arith.muli %217, %c8_i32_170 : i32
    %c3_i32_171 = arith.constant 3 : i32
    %219 = arith.addi %218, %c3_i32_171 : i32
    %220 = arith.index_cast %219 : i32 to index
    %221 = memref.load %arg1[%220] : memref<64xi32, #tpu.memory_space<smem>>
    %c3_i32_172 = arith.constant 3 : i32
    %c0_i32_173 = arith.constant 0 : i32
    %c0_i32_174 = arith.constant 0 : i32
    %222 = tpu.memref_slice %arg3[%221, %c0_i32_174] : memref<100x32xf32, #tpu.memory_space<any>> -> memref<1x32xf32, #tpu.memory_space<any>>
    %c24_i32 = arith.constant 24 : i32
    %c0_i32_175 = arith.constant 0 : i32
    %223 = tpu.memref_slice %arg10[%c24_i32, %c0_i32_175] : memref<64x32xf32, #tpu.memory_space<vmem>> -> memref<1x32xf32, #tpu.memory_space<vmem>>
    %224 = tpu.memref_slice %arg12[%c3_i32_172, %c0_i32_173] : memref<8x8x!tpu.dma_semaphore, #tpu.memory_space<semaphore_mem>> -> memref<1x1x!tpu.dma_semaphore, #tpu.memory_space<semaphore_mem>>
    %225 = tpu.memref_squeeze %224 : memref<1x1x!tpu.dma_semaphore, #tpu.memory_space<semaphore_mem>> -> memref<!tpu.dma_semaphore, #tpu.memory_space<semaphore_mem>>
    tpu.enqueue_dma source(%222 : memref<1x32xf32, #tpu.memory_space<any>>) target(%223 : memref<1x32xf32, #tpu.memory_space<vmem>>) target_semaphore(%225 : memref<!tpu.dma_semaphore, #tpu.memory_space<semaphore_mem>>)
    %c1_i32_176 = arith.constant 1 : i32
    %226 = arith.addi %0, %c1_i32_176 : i32
    %c8_i32_177 = arith.constant 8 : i32
    %227 = arith.muli %226, %c8_i32_177 : i32
    %c3_i32_178 = arith.constant 3 : i32
    %228 = arith.addi %227, %c3_i32_178 : i32
    %229 = arith.index_cast %228 : i32 to index
    %230 = memref.load %arg1[%229] : memref<64xi32, #tpu.memory_space<smem>>
    %c3_i32_179 = arith.constant 3 : i32
    %c1_i32_180 = arith.constant 1 : i32
    %c0_i32_181 = arith.constant 0 : i32
    %231 = tpu.memref_slice %arg3[%230, %c0_i32_181] : memref<100x32xf32, #tpu.memory_space<any>> -> memref<1x32xf32, #tpu.memory_space<any>>
    %c25_i32 = arith.constant 25 : i32
    %c0_i32_182 = arith.constant 0 : i32
    %232 = tpu.memref_slice %arg10[%c25_i32, %c0_i32_182] : memref<64x32xf32, #tpu.memory_space<vmem>> -> memref<1x32xf32, #tpu.memory_space<vmem>>
    %233 = tpu.memref_slice %arg12[%c3_i32_179, %c1_i32_180] : memref<8x8x!tpu.dma_semaphore, #tpu.memory_space<semaphore_mem>> -> memref<1x1x!tpu.dma_semaphore, #tpu.memory_space<semaphore_mem>>
    %234 = tpu.memref_squeeze %233 : memref<1x1x!tpu.dma_semaphore, #tpu.memory_space<semaphore_mem>> -> memref<!tpu.dma_semaphore, #tpu.memory_space<semaphore_mem>>
    tpu.enqueue_dma source(%231 : memref<1x32xf32, #tpu.memory_space<any>>) target(%232 : memref<1x32xf32, #tpu.memory_space<vmem>>) target_semaphore(%234 : memref<!tpu.dma_semaphore, #tpu.memory_space<semaphore_mem>>)
    %c2_i32_183 = arith.constant 2 : i32
    %235 = arith.addi %0, %c2_i32_183 : i32
    %c8_i32_184 = arith.constant 8 : i32
    %236 = arith.muli %235, %c8_i32_184 : i32
    %c3_i32_185 = arith.constant 3 : i32
    %237 = arith.addi %236, %c3_i32_185 : i32
    %238 = arith.index_cast %237 : i32 to index
    %239 = memref.load %arg1[%238] : memref<64xi32, #tpu.memory_space<smem>>
    %c3_i32_186 = arith.constant 3 : i32
    %c2_i32_187 = arith.constant 2 : i32
    %c0_i32_188 = arith.constant 0 : i32
    %240 = tpu.memref_slice %arg3[%239, %c0_i32_188] : memref<100x32xf32, #tpu.memory_space<any>> -> memref<1x32xf32, #tpu.memory_space<any>>
    %c26_i32 = arith.constant 26 : i32
    %c0_i32_189 = arith.constant 0 : i32
    %241 = tpu.memref_slice %arg10[%c26_i32, %c0_i32_189] : memref<64x32xf32, #tpu.memory_space<vmem>> -> memref<1x32xf32, #tpu.memory_space<vmem>>
    %242 = tpu.memref_slice %arg12[%c3_i32_186, %c2_i32_187] : memref<8x8x!tpu.dma_semaphore, #tpu.memory_space<semaphore_mem>> -> memref<1x1x!tpu.dma_semaphore, #tpu.memory_space<semaphore_mem>>
    %243 = tpu.memref_squeeze %242 : memref<1x1x!tpu.dma_semaphore, #tpu.memory_space<semaphore_mem>> -> memref<!tpu.dma_semaphore, #tpu.memory_space<semaphore_mem>>
    tpu.enqueue_dma source(%240 : memref<1x32xf32, #tpu.memory_space<any>>) target(%241 : memref<1x32xf32, #tpu.memory_space<vmem>>) target_semaphore(%243 : memref<!tpu.dma_semaphore, #tpu.memory_space<semaphore_mem>>)
    %c3_i32_190 = arith.constant 3 : i32
    %244 = arith.addi %0, %c3_i32_190 : i32
    %c8_i32_191 = arith.constant 8 : i32
    %245 = arith.muli %244, %c8_i32_191 : i32
    %c3_i32_192 = arith.constant 3 : i32
    %246 = arith.addi %245, %c3_i32_192 : i32
    %247 = arith.index_cast %246 : i32 to index
    %248 = memref.load %arg1[%247] : memref<64xi32, #tpu.memory_space<smem>>
    %c3_i32_193 = arith.constant 3 : i32
    %c3_i32_194 = arith.constant 3 : i32
    %c0_i32_195 = arith.constant 0 : i32
    %249 = tpu.memref_slice %arg3[%248, %c0_i32_195] : memref<100x32xf32, #tpu.memory_space<any>> -> memref<1x32xf32, #tpu.memory_space<any>>
    %c27_i32 = arith.constant 27 : i32
    %c0_i32_196 = arith.constant 0 : i32
    %250 = tpu.memref_slice %arg10[%c27_i32, %c0_i32_196] : memref<64x32xf32, #tpu.memory_space<vmem>> -> memref<1x32xf32, #tpu.memory_space<vmem>>
    %251 = tpu.memref_slice %arg12[%c3_i32_193, %c3_i32_194] : memref<8x8x!tpu.dma_semaphore, #tpu.memory_space<semaphore_mem>> -> memref<1x1x!tpu.dma_semaphore, #tpu.memory_space<semaphore_mem>>
    %252 = tpu.memref_squeeze %251 : memref<1x1x!tpu.dma_semaphore, #tpu.memory_space<semaphore_mem>> -> memref<!tpu.dma_semaphore, #tpu.memory_space<semaphore_mem>>
    tpu.enqueue_dma source(%249 : memref<1x32xf32, #tpu.memory_space<any>>) target(%250 : memref<1x32xf32, #tpu.memory_space<vmem>>) target_semaphore(%252 : memref<!tpu.dma_semaphore, #tpu.memory_space<semaphore_mem>>)
    %c4_i32_197 = arith.constant 4 : i32
    %253 = arith.addi %0, %c4_i32_197 : i32
    %c8_i32_198 = arith.constant 8 : i32
    %254 = arith.muli %253, %c8_i32_198 : i32
    %c3_i32_199 = arith.constant 3 : i32
    %255 = arith.addi %254, %c3_i32_199 : i32
    %256 = arith.index_cast %255 : i32 to index
    %257 = memref.load %arg1[%256] : memref<64xi32, #tpu.memory_space<smem>>
    %c3_i32_200 = arith.constant 3 : i32
    %c4_i32_201 = arith.constant 4 : i32
    %c0_i32_202 = arith.constant 0 : i32
    %258 = tpu.memref_slice %arg3[%257, %c0_i32_202] : memref<100x32xf32, #tpu.memory_space<any>> -> memref<1x32xf32, #tpu.memory_space<any>>
    %c28_i32 = arith.constant 28 : i32
    %c0_i32_203 = arith.constant 0 : i32
    %259 = tpu.memref_slice %arg10[%c28_i32, %c0_i32_203] : memref<64x32xf32, #tpu.memory_space<vmem>> -> memref<1x32xf32, #tpu.memory_space<vmem>>
    %260 = tpu.memref_slice %arg12[%c3_i32_200, %c4_i32_201] : memref<8x8x!tpu.dma_semaphore, #tpu.memory_space<semaphore_mem>> -> memref<1x1x!tpu.dma_semaphore, #tpu.memory_space<semaphore_mem>>
    %261 = tpu.memref_squeeze %260 : memref<1x1x!tpu.dma_semaphore, #tpu.memory_space<semaphore_mem>> -> memref<!tpu.dma_semaphore, #tpu.memory_space<semaphore_mem>>
    tpu.enqueue_dma source(%258 : memref<1x32xf32, #tpu.memory_space<any>>) target(%259 : memref<1x32xf32, #tpu.memory_space<vmem>>) target_semaphore(%261 : memref<!tpu.dma_semaphore, #tpu.memory_space<semaphore_mem>>)
    %c5_i32_204 = arith.constant 5 : i32
    %262 = arith.addi %0, %c5_i32_204 : i32
    %c8_i32_205 = arith.constant 8 : i32
    %263 = arith.muli %262, %c8_i32_205 : i32
    %c3_i32_206 = arith.constant 3 : i32
    %264 = arith.addi %263, %c3_i32_206 : i32
    %265 = arith.index_cast %264 : i32 to index
    %266 = memref.load %arg1[%265] : memref<64xi32, #tpu.memory_space<smem>>
    %c3_i32_207 = arith.constant 3 : i32
    %c5_i32_208 = arith.constant 5 : i32
    %c0_i32_209 = arith.constant 0 : i32
    %267 = tpu.memref_slice %arg3[%266, %c0_i32_209] : memref<100x32xf32, #tpu.memory_space<any>> -> memref<1x32xf32, #tpu.memory_space<any>>
    %c29_i32 = arith.constant 29 : i32
    %c0_i32_210 = arith.constant 0 : i32
    %268 = tpu.memref_slice %arg10[%c29_i32, %c0_i32_210] : memref<64x32xf32, #tpu.memory_space<vmem>> -> memref<1x32xf32, #tpu.memory_space<vmem>>
    %269 = tpu.memref_slice %arg12[%c3_i32_207, %c5_i32_208] : memref<8x8x!tpu.dma_semaphore, #tpu.memory_space<semaphore_mem>> -> memref<1x1x!tpu.dma_semaphore, #tpu.memory_space<semaphore_mem>>
    %270 = tpu.memref_squeeze %269 : memref<1x1x!tpu.dma_semaphore, #tpu.memory_space<semaphore_mem>> -> memref<!tpu.dma_semaphore, #tpu.memory_space<semaphore_mem>>
    tpu.enqueue_dma source(%267 : memref<1x32xf32, #tpu.memory_space<any>>) target(%268 : memref<1x32xf32, #tpu.memory_space<vmem>>) target_semaphore(%270 : memref<!tpu.dma_semaphore, #tpu.memory_space<semaphore_mem>>)
    %c6_i32_211 = arith.constant 6 : i32
    %271 = arith.addi %0, %c6_i32_211 : i32
    %c8_i32_212 = arith.constant 8 : i32
    %272 = arith.muli %271, %c8_i32_212 : i32
    %c3_i32_213 = arith.constant 3 : i32
    %273 = arith.addi %272, %c3_i32_213 : i32
    %274 = arith.index_cast %273 : i32 to index
    %275 = memref.load %arg1[%274] : memref<64xi32, #tpu.memory_space<smem>>
    %c3_i32_214 = arith.constant 3 : i32
    %c6_i32_215 = arith.constant 6 : i32
    %c0_i32_216 = arith.constant 0 : i32
    %276 = tpu.memref_slice %arg3[%275, %c0_i32_216] : memref<100x32xf32, #tpu.memory_space<any>> -> memref<1x32xf32, #tpu.memory_space<any>>
    %c30_i32 = arith.constant 30 : i32
    %c0_i32_217 = arith.constant 0 : i32
    %277 = tpu.memref_slice %arg10[%c30_i32, %c0_i32_217] : memref<64x32xf32, #tpu.memory_space<vmem>> -> memref<1x32xf32, #tpu.memory_space<vmem>>
    %278 = tpu.memref_slice %arg12[%c3_i32_214, %c6_i32_215] : memref<8x8x!tpu.dma_semaphore, #tpu.memory_space<semaphore_mem>> -> memref<1x1x!tpu.dma_semaphore, #tpu.memory_space<semaphore_mem>>
    %279 = tpu.memref_squeeze %278 : memref<1x1x!tpu.dma_semaphore, #tpu.memory_space<semaphore_mem>> -> memref<!tpu.dma_semaphore, #tpu.memory_space<semaphore_mem>>
    tpu.enqueue_dma source(%276 : memref<1x32xf32, #tpu.memory_space<any>>) target(%277 : memref<1x32xf32, #tpu.memory_space<vmem>>) target_semaphore(%279 : memref<!tpu.dma_semaphore, #tpu.memory_space<semaphore_mem>>)
    %c7_i32_218 = arith.constant 7 : i32
    %280 = arith.addi %0, %c7_i32_218 : i32
    %c8_i32_219 = arith.constant 8 : i32
    %281 = arith.muli %280, %c8_i32_219 : i32
    %c3_i32_220 = arith.constant 3 : i32
    %282 = arith.addi %281, %c3_i32_220 : i32
    %283 = arith.index_cast %282 : i32 to index
    %284 = memref.load %arg1[%283] : memref<64xi32, #tpu.memory_space<smem>>
    %c3_i32_221 = arith.constant 3 : i32
    %c7_i32_222 = arith.constant 7 : i32
    %c0_i32_223 = arith.constant 0 : i32
    %285 = tpu.memref_slice %arg3[%284, %c0_i32_223] : memref<100x32xf32, #tpu.memory_space<any>> -> memref<1x32xf32, #tpu.memory_space<any>>
    %c31_i32 = arith.constant 31 : i32
    %c0_i32_224 = arith.constant 0 : i32
    %286 = tpu.memref_slice %arg10[%c31_i32, %c0_i32_224] : memref<64x32xf32, #tpu.memory_space<vmem>> -> memref<1x32xf32, #tpu.memory_space<vmem>>
    %287 = tpu.memref_slice %arg12[%c3_i32_221, %c7_i32_222] : memref<8x8x!tpu.dma_semaphore, #tpu.memory_space<semaphore_mem>> -> memref<1x1x!tpu.dma_semaphore, #tpu.memory_space<semaphore_mem>>
    %288 = tpu.memref_squeeze %287 : memref<1x1x!tpu.dma_semaphore, #tpu.memory_space<semaphore_mem>> -> memref<!tpu.dma_semaphore, #tpu.memory_space<semaphore_mem>>
    tpu.enqueue_dma source(%285 : memref<1x32xf32, #tpu.memory_space<any>>) target(%286 : memref<1x32xf32, #tpu.memory_space<vmem>>) target_semaphore(%288 : memref<!tpu.dma_semaphore, #tpu.memory_space<semaphore_mem>>)
    %c0_i32_225 = arith.constant 0 : i32
    %289 = arith.addi %0, %c0_i32_225 : i32
    %c8_i32_226 = arith.constant 8 : i32
    %290 = arith.muli %289, %c8_i32_226 : i32
    %c4_i32_227 = arith.constant 4 : i32
    %291 = arith.addi %290, %c4_i32_227 : i32
    %292 = arith.index_cast %291 : i32 to index
    %293 = memref.load %arg1[%292] : memref<64xi32, #tpu.memory_space<smem>>
    %c4_i32_228 = arith.constant 4 : i32
    %c0_i32_229 = arith.constant 0 : i32
    %c0_i32_230 = arith.constant 0 : i32
    %294 = tpu.memref_slice %arg3[%293, %c0_i32_230] : memref<100x32xf32, #tpu.memory_space<any>> -> memref<1x32xf32, #tpu.memory_space<any>>
    %c32_i32 = arith.constant 32 : i32
    %c0_i32_231 = arith.constant 0 : i32
    %295 = tpu.memref_slice %arg10[%c32_i32, %c0_i32_231] : memref<64x32xf32, #tpu.memory_space<vmem>> -> memref<1x32xf32, #tpu.memory_space<vmem>>
    %296 = tpu.memref_slice %arg12[%c4_i32_228, %c0_i32_229] : memref<8x8x!tpu.dma_semaphore, #tpu.memory_space<semaphore_mem>> -> memref<1x1x!tpu.dma_semaphore, #tpu.memory_space<semaphore_mem>>
    %297 = tpu.memref_squeeze %296 : memref<1x1x!tpu.dma_semaphore, #tpu.memory_space<semaphore_mem>> -> memref<!tpu.dma_semaphore, #tpu.memory_space<semaphore_mem>>
    tpu.enqueue_dma source(%294 : memref<1x32xf32, #tpu.memory_space<any>>) target(%295 : memref<1x32xf32, #tpu.memory_space<vmem>>) target_semaphore(%297 : memref<!tpu.dma_semaphore, #tpu.memory_space<semaphore_mem>>)
    %c1_i32_232 = arith.constant 1 : i32
    %298 = arith.addi %0, %c1_i32_232 : i32
    %c8_i32_233 = arith.constant 8 : i32
    %299 = arith.muli %298, %c8_i32_233 : i32
    %c4_i32_234 = arith.constant 4 : i32
    %300 = arith.addi %299, %c4_i32_234 : i32
    %301 = arith.index_cast %300 : i32 to index
    %302 = memref.load %arg1[%301] : memref<64xi32, #tpu.memory_space<smem>>
    %c4_i32_235 = arith.constant 4 : i32
    %c1_i32_236 = arith.constant 1 : i32
    %c0_i32_237 = arith.constant 0 : i32
    %303 = tpu.memref_slice %arg3[%302, %c0_i32_237] : memref<100x32xf32, #tpu.memory_space<any>> -> memref<1x32xf32, #tpu.memory_space<any>>
    %c33_i32 = arith.constant 33 : i32
    %c0_i32_238 = arith.constant 0 : i32
    %304 = tpu.memref_slice %arg10[%c33_i32, %c0_i32_238] : memref<64x32xf32, #tpu.memory_space<vmem>> -> memref<1x32xf32, #tpu.memory_space<vmem>>
    %305 = tpu.memref_slice %arg12[%c4_i32_235, %c1_i32_236] : memref<8x8x!tpu.dma_semaphore, #tpu.memory_space<semaphore_mem>> -> memref<1x1x!tpu.dma_semaphore, #tpu.memory_space<semaphore_mem>>
    %306 = tpu.memref_squeeze %305 : memref<1x1x!tpu.dma_semaphore, #tpu.memory_space<semaphore_mem>> -> memref<!tpu.dma_semaphore, #tpu.memory_space<semaphore_mem>>
    tpu.enqueue_dma source(%303 : memref<1x32xf32, #tpu.memory_space<any>>) target(%304 : memref<1x32xf32, #tpu.memory_space<vmem>>) target_semaphore(%306 : memref<!tpu.dma_semaphore, #tpu.memory_space<semaphore_mem>>)
    %c2_i32_239 = arith.constant 2 : i32
    %307 = arith.addi %0, %c2_i32_239 : i32
    %c8_i32_240 = arith.constant 8 : i32
    %308 = arith.muli %307, %c8_i32_240 : i32
    %c4_i32_241 = arith.constant 4 : i32
    %309 = arith.addi %308, %c4_i32_241 : i32
    %310 = arith.index_cast %309 : i32 to index
    %311 = memref.load %arg1[%310] : memref<64xi32, #tpu.memory_space<smem>>
    %c4_i32_242 = arith.constant 4 : i32
    %c2_i32_243 = arith.constant 2 : i32
    %c0_i32_244 = arith.constant 0 : i32
    %312 = tpu.memref_slice %arg3[%311, %c0_i32_244] : memref<100x32xf32, #tpu.memory_space<any>> -> memref<1x32xf32, #tpu.memory_space<any>>
    %c34_i32 = arith.constant 34 : i32
    %c0_i32_245 = arith.constant 0 : i32
    %313 = tpu.memref_slice %arg10[%c34_i32, %c0_i32_245] : memref<64x32xf32, #tpu.memory_space<vmem>> -> memref<1x32xf32, #tpu.memory_space<vmem>>
    %314 = tpu.memref_slice %arg12[%c4_i32_242, %c2_i32_243] : memref<8x8x!tpu.dma_semaphore, #tpu.memory_space<semaphore_mem>> -> memref<1x1x!tpu.dma_semaphore, #tpu.memory_space<semaphore_mem>>
    %315 = tpu.memref_squeeze %314 : memref<1x1x!tpu.dma_semaphore, #tpu.memory_space<semaphore_mem>> -> memref<!tpu.dma_semaphore, #tpu.memory_space<semaphore_mem>>
    tpu.enqueue_dma source(%312 : memref<1x32xf32, #tpu.memory_space<any>>) target(%313 : memref<1x32xf32, #tpu.memory_space<vmem>>) target_semaphore(%315 : memref<!tpu.dma_semaphore, #tpu.memory_space<semaphore_mem>>)
    %c3_i32_246 = arith.constant 3 : i32
    %316 = arith.addi %0, %c3_i32_246 : i32
    %c8_i32_247 = arith.constant 8 : i32
    %317 = arith.muli %316, %c8_i32_247 : i32
    %c4_i32_248 = arith.constant 4 : i32
    %318 = arith.addi %317, %c4_i32_248 : i32
    %319 = arith.index_cast %318 : i32 to index
    %320 = memref.load %arg1[%319] : memref<64xi32, #tpu.memory_space<smem>>
    %c4_i32_249 = arith.constant 4 : i32
    %c3_i32_250 = arith.constant 3 : i32
    %c0_i32_251 = arith.constant 0 : i32
    %321 = tpu.memref_slice %arg3[%320, %c0_i32_251] : memref<100x32xf32, #tpu.memory_space<any>> -> memref<1x32xf32, #tpu.memory_space<any>>
    %c35_i32 = arith.constant 35 : i32
    %c0_i32_252 = arith.constant 0 : i32
    %322 = tpu.memref_slice %arg10[%c35_i32, %c0_i32_252] : memref<64x32xf32, #tpu.memory_space<vmem>> -> memref<1x32xf32, #tpu.memory_space<vmem>>
    %323 = tpu.memref_slice %arg12[%c4_i32_249, %c3_i32_250] : memref<8x8x!tpu.dma_semaphore, #tpu.memory_space<semaphore_mem>> -> memref<1x1x!tpu.dma_semaphore, #tpu.memory_space<semaphore_mem>>
    %324 = tpu.memref_squeeze %323 : memref<1x1x!tpu.dma_semaphore, #tpu.memory_space<semaphore_mem>> -> memref<!tpu.dma_semaphore, #tpu.memory_space<semaphore_mem>>
    tpu.enqueue_dma source(%321 : memref<1x32xf32, #tpu.memory_space<any>>) target(%322 : memref<1x32xf32, #tpu.memory_space<vmem>>) target_semaphore(%324 : memref<!tpu.dma_semaphore, #tpu.memory_space<semaphore_mem>>)
    %c4_i32_253 = arith.constant 4 : i32
    %325 = arith.addi %0, %c4_i32_253 : i32
    %c8_i32_254 = arith.constant 8 : i32
    %326 = arith.muli %325, %c8_i32_254 : i32
    %c4_i32_255 = arith.constant 4 : i32
    %327 = arith.addi %326, %c4_i32_255 : i32
    %328 = arith.index_cast %327 : i32 to index
    %329 = memref.load %arg1[%328] : memref<64xi32, #tpu.memory_space<smem>>
    %c4_i32_256 = arith.constant 4 : i32
    %c4_i32_257 = arith.constant 4 : i32
    %c0_i32_258 = arith.constant 0 : i32
    %330 = tpu.memref_slice %arg3[%329, %c0_i32_258] : memref<100x32xf32, #tpu.memory_space<any>> -> memref<1x32xf32, #tpu.memory_space<any>>
    %c36_i32 = arith.constant 36 : i32
    %c0_i32_259 = arith.constant 0 : i32
    %331 = tpu.memref_slice %arg10[%c36_i32, %c0_i32_259] : memref<64x32xf32, #tpu.memory_space<vmem>> -> memref<1x32xf32, #tpu.memory_space<vmem>>
    %332 = tpu.memref_slice %arg12[%c4_i32_256, %c4_i32_257] : memref<8x8x!tpu.dma_semaphore, #tpu.memory_space<semaphore_mem>> -> memref<1x1x!tpu.dma_semaphore, #tpu.memory_space<semaphore_mem>>
    %333 = tpu.memref_squeeze %332 : memref<1x1x!tpu.dma_semaphore, #tpu.memory_space<semaphore_mem>> -> memref<!tpu.dma_semaphore, #tpu.memory_space<semaphore_mem>>
    tpu.enqueue_dma source(%330 : memref<1x32xf32, #tpu.memory_space<any>>) target(%331 : memref<1x32xf32, #tpu.memory_space<vmem>>) target_semaphore(%333 : memref<!tpu.dma_semaphore, #tpu.memory_space<semaphore_mem>>)
    %c5_i32_260 = arith.constant 5 : i32
    %334 = arith.addi %0, %c5_i32_260 : i32
    %c8_i32_261 = arith.constant 8 : i32
    %335 = arith.muli %334, %c8_i32_261 : i32
    %c4_i32_262 = arith.constant 4 : i32
    %336 = arith.addi %335, %c4_i32_262 : i32
    %337 = arith.index_cast %336 : i32 to index
    %338 = memref.load %arg1[%337] : memref<64xi32, #tpu.memory_space<smem>>
    %c4_i32_263 = arith.constant 4 : i32
    %c5_i32_264 = arith.constant 5 : i32
    %c0_i32_265 = arith.constant 0 : i32
    %339 = tpu.memref_slice %arg3[%338, %c0_i32_265] : memref<100x32xf32, #tpu.memory_space<any>> -> memref<1x32xf32, #tpu.memory_space<any>>
    %c37_i32 = arith.constant 37 : i32
    %c0_i32_266 = arith.constant 0 : i32
    %340 = tpu.memref_slice %arg10[%c37_i32, %c0_i32_266] : memref<64x32xf32, #tpu.memory_space<vmem>> -> memref<1x32xf32, #tpu.memory_space<vmem>>
    %341 = tpu.memref_slice %arg12[%c4_i32_263, %c5_i32_264] : memref<8x8x!tpu.dma_semaphore, #tpu.memory_space<semaphore_mem>> -> memref<1x1x!tpu.dma_semaphore, #tpu.memory_space<semaphore_mem>>
    %342 = tpu.memref_squeeze %341 : memref<1x1x!tpu.dma_semaphore, #tpu.memory_space<semaphore_mem>> -> memref<!tpu.dma_semaphore, #tpu.memory_space<semaphore_mem>>
    tpu.enqueue_dma source(%339 : memref<1x32xf32, #tpu.memory_space<any>>) target(%340 : memref<1x32xf32, #tpu.memory_space<vmem>>) target_semaphore(%342 : memref<!tpu.dma_semaphore, #tpu.memory_space<semaphore_mem>>)
    %c6_i32_267 = arith.constant 6 : i32
    %343 = arith.addi %0, %c6_i32_267 : i32
    %c8_i32_268 = arith.constant 8 : i32
    %344 = arith.muli %343, %c8_i32_268 : i32
    %c4_i32_269 = arith.constant 4 : i32
    %345 = arith.addi %344, %c4_i32_269 : i32
    %346 = arith.index_cast %345 : i32 to index
    %347 = memref.load %arg1[%346] : memref<64xi32, #tpu.memory_space<smem>>
    %c4_i32_270 = arith.constant 4 : i32
    %c6_i32_271 = arith.constant 6 : i32
    %c0_i32_272 = arith.constant 0 : i32
    %348 = tpu.memref_slice %arg3[%347, %c0_i32_272] : memref<100x32xf32, #tpu.memory_space<any>> -> memref<1x32xf32, #tpu.memory_space<any>>
    %c38_i32 = arith.constant 38 : i32
    %c0_i32_273 = arith.constant 0 : i32
    %349 = tpu.memref_slice %arg10[%c38_i32, %c0_i32_273] : memref<64x32xf32, #tpu.memory_space<vmem>> -> memref<1x32xf32, #tpu.memory_space<vmem>>
    %350 = tpu.memref_slice %arg12[%c4_i32_270, %c6_i32_271] : memref<8x8x!tpu.dma_semaphore, #tpu.memory_space<semaphore_mem>> -> memref<1x1x!tpu.dma_semaphore, #tpu.memory_space<semaphore_mem>>
    %351 = tpu.memref_squeeze %350 : memref<1x1x!tpu.dma_semaphore, #tpu.memory_space<semaphore_mem>> -> memref<!tpu.dma_semaphore, #tpu.memory_space<semaphore_mem>>
    tpu.enqueue_dma source(%348 : memref<1x32xf32, #tpu.memory_space<any>>) target(%349 : memref<1x32xf32, #tpu.memory_space<vmem>>) target_semaphore(%351 : memref<!tpu.dma_semaphore, #tpu.memory_space<semaphore_mem>>)
    %c7_i32_274 = arith.constant 7 : i32
    %352 = arith.addi %0, %c7_i32_274 : i32
    %c8_i32_275 = arith.constant 8 : i32
    %353 = arith.muli %352, %c8_i32_275 : i32
    %c4_i32_276 = arith.constant 4 : i32
    %354 = arith.addi %353, %c4_i32_276 : i32
    %355 = arith.index_cast %354 : i32 to index
    %356 = memref.load %arg1[%355] : memref<64xi32, #tpu.memory_space<smem>>
    %c4_i32_277 = arith.constant 4 : i32
    %c7_i32_278 = arith.constant 7 : i32
    %c0_i32_279 = arith.constant 0 : i32
    %357 = tpu.memref_slice %arg3[%356, %c0_i32_279] : memref<100x32xf32, #tpu.memory_space<any>> -> memref<1x32xf32, #tpu.memory_space<any>>
    %c39_i32 = arith.constant 39 : i32
    %c0_i32_280 = arith.constant 0 : i32
    %358 = tpu.memref_slice %arg10[%c39_i32, %c0_i32_280] : memref<64x32xf32, #tpu.memory_space<vmem>> -> memref<1x32xf32, #tpu.memory_space<vmem>>
    %359 = tpu.memref_slice %arg12[%c4_i32_277, %c7_i32_278] : memref<8x8x!tpu.dma_semaphore, #tpu.memory_space<semaphore_mem>> -> memref<1x1x!tpu.dma_semaphore, #tpu.memory_space<semaphore_mem>>
    %360 = tpu.memref_squeeze %359 : memref<1x1x!tpu.dma_semaphore, #tpu.memory_space<semaphore_mem>> -> memref<!tpu.dma_semaphore, #tpu.memory_space<semaphore_mem>>
    tpu.enqueue_dma source(%357 : memref<1x32xf32, #tpu.memory_space<any>>) target(%358 : memref<1x32xf32, #tpu.memory_space<vmem>>) target_semaphore(%360 : memref<!tpu.dma_semaphore, #tpu.memory_space<semaphore_mem>>)
    %c0_i32_281 = arith.constant 0 : i32
    %361 = arith.addi %0, %c0_i32_281 : i32
    %c8_i32_282 = arith.constant 8 : i32
    %362 = arith.muli %361, %c8_i32_282 : i32
    %c5_i32_283 = arith.constant 5 : i32
    %363 = arith.addi %362, %c5_i32_283 : i32
    %364 = arith.index_cast %363 : i32 to index
    %365 = memref.load %arg1[%364] : memref<64xi32, #tpu.memory_space<smem>>
    %c5_i32_284 = arith.constant 5 : i32
    %c0_i32_285 = arith.constant 0 : i32
    %c0_i32_286 = arith.constant 0 : i32
    %366 = tpu.memref_slice %arg3[%365, %c0_i32_286] : memref<100x32xf32, #tpu.memory_space<any>> -> memref<1x32xf32, #tpu.memory_space<any>>
    %c40_i32 = arith.constant 40 : i32
    %c0_i32_287 = arith.constant 0 : i32
    %367 = tpu.memref_slice %arg10[%c40_i32, %c0_i32_287] : memref<64x32xf32, #tpu.memory_space<vmem>> -> memref<1x32xf32, #tpu.memory_space<vmem>>
    %368 = tpu.memref_slice %arg12[%c5_i32_284, %c0_i32_285] : memref<8x8x!tpu.dma_semaphore, #tpu.memory_space<semaphore_mem>> -> memref<1x1x!tpu.dma_semaphore, #tpu.memory_space<semaphore_mem>>
    %369 = tpu.memref_squeeze %368 : memref<1x1x!tpu.dma_semaphore, #tpu.memory_space<semaphore_mem>> -> memref<!tpu.dma_semaphore, #tpu.memory_space<semaphore_mem>>
    tpu.enqueue_dma source(%366 : memref<1x32xf32, #tpu.memory_space<any>>) target(%367 : memref<1x32xf32, #tpu.memory_space<vmem>>) target_semaphore(%369 : memref<!tpu.dma_semaphore, #tpu.memory_space<semaphore_mem>>)
    %c1_i32_288 = arith.constant 1 : i32
    %370 = arith.addi %0, %c1_i32_288 : i32
    %c8_i32_289 = arith.constant 8 : i32
    %371 = arith.muli %370, %c8_i32_289 : i32
    %c5_i32_290 = arith.constant 5 : i32
    %372 = arith.addi %371, %c5_i32_290 : i32
    %373 = arith.index_cast %372 : i32 to index
    %374 = memref.load %arg1[%373] : memref<64xi32, #tpu.memory_space<smem>>
    %c5_i32_291 = arith.constant 5 : i32
    %c1_i32_292 = arith.constant 1 : i32
    %c0_i32_293 = arith.constant 0 : i32
    %375 = tpu.memref_slice %arg3[%374, %c0_i32_293] : memref<100x32xf32, #tpu.memory_space<any>> -> memref<1x32xf32, #tpu.memory_space<any>>
    %c41_i32 = arith.constant 41 : i32
    %c0_i32_294 = arith.constant 0 : i32
    %376 = tpu.memref_slice %arg10[%c41_i32, %c0_i32_294] : memref<64x32xf32, #tpu.memory_space<vmem>> -> memref<1x32xf32, #tpu.memory_space<vmem>>
    %377 = tpu.memref_slice %arg12[%c5_i32_291, %c1_i32_292] : memref<8x8x!tpu.dma_semaphore, #tpu.memory_space<semaphore_mem>> -> memref<1x1x!tpu.dma_semaphore, #tpu.memory_space<semaphore_mem>>
    %378 = tpu.memref_squeeze %377 : memref<1x1x!tpu.dma_semaphore, #tpu.memory_space<semaphore_mem>> -> memref<!tpu.dma_semaphore, #tpu.memory_space<semaphore_mem>>
    tpu.enqueue_dma source(%375 : memref<1x32xf32, #tpu.memory_space<any>>) target(%376 : memref<1x32xf32, #tpu.memory_space<vmem>>) target_semaphore(%378 : memref<!tpu.dma_semaphore, #tpu.memory_space<semaphore_mem>>)
    %c2_i32_295 = arith.constant 2 : i32
    %379 = arith.addi %0, %c2_i32_295 : i32
    %c8_i32_296 = arith.constant 8 : i32
    %380 = arith.muli %379, %c8_i32_296 : i32
    %c5_i32_297 = arith.constant 5 : i32
    %381 = arith.addi %380, %c5_i32_297 : i32
    %382 = arith.index_cast %381 : i32 to index
    %383 = memref.load %arg1[%382] : memref<64xi32, #tpu.memory_space<smem>>
    %c5_i32_298 = arith.constant 5 : i32
    %c2_i32_299 = arith.constant 2 : i32
    %c0_i32_300 = arith.constant 0 : i32
    %384 = tpu.memref_slice %arg3[%383, %c0_i32_300] : memref<100x32xf32, #tpu.memory_space<any>> -> memref<1x32xf32, #tpu.memory_space<any>>
    %c42_i32 = arith.constant 42 : i32
    %c0_i32_301 = arith.constant 0 : i32
    %385 = tpu.memref_slice %arg10[%c42_i32, %c0_i32_301] : memref<64x32xf32, #tpu.memory_space<vmem>> -> memref<1x32xf32, #tpu.memory_space<vmem>>
    %386 = tpu.memref_slice %arg12[%c5_i32_298, %c2_i32_299] : memref<8x8x!tpu.dma_semaphore, #tpu.memory_space<semaphore_mem>> -> memref<1x1x!tpu.dma_semaphore, #tpu.memory_space<semaphore_mem>>
    %387 = tpu.memref_squeeze %386 : memref<1x1x!tpu.dma_semaphore, #tpu.memory_space<semaphore_mem>> -> memref<!tpu.dma_semaphore, #tpu.memory_space<semaphore_mem>>
    tpu.enqueue_dma source(%384 : memref<1x32xf32, #tpu.memory_space<any>>) target(%385 : memref<1x32xf32, #tpu.memory_space<vmem>>) target_semaphore(%387 : memref<!tpu.dma_semaphore, #tpu.memory_space<semaphore_mem>>)
    %c3_i32_302 = arith.constant 3 : i32
    %388 = arith.addi %0, %c3_i32_302 : i32
    %c8_i32_303 = arith.constant 8 : i32
    %389 = arith.muli %388, %c8_i32_303 : i32
    %c5_i32_304 = arith.constant 5 : i32
    %390 = arith.addi %389, %c5_i32_304 : i32
    %391 = arith.index_cast %390 : i32 to index
    %392 = memref.load %arg1[%391] : memref<64xi32, #tpu.memory_space<smem>>
    %c5_i32_305 = arith.constant 5 : i32
    %c3_i32_306 = arith.constant 3 : i32
    %c0_i32_307 = arith.constant 0 : i32
    %393 = tpu.memref_slice %arg3[%392, %c0_i32_307] : memref<100x32xf32, #tpu.memory_space<any>> -> memref<1x32xf32, #tpu.memory_space<any>>
    %c43_i32 = arith.constant 43 : i32
    %c0_i32_308 = arith.constant 0 : i32
    %394 = tpu.memref_slice %arg10[%c43_i32, %c0_i32_308] : memref<64x32xf32, #tpu.memory_space<vmem>> -> memref<1x32xf32, #tpu.memory_space<vmem>>
    %395 = tpu.memref_slice %arg12[%c5_i32_305, %c3_i32_306] : memref<8x8x!tpu.dma_semaphore, #tpu.memory_space<semaphore_mem>> -> memref<1x1x!tpu.dma_semaphore, #tpu.memory_space<semaphore_mem>>
    %396 = tpu.memref_squeeze %395 : memref<1x1x!tpu.dma_semaphore, #tpu.memory_space<semaphore_mem>> -> memref<!tpu.dma_semaphore, #tpu.memory_space<semaphore_mem>>
    tpu.enqueue_dma source(%393 : memref<1x32xf32, #tpu.memory_space<any>>) target(%394 : memref<1x32xf32, #tpu.memory_space<vmem>>) target_semaphore(%396 : memref<!tpu.dma_semaphore, #tpu.memory_space<semaphore_mem>>)
    %c4_i32_309 = arith.constant 4 : i32
    %397 = arith.addi %0, %c4_i32_309 : i32
    %c8_i32_310 = arith.constant 8 : i32
    %398 = arith.muli %397, %c8_i32_310 : i32
    %c5_i32_311 = arith.constant 5 : i32
    %399 = arith.addi %398, %c5_i32_311 : i32
    %400 = arith.index_cast %399 : i32 to index
    %401 = memref.load %arg1[%400] : memref<64xi32, #tpu.memory_space<smem>>
    %c5_i32_312 = arith.constant 5 : i32
    %c4_i32_313 = arith.constant 4 : i32
    %c0_i32_314 = arith.constant 0 : i32
    %402 = tpu.memref_slice %arg3[%401, %c0_i32_314] : memref<100x32xf32, #tpu.memory_space<any>> -> memref<1x32xf32, #tpu.memory_space<any>>
    %c44_i32 = arith.constant 44 : i32
    %c0_i32_315 = arith.constant 0 : i32
    %403 = tpu.memref_slice %arg10[%c44_i32, %c0_i32_315] : memref<64x32xf32, #tpu.memory_space<vmem>> -> memref<1x32xf32, #tpu.memory_space<vmem>>
    %404 = tpu.memref_slice %arg12[%c5_i32_312, %c4_i32_313] : memref<8x8x!tpu.dma_semaphore, #tpu.memory_space<semaphore_mem>> -> memref<1x1x!tpu.dma_semaphore, #tpu.memory_space<semaphore_mem>>
    %405 = tpu.memref_squeeze %404 : memref<1x1x!tpu.dma_semaphore, #tpu.memory_space<semaphore_mem>> -> memref<!tpu.dma_semaphore, #tpu.memory_space<semaphore_mem>>
    tpu.enqueue_dma source(%402 : memref<1x32xf32, #tpu.memory_space<any>>) target(%403 : memref<1x32xf32, #tpu.memory_space<vmem>>) target_semaphore(%405 : memref<!tpu.dma_semaphore, #tpu.memory_space<semaphore_mem>>)
    %c5_i32_316 = arith.constant 5 : i32
    %406 = arith.addi %0, %c5_i32_316 : i32
    %c8_i32_317 = arith.constant 8 : i32
    %407 = arith.muli %406, %c8_i32_317 : i32
    %c5_i32_318 = arith.constant 5 : i32
    %408 = arith.addi %407, %c5_i32_318 : i32
    %409 = arith.index_cast %408 : i32 to index
    %410 = memref.load %arg1[%409] : memref<64xi32, #tpu.memory_space<smem>>
    %c5_i32_319 = arith.constant 5 : i32
    %c5_i32_320 = arith.constant 5 : i32
    %c0_i32_321 = arith.constant 0 : i32
    %411 = tpu.memref_slice %arg3[%410, %c0_i32_321] : memref<100x32xf32, #tpu.memory_space<any>> -> memref<1x32xf32, #tpu.memory_space<any>>
    %c45_i32 = arith.constant 45 : i32
    %c0_i32_322 = arith.constant 0 : i32
    %412 = tpu.memref_slice %arg10[%c45_i32, %c0_i32_322] : memref<64x32xf32, #tpu.memory_space<vmem>> -> memref<1x32xf32, #tpu.memory_space<vmem>>
    %413 = tpu.memref_slice %arg12[%c5_i32_319, %c5_i32_320] : memref<8x8x!tpu.dma_semaphore, #tpu.memory_space<semaphore_mem>> -> memref<1x1x!tpu.dma_semaphore, #tpu.memory_space<semaphore_mem>>
    %414 = tpu.memref_squeeze %413 : memref<1x1x!tpu.dma_semaphore, #tpu.memory_space<semaphore_mem>> -> memref<!tpu.dma_semaphore, #tpu.memory_space<semaphore_mem>>
    tpu.enqueue_dma source(%411 : memref<1x32xf32, #tpu.memory_space<any>>) target(%412 : memref<1x32xf32, #tpu.memory_space<vmem>>) target_semaphore(%414 : memref<!tpu.dma_semaphore, #tpu.memory_space<semaphore_mem>>)
    %c6_i32_323 = arith.constant 6 : i32
    %415 = arith.addi %0, %c6_i32_323 : i32
    %c8_i32_324 = arith.constant 8 : i32
    %416 = arith.muli %415, %c8_i32_324 : i32
    %c5_i32_325 = arith.constant 5 : i32
    %417 = arith.addi %416, %c5_i32_325 : i32
    %418 = arith.index_cast %417 : i32 to index
    %419 = memref.load %arg1[%418] : memref<64xi32, #tpu.memory_space<smem>>
    %c5_i32_326 = arith.constant 5 : i32
    %c6_i32_327 = arith.constant 6 : i32
    %c0_i32_328 = arith.constant 0 : i32
    %420 = tpu.memref_slice %arg3[%419, %c0_i32_328] : memref<100x32xf32, #tpu.memory_space<any>> -> memref<1x32xf32, #tpu.memory_space<any>>
    %c46_i32 = arith.constant 46 : i32
    %c0_i32_329 = arith.constant 0 : i32
    %421 = tpu.memref_slice %arg10[%c46_i32, %c0_i32_329] : memref<64x32xf32, #tpu.memory_space<vmem>> -> memref<1x32xf32, #tpu.memory_space<vmem>>
    %422 = tpu.memref_slice %arg12[%c5_i32_326, %c6_i32_327] : memref<8x8x!tpu.dma_semaphore, #tpu.memory_space<semaphore_mem>> -> memref<1x1x!tpu.dma_semaphore, #tpu.memory_space<semaphore_mem>>
    %423 = tpu.memref_squeeze %422 : memref<1x1x!tpu.dma_semaphore, #tpu.memory_space<semaphore_mem>> -> memref<!tpu.dma_semaphore, #tpu.memory_space<semaphore_mem>>
    tpu.enqueue_dma source(%420 : memref<1x32xf32, #tpu.memory_space<any>>) target(%421 : memref<1x32xf32, #tpu.memory_space<vmem>>) target_semaphore(%423 : memref<!tpu.dma_semaphore, #tpu.memory_space<semaphore_mem>>)
    %c7_i32_330 = arith.constant 7 : i32
    %424 = arith.addi %0, %c7_i32_330 : i32
    %c8_i32_331 = arith.constant 8 : i32
    %425 = arith.muli %424, %c8_i32_331 : i32
    %c5_i32_332 = arith.constant 5 : i32
    %426 = arith.addi %425, %c5_i32_332 : i32
    %427 = arith.index_cast %426 : i32 to index
    %428 = memref.load %arg1[%427] : memref<64xi32, #tpu.memory_space<smem>>
    %c5_i32_333 = arith.constant 5 : i32
    %c7_i32_334 = arith.constant 7 : i32
    %c0_i32_335 = arith.constant 0 : i32
    %429 = tpu.memref_slice %arg3[%428, %c0_i32_335] : memref<100x32xf32, #tpu.memory_space<any>> -> memref<1x32xf32, #tpu.memory_space<any>>
    %c47_i32 = arith.constant 47 : i32
    %c0_i32_336 = arith.constant 0 : i32
    %430 = tpu.memref_slice %arg10[%c47_i32, %c0_i32_336] : memref<64x32xf32, #tpu.memory_space<vmem>> -> memref<1x32xf32, #tpu.memory_space<vmem>>
    %431 = tpu.memref_slice %arg12[%c5_i32_333, %c7_i32_334] : memref<8x8x!tpu.dma_semaphore, #tpu.memory_space<semaphore_mem>> -> memref<1x1x!tpu.dma_semaphore, #tpu.memory_space<semaphore_mem>>
    %432 = tpu.memref_squeeze %431 : memref<1x1x!tpu.dma_semaphore, #tpu.memory_space<semaphore_mem>> -> memref<!tpu.dma_semaphore, #tpu.memory_space<semaphore_mem>>
    tpu.enqueue_dma source(%429 : memref<1x32xf32, #tpu.memory_space<any>>) target(%430 : memref<1x32xf32, #tpu.memory_space<vmem>>) target_semaphore(%432 : memref<!tpu.dma_semaphore, #tpu.memory_space<semaphore_mem>>)
    %c0_i32_337 = arith.constant 0 : i32
    %433 = arith.addi %0, %c0_i32_337 : i32
    %c8_i32_338 = arith.constant 8 : i32
    %434 = arith.muli %433, %c8_i32_338 : i32
    %c6_i32_339 = arith.constant 6 : i32
    %435 = arith.addi %434, %c6_i32_339 : i32
    %436 = arith.index_cast %435 : i32 to index
    %437 = memref.load %arg1[%436] : memref<64xi32, #tpu.memory_space<smem>>
    %c6_i32_340 = arith.constant 6 : i32
    %c0_i32_341 = arith.constant 0 : i32
    %c0_i32_342 = arith.constant 0 : i32
    %438 = tpu.memref_slice %arg3[%437, %c0_i32_342] : memref<100x32xf32, #tpu.memory_space<any>> -> memref<1x32xf32, #tpu.memory_space<any>>
    %c48_i32 = arith.constant 48 : i32
    %c0_i32_343 = arith.constant 0 : i32
    %439 = tpu.memref_slice %arg10[%c48_i32, %c0_i32_343] : memref<64x32xf32, #tpu.memory_space<vmem>> -> memref<1x32xf32, #tpu.memory_space<vmem>>
    %440 = tpu.memref_slice %arg12[%c6_i32_340, %c0_i32_341] : memref<8x8x!tpu.dma_semaphore, #tpu.memory_space<semaphore_mem>> -> memref<1x1x!tpu.dma_semaphore, #tpu.memory_space<semaphore_mem>>
    %441 = tpu.memref_squeeze %440 : memref<1x1x!tpu.dma_semaphore, #tpu.memory_space<semaphore_mem>> -> memref<!tpu.dma_semaphore, #tpu.memory_space<semaphore_mem>>
    tpu.enqueue_dma source(%438 : memref<1x32xf32, #tpu.memory_space<any>>) target(%439 : memref<1x32xf32, #tpu.memory_space<vmem>>) target_semaphore(%441 : memref<!tpu.dma_semaphore, #tpu.memory_space<semaphore_mem>>)
    %c1_i32_344 = arith.constant 1 : i32
    %442 = arith.addi %0, %c1_i32_344 : i32
    %c8_i32_345 = arith.constant 8 : i32
    %443 = arith.muli %442, %c8_i32_345 : i32
    %c6_i32_346 = arith.constant 6 : i32
    %444 = arith.addi %443, %c6_i32_346 : i32
    %445 = arith.index_cast %444 : i32 to index
    %446 = memref.load %arg1[%445] : memref<64xi32, #tpu.memory_space<smem>>
    %c6_i32_347 = arith.constant 6 : i32
    %c1_i32_348 = arith.constant 1 : i32
    %c0_i32_349 = arith.constant 0 : i32
    %447 = tpu.memref_slice %arg3[%446, %c0_i32_349] : memref<100x32xf32, #tpu.memory_space<any>> -> memref<1x32xf32, #tpu.memory_space<any>>
    %c49_i32 = arith.constant 49 : i32
    %c0_i32_350 = arith.constant 0 : i32
    %448 = tpu.memref_slice %arg10[%c49_i32, %c0_i32_350] : memref<64x32xf32, #tpu.memory_space<vmem>> -> memref<1x32xf32, #tpu.memory_space<vmem>>
    %449 = tpu.memref_slice %arg12[%c6_i32_347, %c1_i32_348] : memref<8x8x!tpu.dma_semaphore, #tpu.memory_space<semaphore_mem>> -> memref<1x1x!tpu.dma_semaphore, #tpu.memory_space<semaphore_mem>>
    %450 = tpu.memref_squeeze %449 : memref<1x1x!tpu.dma_semaphore, #tpu.memory_space<semaphore_mem>> -> memref<!tpu.dma_semaphore, #tpu.memory_space<semaphore_mem>>
    tpu.enqueue_dma source(%447 : memref<1x32xf32, #tpu.memory_space<any>>) target(%448 : memref<1x32xf32, #tpu.memory_space<vmem>>) target_semaphore(%450 : memref<!tpu.dma_semaphore, #tpu.memory_space<semaphore_mem>>)
    %c2_i32_351 = arith.constant 2 : i32
    %451 = arith.addi %0, %c2_i32_351 : i32
    %c8_i32_352 = arith.constant 8 : i32
    %452 = arith.muli %451, %c8_i32_352 : i32
    %c6_i32_353 = arith.constant 6 : i32
    %453 = arith.addi %452, %c6_i32_353 : i32
    %454 = arith.index_cast %453 : i32 to index
    %455 = memref.load %arg1[%454] : memref<64xi32, #tpu.memory_space<smem>>
    %c6_i32_354 = arith.constant 6 : i32
    %c2_i32_355 = arith.constant 2 : i32
    %c0_i32_356 = arith.constant 0 : i32
    %456 = tpu.memref_slice %arg3[%455, %c0_i32_356] : memref<100x32xf32, #tpu.memory_space<any>> -> memref<1x32xf32, #tpu.memory_space<any>>
    %c50_i32 = arith.constant 50 : i32
    %c0_i32_357 = arith.constant 0 : i32
    %457 = tpu.memref_slice %arg10[%c50_i32, %c0_i32_357] : memref<64x32xf32, #tpu.memory_space<vmem>> -> memref<1x32xf32, #tpu.memory_space<vmem>>
    %458 = tpu.memref_slice %arg12[%c6_i32_354, %c2_i32_355] : memref<8x8x!tpu.dma_semaphore, #tpu.memory_space<semaphore_mem>> -> memref<1x1x!tpu.dma_semaphore, #tpu.memory_space<semaphore_mem>>
    %459 = tpu.memref_squeeze %458 : memref<1x1x!tpu.dma_semaphore, #tpu.memory_space<semaphore_mem>> -> memref<!tpu.dma_semaphore, #tpu.memory_space<semaphore_mem>>
    tpu.enqueue_dma source(%456 : memref<1x32xf32, #tpu.memory_space<any>>) target(%457 : memref<1x32xf32, #tpu.memory_space<vmem>>) target_semaphore(%459 : memref<!tpu.dma_semaphore, #tpu.memory_space<semaphore_mem>>)
    %c3_i32_358 = arith.constant 3 : i32
    %460 = arith.addi %0, %c3_i32_358 : i32
    %c8_i32_359 = arith.constant 8 : i32
    %461 = arith.muli %460, %c8_i32_359 : i32
    %c6_i32_360 = arith.constant 6 : i32
    %462 = arith.addi %461, %c6_i32_360 : i32
    %463 = arith.index_cast %462 : i32 to index
    %464 = memref.load %arg1[%463] : memref<64xi32, #tpu.memory_space<smem>>
    %c6_i32_361 = arith.constant 6 : i32
    %c3_i32_362 = arith.constant 3 : i32
    %c0_i32_363 = arith.constant 0 : i32
    %465 = tpu.memref_slice %arg3[%464, %c0_i32_363] : memref<100x32xf32, #tpu.memory_space<any>> -> memref<1x32xf32, #tpu.memory_space<any>>
    %c51_i32 = arith.constant 51 : i32
    %c0_i32_364 = arith.constant 0 : i32
    %466 = tpu.memref_slice %arg10[%c51_i32, %c0_i32_364] : memref<64x32xf32, #tpu.memory_space<vmem>> -> memref<1x32xf32, #tpu.memory_space<vmem>>
    %467 = tpu.memref_slice %arg12[%c6_i32_361, %c3_i32_362] : memref<8x8x!tpu.dma_semaphore, #tpu.memory_space<semaphore_mem>> -> memref<1x1x!tpu.dma_semaphore, #tpu.memory_space<semaphore_mem>>
    %468 = tpu.memref_squeeze %467 : memref<1x1x!tpu.dma_semaphore, #tpu.memory_space<semaphore_mem>> -> memref<!tpu.dma_semaphore, #tpu.memory_space<semaphore_mem>>
    tpu.enqueue_dma source(%465 : memref<1x32xf32, #tpu.memory_space<any>>) target(%466 : memref<1x32xf32, #tpu.memory_space<vmem>>) target_semaphore(%468 : memref<!tpu.dma_semaphore, #tpu.memory_space<semaphore_mem>>)
    %c4_i32_365 = arith.constant 4 : i32
    %469 = arith.addi %0, %c4_i32_365 : i32
    %c8_i32_366 = arith.constant 8 : i32
    %470 = arith.muli %469, %c8_i32_366 : i32
    %c6_i32_367 = arith.constant 6 : i32
    %471 = arith.addi %470, %c6_i32_367 : i32
    %472 = arith.index_cast %471 : i32 to index
    %473 = memref.load %arg1[%472] : memref<64xi32, #tpu.memory_space<smem>>
    %c6_i32_368 = arith.constant 6 : i32
    %c4_i32_369 = arith.constant 4 : i32
    %c0_i32_370 = arith.constant 0 : i32
    %474 = tpu.memref_slice %arg3[%473, %c0_i32_370] : memref<100x32xf32, #tpu.memory_space<any>> -> memref<1x32xf32, #tpu.memory_space<any>>
    %c52_i32 = arith.constant 52 : i32
    %c0_i32_371 = arith.constant 0 : i32
    %475 = tpu.memref_slice %arg10[%c52_i32, %c0_i32_371] : memref<64x32xf32, #tpu.memory_space<vmem>> -> memref<1x32xf32, #tpu.memory_space<vmem>>
    %476 = tpu.memref_slice %arg12[%c6_i32_368, %c4_i32_369] : memref<8x8x!tpu.dma_semaphore, #tpu.memory_space<semaphore_mem>> -> memref<1x1x!tpu.dma_semaphore, #tpu.memory_space<semaphore_mem>>
    %477 = tpu.memref_squeeze %476 : memref<1x1x!tpu.dma_semaphore, #tpu.memory_space<semaphore_mem>> -> memref<!tpu.dma_semaphore, #tpu.memory_space<semaphore_mem>>
    tpu.enqueue_dma source(%474 : memref<1x32xf32, #tpu.memory_space<any>>) target(%475 : memref<1x32xf32, #tpu.memory_space<vmem>>) target_semaphore(%477 : memref<!tpu.dma_semaphore, #tpu.memory_space<semaphore_mem>>)
    %c5_i32_372 = arith.constant 5 : i32
    %478 = arith.addi %0, %c5_i32_372 : i32
    %c8_i32_373 = arith.constant 8 : i32
    %479 = arith.muli %478, %c8_i32_373 : i32
    %c6_i32_374 = arith.constant 6 : i32
    %480 = arith.addi %479, %c6_i32_374 : i32
    %481 = arith.index_cast %480 : i32 to index
    %482 = memref.load %arg1[%481] : memref<64xi32, #tpu.memory_space<smem>>
    %c6_i32_375 = arith.constant 6 : i32
    %c5_i32_376 = arith.constant 5 : i32
    %c0_i32_377 = arith.constant 0 : i32
    %483 = tpu.memref_slice %arg3[%482, %c0_i32_377] : memref<100x32xf32, #tpu.memory_space<any>> -> memref<1x32xf32, #tpu.memory_space<any>>
    %c53_i32 = arith.constant 53 : i32
    %c0_i32_378 = arith.constant 0 : i32
    %484 = tpu.memref_slice %arg10[%c53_i32, %c0_i32_378] : memref<64x32xf32, #tpu.memory_space<vmem>> -> memref<1x32xf32, #tpu.memory_space<vmem>>
    %485 = tpu.memref_slice %arg12[%c6_i32_375, %c5_i32_376] : memref<8x8x!tpu.dma_semaphore, #tpu.memory_space<semaphore_mem>> -> memref<1x1x!tpu.dma_semaphore, #tpu.memory_space<semaphore_mem>>
    %486 = tpu.memref_squeeze %485 : memref<1x1x!tpu.dma_semaphore, #tpu.memory_space<semaphore_mem>> -> memref<!tpu.dma_semaphore, #tpu.memory_space<semaphore_mem>>
    tpu.enqueue_dma source(%483 : memref<1x32xf32, #tpu.memory_space<any>>) target(%484 : memref<1x32xf32, #tpu.memory_space<vmem>>) target_semaphore(%486 : memref<!tpu.dma_semaphore, #tpu.memory_space<semaphore_mem>>)
    %c6_i32_379 = arith.constant 6 : i32
    %487 = arith.addi %0, %c6_i32_379 : i32
    %c8_i32_380 = arith.constant 8 : i32
    %488 = arith.muli %487, %c8_i32_380 : i32
    %c6_i32_381 = arith.constant 6 : i32
    %489 = arith.addi %488, %c6_i32_381 : i32
    %490 = arith.index_cast %489 : i32 to index
    %491 = memref.load %arg1[%490] : memref<64xi32, #tpu.memory_space<smem>>
    %c6_i32_382 = arith.constant 6 : i32
    %c6_i32_383 = arith.constant 6 : i32
    %c0_i32_384 = arith.constant 0 : i32
    %492 = tpu.memref_slice %arg3[%491, %c0_i32_384] : memref<100x32xf32, #tpu.memory_space<any>> -> memref<1x32xf32, #tpu.memory_space<any>>
    %c54_i32 = arith.constant 54 : i32
    %c0_i32_385 = arith.constant 0 : i32
    %493 = tpu.memref_slice %arg10[%c54_i32, %c0_i32_385] : memref<64x32xf32, #tpu.memory_space<vmem>> -> memref<1x32xf32, #tpu.memory_space<vmem>>
    %494 = tpu.memref_slice %arg12[%c6_i32_382, %c6_i32_383] : memref<8x8x!tpu.dma_semaphore, #tpu.memory_space<semaphore_mem>> -> memref<1x1x!tpu.dma_semaphore, #tpu.memory_space<semaphore_mem>>
    %495 = tpu.memref_squeeze %494 : memref<1x1x!tpu.dma_semaphore, #tpu.memory_space<semaphore_mem>> -> memref<!tpu.dma_semaphore, #tpu.memory_space<semaphore_mem>>
    tpu.enqueue_dma source(%492 : memref<1x32xf32, #tpu.memory_space<any>>) target(%493 : memref<1x32xf32, #tpu.memory_space<vmem>>) target_semaphore(%495 : memref<!tpu.dma_semaphore, #tpu.memory_space<semaphore_mem>>)
    %c7_i32_386 = arith.constant 7 : i32
    %496 = arith.addi %0, %c7_i32_386 : i32
    %c8_i32_387 = arith.constant 8 : i32
    %497 = arith.muli %496, %c8_i32_387 : i32
    %c6_i32_388 = arith.constant 6 : i32
    %498 = arith.addi %497, %c6_i32_388 : i32
    %499 = arith.index_cast %498 : i32 to index
    %500 = memref.load %arg1[%499] : memref<64xi32, #tpu.memory_space<smem>>
    %c6_i32_389 = arith.constant 6 : i32
    %c7_i32_390 = arith.constant 7 : i32
    %c0_i32_391 = arith.constant 0 : i32
    %501 = tpu.memref_slice %arg3[%500, %c0_i32_391] : memref<100x32xf32, #tpu.memory_space<any>> -> memref<1x32xf32, #tpu.memory_space<any>>
    %c55_i32 = arith.constant 55 : i32
    %c0_i32_392 = arith.constant 0 : i32
    %502 = tpu.memref_slice %arg10[%c55_i32, %c0_i32_392] : memref<64x32xf32, #tpu.memory_space<vmem>> -> memref<1x32xf32, #tpu.memory_space<vmem>>
    %503 = tpu.memref_slice %arg12[%c6_i32_389, %c7_i32_390] : memref<8x8x!tpu.dma_semaphore, #tpu.memory_space<semaphore_mem>> -> memref<1x1x!tpu.dma_semaphore, #tpu.memory_space<semaphore_mem>>
    %504 = tpu.memref_squeeze %503 : memref<1x1x!tpu.dma_semaphore, #tpu.memory_space<semaphore_mem>> -> memref<!tpu.dma_semaphore, #tpu.memory_space<semaphore_mem>>
    tpu.enqueue_dma source(%501 : memref<1x32xf32, #tpu.memory_space<any>>) target(%502 : memref<1x32xf32, #tpu.memory_space<vmem>>) target_semaphore(%504 : memref<!tpu.dma_semaphore, #tpu.memory_space<semaphore_mem>>)
    %c0_i32_393 = arith.constant 0 : i32
    %505 = arith.addi %0, %c0_i32_393 : i32
    %c8_i32_394 = arith.constant 8 : i32
    %506 = arith.muli %505, %c8_i32_394 : i32
    %c7_i32_395 = arith.constant 7 : i32
    %507 = arith.addi %506, %c7_i32_395 : i32
    %508 = arith.index_cast %507 : i32 to index
    %509 = memref.load %arg1[%508] : memref<64xi32, #tpu.memory_space<smem>>
    %c7_i32_396 = arith.constant 7 : i32
    %c0_i32_397 = arith.constant 0 : i32
    %c0_i32_398 = arith.constant 0 : i32
    %510 = tpu.memref_slice %arg3[%509, %c0_i32_398] : memref<100x32xf32, #tpu.memory_space<any>> -> memref<1x32xf32, #tpu.memory_space<any>>
    %c56_i32 = arith.constant 56 : i32
    %c0_i32_399 = arith.constant 0 : i32
    %511 = tpu.memref_slice %arg10[%c56_i32, %c0_i32_399] : memref<64x32xf32, #tpu.memory_space<vmem>> -> memref<1x32xf32, #tpu.memory_space<vmem>>
    %512 = tpu.memref_slice %arg12[%c7_i32_396, %c0_i32_397] : memref<8x8x!tpu.dma_semaphore, #tpu.memory_space<semaphore_mem>> -> memref<1x1x!tpu.dma_semaphore, #tpu.memory_space<semaphore_mem>>
    %513 = tpu.memref_squeeze %512 : memref<1x1x!tpu.dma_semaphore, #tpu.memory_space<semaphore_mem>> -> memref<!tpu.dma_semaphore, #tpu.memory_space<semaphore_mem>>
    tpu.enqueue_dma source(%510 : memref<1x32xf32, #tpu.memory_space<any>>) target(%511 : memref<1x32xf32, #tpu.memory_space<vmem>>) target_semaphore(%513 : memref<!tpu.dma_semaphore, #tpu.memory_space<semaphore_mem>>)
    %c1_i32_400 = arith.constant 1 : i32
    %514 = arith.addi %0, %c1_i32_400 : i32
    %c8_i32_401 = arith.constant 8 : i32
    %515 = arith.muli %514, %c8_i32_401 : i32
    %c7_i32_402 = arith.constant 7 : i32
    %516 = arith.addi %515, %c7_i32_402 : i32
    %517 = arith.index_cast %516 : i32 to index
    %518 = memref.load %arg1[%517] : memref<64xi32, #tpu.memory_space<smem>>
    %c7_i32_403 = arith.constant 7 : i32
    %c1_i32_404 = arith.constant 1 : i32
    %c0_i32_405 = arith.constant 0 : i32
    %519 = tpu.memref_slice %arg3[%518, %c0_i32_405] : memref<100x32xf32, #tpu.memory_space<any>> -> memref<1x32xf32, #tpu.memory_space<any>>
    %c57_i32 = arith.constant 57 : i32
    %c0_i32_406 = arith.constant 0 : i32
    %520 = tpu.memref_slice %arg10[%c57_i32, %c0_i32_406] : memref<64x32xf32, #tpu.memory_space<vmem>> -> memref<1x32xf32, #tpu.memory_space<vmem>>
    %521 = tpu.memref_slice %arg12[%c7_i32_403, %c1_i32_404] : memref<8x8x!tpu.dma_semaphore, #tpu.memory_space<semaphore_mem>> -> memref<1x1x!tpu.dma_semaphore, #tpu.memory_space<semaphore_mem>>
    %522 = tpu.memref_squeeze %521 : memref<1x1x!tpu.dma_semaphore, #tpu.memory_space<semaphore_mem>> -> memref<!tpu.dma_semaphore, #tpu.memory_space<semaphore_mem>>
    tpu.enqueue_dma source(%519 : memref<1x32xf32, #tpu.memory_space<any>>) target(%520 : memref<1x32xf32, #tpu.memory_space<vmem>>) target_semaphore(%522 : memref<!tpu.dma_semaphore, #tpu.memory_space<semaphore_mem>>)
    %c2_i32_407 = arith.constant 2 : i32
    %523 = arith.addi %0, %c2_i32_407 : i32
    %c8_i32_408 = arith.constant 8 : i32
    %524 = arith.muli %523, %c8_i32_408 : i32
    %c7_i32_409 = arith.constant 7 : i32
    %525 = arith.addi %524, %c7_i32_409 : i32
    %526 = arith.index_cast %525 : i32 to index
    %527 = memref.load %arg1[%526] : memref<64xi32, #tpu.memory_space<smem>>
    %c7_i32_410 = arith.constant 7 : i32
    %c2_i32_411 = arith.constant 2 : i32
    %c0_i32_412 = arith.constant 0 : i32
    %528 = tpu.memref_slice %arg3[%527, %c0_i32_412] : memref<100x32xf32, #tpu.memory_space<any>> -> memref<1x32xf32, #tpu.memory_space<any>>
    %c58_i32 = arith.constant 58 : i32
    %c0_i32_413 = arith.constant 0 : i32
    %529 = tpu.memref_slice %arg10[%c58_i32, %c0_i32_413] : memref<64x32xf32, #tpu.memory_space<vmem>> -> memref<1x32xf32, #tpu.memory_space<vmem>>
    %530 = tpu.memref_slice %arg12[%c7_i32_410, %c2_i32_411] : memref<8x8x!tpu.dma_semaphore, #tpu.memory_space<semaphore_mem>> -> memref<1x1x!tpu.dma_semaphore, #tpu.memory_space<semaphore_mem>>
    %531 = tpu.memref_squeeze %530 : memref<1x1x!tpu.dma_semaphore, #tpu.memory_space<semaphore_mem>> -> memref<!tpu.dma_semaphore, #tpu.memory_space<semaphore_mem>>
    tpu.enqueue_dma source(%528 : memref<1x32xf32, #tpu.memory_space<any>>) target(%529 : memref<1x32xf32, #tpu.memory_space<vmem>>) target_semaphore(%531 : memref<!tpu.dma_semaphore, #tpu.memory_space<semaphore_mem>>)
    %c3_i32_414 = arith.constant 3 : i32
    %532 = arith.addi %0, %c3_i32_414 : i32
    %c8_i32_415 = arith.constant 8 : i32
    %533 = arith.muli %532, %c8_i32_415 : i32
    %c7_i32_416 = arith.constant 7 : i32
    %534 = arith.addi %533, %c7_i32_416 : i32
    %535 = arith.index_cast %534 : i32 to index
    %536 = memref.load %arg1[%535] : memref<64xi32, #tpu.memory_space<smem>>
    %c7_i32_417 = arith.constant 7 : i32
    %c3_i32_418 = arith.constant 3 : i32
    %c0_i32_419 = arith.constant 0 : i32
    %537 = tpu.memref_slice %arg3[%536, %c0_i32_419] : memref<100x32xf32, #tpu.memory_space<any>> -> memref<1x32xf32, #tpu.memory_space<any>>
    %c59_i32 = arith.constant 59 : i32
    %c0_i32_420 = arith.constant 0 : i32
    %538 = tpu.memref_slice %arg10[%c59_i32, %c0_i32_420] : memref<64x32xf32, #tpu.memory_space<vmem>> -> memref<1x32xf32, #tpu.memory_space<vmem>>
    %539 = tpu.memref_slice %arg12[%c7_i32_417, %c3_i32_418] : memref<8x8x!tpu.dma_semaphore, #tpu.memory_space<semaphore_mem>> -> memref<1x1x!tpu.dma_semaphore, #tpu.memory_space<semaphore_mem>>
    %540 = tpu.memref_squeeze %539 : memref<1x1x!tpu.dma_semaphore, #tpu.memory_space<semaphore_mem>> -> memref<!tpu.dma_semaphore, #tpu.memory_space<semaphore_mem>>
    tpu.enqueue_dma source(%537 : memref<1x32xf32, #tpu.memory_space<any>>) target(%538 : memref<1x32xf32, #tpu.memory_space<vmem>>) target_semaphore(%540 : memref<!tpu.dma_semaphore, #tpu.memory_space<semaphore_mem>>)
    %c4_i32_421 = arith.constant 4 : i32
    %541 = arith.addi %0, %c4_i32_421 : i32
    %c8_i32_422 = arith.constant 8 : i32
    %542 = arith.muli %541, %c8_i32_422 : i32
    %c7_i32_423 = arith.constant 7 : i32
    %543 = arith.addi %542, %c7_i32_423 : i32
    %544 = arith.index_cast %543 : i32 to index
    %545 = memref.load %arg1[%544] : memref<64xi32, #tpu.memory_space<smem>>
    %c7_i32_424 = arith.constant 7 : i32
    %c4_i32_425 = arith.constant 4 : i32
    %c0_i32_426 = arith.constant 0 : i32
    %546 = tpu.memref_slice %arg3[%545, %c0_i32_426] : memref<100x32xf32, #tpu.memory_space<any>> -> memref<1x32xf32, #tpu.memory_space<any>>
    %c60_i32 = arith.constant 60 : i32
    %c0_i32_427 = arith.constant 0 : i32
    %547 = tpu.memref_slice %arg10[%c60_i32, %c0_i32_427] : memref<64x32xf32, #tpu.memory_space<vmem>> -> memref<1x32xf32, #tpu.memory_space<vmem>>
    %548 = tpu.memref_slice %arg12[%c7_i32_424, %c4_i32_425] : memref<8x8x!tpu.dma_semaphore, #tpu.memory_space<semaphore_mem>> -> memref<1x1x!tpu.dma_semaphore, #tpu.memory_space<semaphore_mem>>
    %549 = tpu.memref_squeeze %548 : memref<1x1x!tpu.dma_semaphore, #tpu.memory_space<semaphore_mem>> -> memref<!tpu.dma_semaphore, #tpu.memory_space<semaphore_mem>>
    tpu.enqueue_dma source(%546 : memref<1x32xf32, #tpu.memory_space<any>>) target(%547 : memref<1x32xf32, #tpu.memory_space<vmem>>) target_semaphore(%549 : memref<!tpu.dma_semaphore, #tpu.memory_space<semaphore_mem>>)
    %c5_i32_428 = arith.constant 5 : i32
    %550 = arith.addi %0, %c5_i32_428 : i32
    %c8_i32_429 = arith.constant 8 : i32
    %551 = arith.muli %550, %c8_i32_429 : i32
    %c7_i32_430 = arith.constant 7 : i32
    %552 = arith.addi %551, %c7_i32_430 : i32
    %553 = arith.index_cast %552 : i32 to index
    %554 = memref.load %arg1[%553] : memref<64xi32, #tpu.memory_space<smem>>
    %c7_i32_431 = arith.constant 7 : i32
    %c5_i32_432 = arith.constant 5 : i32
    %c0_i32_433 = arith.constant 0 : i32
    %555 = tpu.memref_slice %arg3[%554, %c0_i32_433] : memref<100x32xf32, #tpu.memory_space<any>> -> memref<1x32xf32, #tpu.memory_space<any>>
    %c61_i32 = arith.constant 61 : i32
    %c0_i32_434 = arith.constant 0 : i32
    %556 = tpu.memref_slice %arg10[%c61_i32, %c0_i32_434] : memref<64x32xf32, #tpu.memory_space<vmem>> -> memref<1x32xf32, #tpu.memory_space<vmem>>
    %557 = tpu.memref_slice %arg12[%c7_i32_431, %c5_i32_432] : memref<8x8x!tpu.dma_semaphore, #tpu.memory_space<semaphore_mem>> -> memref<1x1x!tpu.dma_semaphore, #tpu.memory_space<semaphore_mem>>
    %558 = tpu.memref_squeeze %557 : memref<1x1x!tpu.dma_semaphore, #tpu.memory_space<semaphore_mem>> -> memref<!tpu.dma_semaphore, #tpu.memory_space<semaphore_mem>>
    tpu.enqueue_dma source(%555 : memref<1x32xf32, #tpu.memory_space<any>>) target(%556 : memref<1x32xf32, #tpu.memory_space<vmem>>) target_semaphore(%558 : memref<!tpu.dma_semaphore, #tpu.memory_space<semaphore_mem>>)
    %c6_i32_435 = arith.constant 6 : i32
    %559 = arith.addi %0, %c6_i32_435 : i32
    %c8_i32_436 = arith.constant 8 : i32
    %560 = arith.muli %559, %c8_i32_436 : i32
    %c7_i32_437 = arith.constant 7 : i32
    %561 = arith.addi %560, %c7_i32_437 : i32
    %562 = arith.index_cast %561 : i32 to index
    %563 = memref.load %arg1[%562] : memref<64xi32, #tpu.memory_space<smem>>
    %c7_i32_438 = arith.constant 7 : i32
    %c6_i32_439 = arith.constant 6 : i32
    %c0_i32_440 = arith.constant 0 : i32
    %564 = tpu.memref_slice %arg3[%563, %c0_i32_440] : memref<100x32xf32, #tpu.memory_space<any>> -> memref<1x32xf32, #tpu.memory_space<any>>
    %c62_i32 = arith.constant 62 : i32
    %c0_i32_441 = arith.constant 0 : i32
    %565 = tpu.memref_slice %arg10[%c62_i32, %c0_i32_441] : memref<64x32xf32, #tpu.memory_space<vmem>> -> memref<1x32xf32, #tpu.memory_space<vmem>>
    %566 = tpu.memref_slice %arg12[%c7_i32_438, %c6_i32_439] : memref<8x8x!tpu.dma_semaphore, #tpu.memory_space<semaphore_mem>> -> memref<1x1x!tpu.dma_semaphore, #tpu.memory_space<semaphore_mem>>
    %567 = tpu.memref_squeeze %566 : memref<1x1x!tpu.dma_semaphore, #tpu.memory_space<semaphore_mem>> -> memref<!tpu.dma_semaphore, #tpu.memory_space<semaphore_mem>>
    tpu.enqueue_dma source(%564 : memref<1x32xf32, #tpu.memory_space<any>>) target(%565 : memref<1x32xf32, #tpu.memory_space<vmem>>) target_semaphore(%567 : memref<!tpu.dma_semaphore, #tpu.memory_space<semaphore_mem>>)
    %c7_i32_442 = arith.constant 7 : i32
    %568 = arith.addi %0, %c7_i32_442 : i32
    %c8_i32_443 = arith.constant 8 : i32
    %569 = arith.muli %568, %c8_i32_443 : i32
    %c7_i32_444 = arith.constant 7 : i32
    %570 = arith.addi %569, %c7_i32_444 : i32
    %571 = arith.index_cast %570 : i32 to index
    %572 = memref.load %arg1[%571] : memref<64xi32, #tpu.memory_space<smem>>
    %c7_i32_445 = arith.constant 7 : i32
    %c7_i32_446 = arith.constant 7 : i32
    %c0_i32_447 = arith.constant 0 : i32
    %573 = tpu.memref_slice %arg3[%572, %c0_i32_447] : memref<100x32xf32, #tpu.memory_space<any>> -> memref<1x32xf32, #tpu.memory_space<any>>
    %c63_i32 = arith.constant 63 : i32
    %c0_i32_448 = arith.constant 0 : i32
    %574 = tpu.memref_slice %arg10[%c63_i32, %c0_i32_448] : memref<64x32xf32, #tpu.memory_space<vmem>> -> memref<1x32xf32, #tpu.memory_space<vmem>>
    %575 = tpu.memref_slice %arg12[%c7_i32_445, %c7_i32_446] : memref<8x8x!tpu.dma_semaphore, #tpu.memory_space<semaphore_mem>> -> memref<1x1x!tpu.dma_semaphore, #tpu.memory_space<semaphore_mem>>
    %576 = tpu.memref_squeeze %575 : memref<1x1x!tpu.dma_semaphore, #tpu.memory_space<semaphore_mem>> -> memref<!tpu.dma_semaphore, #tpu.memory_space<semaphore_mem>>
    tpu.enqueue_dma source(%573 : memref<1x32xf32, #tpu.memory_space<any>>) target(%574 : memref<1x32xf32, #tpu.memory_space<vmem>>) target_semaphore(%576 : memref<!tpu.dma_semaphore, #tpu.memory_space<semaphore_mem>>)
    %c0_i32_449 = arith.constant 0 : i32
    %c0_i32_450 = arith.constant 0 : i32
    %c0_i32_451 = arith.constant 0 : i32
    %577 = tpu.memref_slice %arg3[%5, %c0_i32_451] : memref<100x32xf32, #tpu.memory_space<any>> -> memref<1x32xf32, #tpu.memory_space<any>>
    %c0_i32_452 = arith.constant 0 : i32
    %c0_i32_453 = arith.constant 0 : i32
    %578 = tpu.memref_slice %arg10[%c0_i32_452, %c0_i32_453] : memref<64x32xf32, #tpu.memory_space<vmem>> -> memref<1x32xf32, #tpu.memory_space<vmem>>
    %579 = tpu.memref_slice %arg12[%c0_i32_449, %c0_i32_450] : memref<8x8x!tpu.dma_semaphore, #tpu.memory_space<semaphore_mem>> -> memref<1x1x!tpu.dma_semaphore, #tpu.memory_space<semaphore_mem>>
    %580 = tpu.memref_squeeze %579 : memref<1x1x!tpu.dma_semaphore, #tpu.memory_space<semaphore_mem>> -> memref<!tpu.dma_semaphore, #tpu.memory_space<semaphore_mem>>
    tpu.wait_dma2 semaphore(%580 : memref<!tpu.dma_semaphore, #tpu.memory_space<semaphore_mem>>) src(%577 : memref<1x32xf32, #tpu.memory_space<any>>) dst(%578 : memref<1x32xf32, #tpu.memory_space<vmem>>)
    %c0_i32_454 = arith.constant 0 : i32
    %c1_i32_455 = arith.constant 1 : i32
    %c0_i32_456 = arith.constant 0 : i32
    %581 = tpu.memref_slice %arg3[%14, %c0_i32_456] : memref<100x32xf32, #tpu.memory_space<any>> -> memref<1x32xf32, #tpu.memory_space<any>>
    %c1_i32_457 = arith.constant 1 : i32
    %c0_i32_458 = arith.constant 0 : i32
    %582 = tpu.memref_slice %arg10[%c1_i32_457, %c0_i32_458] : memref<64x32xf32, #tpu.memory_space<vmem>> -> memref<1x32xf32, #tpu.memory_space<vmem>>
    %583 = tpu.memref_slice %arg12[%c0_i32_454, %c1_i32_455] : memref<8x8x!tpu.dma_semaphore, #tpu.memory_space<semaphore_mem>> -> memref<1x1x!tpu.dma_semaphore, #tpu.memory_space<semaphore_mem>>
    %584 = tpu.memref_squeeze %583 : memref<1x1x!tpu.dma_semaphore, #tpu.memory_space<semaphore_mem>> -> memref<!tpu.dma_semaphore, #tpu.memory_space<semaphore_mem>>
    tpu.wait_dma2 semaphore(%584 : memref<!tpu.dma_semaphore, #tpu.memory_space<semaphore_mem>>) src(%581 : memref<1x32xf32, #tpu.memory_space<any>>) dst(%582 : memref<1x32xf32, #tpu.memory_space<vmem>>)
    %c0_i32_459 = arith.constant 0 : i32
    %c2_i32_460 = arith.constant 2 : i32
    %c0_i32_461 = arith.constant 0 : i32
    %585 = tpu.memref_slice %arg3[%23, %c0_i32_461] : memref<100x32xf32, #tpu.memory_space<any>> -> memref<1x32xf32, #tpu.memory_space<any>>
    %c2_i32_462 = arith.constant 2 : i32
    %c0_i32_463 = arith.constant 0 : i32
    %586 = tpu.memref_slice %arg10[%c2_i32_462, %c0_i32_463] : memref<64x32xf32, #tpu.memory_space<vmem>> -> memref<1x32xf32, #tpu.memory_space<vmem>>
    %587 = tpu.memref_slice %arg12[%c0_i32_459, %c2_i32_460] : memref<8x8x!tpu.dma_semaphore, #tpu.memory_space<semaphore_mem>> -> memref<1x1x!tpu.dma_semaphore, #tpu.memory_space<semaphore_mem>>
    %588 = tpu.memref_squeeze %587 : memref<1x1x!tpu.dma_semaphore, #tpu.memory_space<semaphore_mem>> -> memref<!tpu.dma_semaphore, #tpu.memory_space<semaphore_mem>>
    tpu.wait_dma2 semaphore(%588 : memref<!tpu.dma_semaphore, #tpu.memory_space<semaphore_mem>>) src(%585 : memref<1x32xf32, #tpu.memory_space<any>>) dst(%586 : memref<1x32xf32, #tpu.memory_space<vmem>>)
    %c0_i32_464 = arith.constant 0 : i32
    %c3_i32_465 = arith.constant 3 : i32
    %c0_i32_466 = arith.constant 0 : i32
    %589 = tpu.memref_slice %arg3[%32, %c0_i32_466] : memref<100x32xf32, #tpu.memory_space<any>> -> memref<1x32xf32, #tpu.memory_space<any>>
    %c3_i32_467 = arith.constant 3 : i32
    %c0_i32_468 = arith.constant 0 : i32
    %590 = tpu.memref_slice %arg10[%c3_i32_467, %c0_i32_468] : memref<64x32xf32, #tpu.memory_space<vmem>> -> memref<1x32xf32, #tpu.memory_space<vmem>>
    %591 = tpu.memref_slice %arg12[%c0_i32_464, %c3_i32_465] : memref<8x8x!tpu.dma_semaphore, #tpu.memory_space<semaphore_mem>> -> memref<1x1x!tpu.dma_semaphore, #tpu.memory_space<semaphore_mem>>
    %592 = tpu.memref_squeeze %591 : memref<1x1x!tpu.dma_semaphore, #tpu.memory_space<semaphore_mem>> -> memref<!tpu.dma_semaphore, #tpu.memory_space<semaphore_mem>>
    tpu.wait_dma2 semaphore(%592 : memref<!tpu.dma_semaphore, #tpu.memory_space<semaphore_mem>>) src(%589 : memref<1x32xf32, #tpu.memory_space<any>>) dst(%590 : memref<1x32xf32, #tpu.memory_space<vmem>>)
    %c0_i32_469 = arith.constant 0 : i32
    %c4_i32_470 = arith.constant 4 : i32
    %c0_i32_471 = arith.constant 0 : i32
    %593 = tpu.memref_slice %arg3[%41, %c0_i32_471] : memref<100x32xf32, #tpu.memory_space<any>> -> memref<1x32xf32, #tpu.memory_space<any>>
    %c4_i32_472 = arith.constant 4 : i32
    %c0_i32_473 = arith.constant 0 : i32
    %594 = tpu.memref_slice %arg10[%c4_i32_472, %c0_i32_473] : memref<64x32xf32, #tpu.memory_space<vmem>> -> memref<1x32xf32, #tpu.memory_space<vmem>>
    %595 = tpu.memref_slice %arg12[%c0_i32_469, %c4_i32_470] : memref<8x8x!tpu.dma_semaphore, #tpu.memory_space<semaphore_mem>> -> memref<1x1x!tpu.dma_semaphore, #tpu.memory_space<semaphore_mem>>
    %596 = tpu.memref_squeeze %595 : memref<1x1x!tpu.dma_semaphore, #tpu.memory_space<semaphore_mem>> -> memref<!tpu.dma_semaphore, #tpu.memory_space<semaphore_mem>>
    tpu.wait_dma2 semaphore(%596 : memref<!tpu.dma_semaphore, #tpu.memory_space<semaphore_mem>>) src(%593 : memref<1x32xf32, #tpu.memory_space<any>>) dst(%594 : memref<1x32xf32, #tpu.memory_space<vmem>>)
    %c0_i32_474 = arith.constant 0 : i32
    %c5_i32_475 = arith.constant 5 : i32
    %c0_i32_476 = arith.constant 0 : i32
    %597 = tpu.memref_slice %arg3[%50, %c0_i32_476] : memref<100x32xf32, #tpu.memory_space<any>> -> memref<1x32xf32, #tpu.memory_space<any>>
    %c5_i32_477 = arith.constant 5 : i32
    %c0_i32_478 = arith.constant 0 : i32
    %598 = tpu.memref_slice %arg10[%c5_i32_477, %c0_i32_478] : memref<64x32xf32, #tpu.memory_space<vmem>> -> memref<1x32xf32, #tpu.memory_space<vmem>>
    %599 = tpu.memref_slice %arg12[%c0_i32_474, %c5_i32_475] : memref<8x8x!tpu.dma_semaphore, #tpu.memory_space<semaphore_mem>> -> memref<1x1x!tpu.dma_semaphore, #tpu.memory_space<semaphore_mem>>
    %600 = tpu.memref_squeeze %599 : memref<1x1x!tpu.dma_semaphore, #tpu.memory_space<semaphore_mem>> -> memref<!tpu.dma_semaphore, #tpu.memory_space<semaphore_mem>>
    tpu.wait_dma2 semaphore(%600 : memref<!tpu.dma_semaphore, #tpu.memory_space<semaphore_mem>>) src(%597 : memref<1x32xf32, #tpu.memory_space<any>>) dst(%598 : memref<1x32xf32, #tpu.memory_space<vmem>>)
    %c0_i32_479 = arith.constant 0 : i32
    %c6_i32_480 = arith.constant 6 : i32
    %c0_i32_481 = arith.constant 0 : i32
    %601 = tpu.memref_slice %arg3[%59, %c0_i32_481] : memref<100x32xf32, #tpu.memory_space<any>> -> memref<1x32xf32, #tpu.memory_space<any>>
    %c6_i32_482 = arith.constant 6 : i32
    %c0_i32_483 = arith.constant 0 : i32
    %602 = tpu.memref_slice %arg10[%c6_i32_482, %c0_i32_483] : memref<64x32xf32, #tpu.memory_space<vmem>> -> memref<1x32xf32, #tpu.memory_space<vmem>>
    %603 = tpu.memref_slice %arg12[%c0_i32_479, %c6_i32_480] : memref<8x8x!tpu.dma_semaphore, #tpu.memory_space<semaphore_mem>> -> memref<1x1x!tpu.dma_semaphore, #tpu.memory_space<semaphore_mem>>
    %604 = tpu.memref_squeeze %603 : memref<1x1x!tpu.dma_semaphore, #tpu.memory_space<semaphore_mem>> -> memref<!tpu.dma_semaphore, #tpu.memory_space<semaphore_mem>>
    tpu.wait_dma2 semaphore(%604 : memref<!tpu.dma_semaphore, #tpu.memory_space<semaphore_mem>>) src(%601 : memref<1x32xf32, #tpu.memory_space<any>>) dst(%602 : memref<1x32xf32, #tpu.memory_space<vmem>>)
    %c0_i32_484 = arith.constant 0 : i32
    %c7_i32_485 = arith.constant 7 : i32
    %c0_i32_486 = arith.constant 0 : i32
    %605 = tpu.memref_slice %arg3[%68, %c0_i32_486] : memref<100x32xf32, #tpu.memory_space<any>> -> memref<1x32xf32, #tpu.memory_space<any>>
    %c7_i32_487 = arith.constant 7 : i32
    %c0_i32_488 = arith.constant 0 : i32
    %606 = tpu.memref_slice %arg10[%c7_i32_487, %c0_i32_488] : memref<64x32xf32, #tpu.memory_space<vmem>> -> memref<1x32xf32, #tpu.memory_space<vmem>>
    %607 = tpu.memref_slice %arg12[%c0_i32_484, %c7_i32_485] : memref<8x8x!tpu.dma_semaphore, #tpu.memory_space<semaphore_mem>> -> memref<1x1x!tpu.dma_semaphore, #tpu.memory_space<semaphore_mem>>
    %608 = tpu.memref_squeeze %607 : memref<1x1x!tpu.dma_semaphore, #tpu.memory_space<semaphore_mem>> -> memref<!tpu.dma_semaphore, #tpu.memory_space<semaphore_mem>>
    tpu.wait_dma2 semaphore(%608 : memref<!tpu.dma_semaphore, #tpu.memory_space<semaphore_mem>>) src(%605 : memref<1x32xf32, #tpu.memory_space<any>>) dst(%606 : memref<1x32xf32, #tpu.memory_space<vmem>>)
    %c1_i32_489 = arith.constant 1 : i32
    %c0_i32_490 = arith.constant 0 : i32
    %c0_i32_491 = arith.constant 0 : i32
    %609 = tpu.memref_slice %arg3[%77, %c0_i32_491] : memref<100x32xf32, #tpu.memory_space<any>> -> memref<1x32xf32, #tpu.memory_space<any>>
    %c8_i32_492 = arith.constant 8 : i32
    %c0_i32_493 = arith.constant 0 : i32
    %610 = tpu.memref_slice %arg10[%c8_i32_492, %c0_i32_493] : memref<64x32xf32, #tpu.memory_space<vmem>> -> memref<1x32xf32, #tpu.memory_space<vmem>>
    %611 = tpu.memref_slice %arg12[%c1_i32_489, %c0_i32_490] : memref<8x8x!tpu.dma_semaphore, #tpu.memory_space<semaphore_mem>> -> memref<1x1x!tpu.dma_semaphore, #tpu.memory_space<semaphore_mem>>
    %612 = tpu.memref_squeeze %611 : memref<1x1x!tpu.dma_semaphore, #tpu.memory_space<semaphore_mem>> -> memref<!tpu.dma_semaphore, #tpu.memory_space<semaphore_mem>>
    tpu.wait_dma2 semaphore(%612 : memref<!tpu.dma_semaphore, #tpu.memory_space<semaphore_mem>>) src(%609 : memref<1x32xf32, #tpu.memory_space<any>>) dst(%610 : memref<1x32xf32, #tpu.memory_space<vmem>>)
    %c1_i32_494 = arith.constant 1 : i32
    %c1_i32_495 = arith.constant 1 : i32
    %c0_i32_496 = arith.constant 0 : i32
    %613 = tpu.memref_slice %arg3[%86, %c0_i32_496] : memref<100x32xf32, #tpu.memory_space<any>> -> memref<1x32xf32, #tpu.memory_space<any>>
    %c9_i32_497 = arith.constant 9 : i32
    %c0_i32_498 = arith.constant 0 : i32
    %614 = tpu.memref_slice %arg10[%c9_i32_497, %c0_i32_498] : memref<64x32xf32, #tpu.memory_space<vmem>> -> memref<1x32xf32, #tpu.memory_space<vmem>>
    %615 = tpu.memref_slice %arg12[%c1_i32_494, %c1_i32_495] : memref<8x8x!tpu.dma_semaphore, #tpu.memory_space<semaphore_mem>> -> memref<1x1x!tpu.dma_semaphore, #tpu.memory_space<semaphore_mem>>
    %616 = tpu.memref_squeeze %615 : memref<1x1x!tpu.dma_semaphore, #tpu.memory_space<semaphore_mem>> -> memref<!tpu.dma_semaphore, #tpu.memory_space<semaphore_mem>>
    tpu.wait_dma2 semaphore(%616 : memref<!tpu.dma_semaphore, #tpu.memory_space<semaphore_mem>>) src(%613 : memref<1x32xf32, #tpu.memory_space<any>>) dst(%614 : memref<1x32xf32, #tpu.memory_space<vmem>>)
    %c1_i32_499 = arith.constant 1 : i32
    %c2_i32_500 = arith.constant 2 : i32
    %c0_i32_501 = arith.constant 0 : i32
    %617 = tpu.memref_slice %arg3[%95, %c0_i32_501] : memref<100x32xf32, #tpu.memory_space<any>> -> memref<1x32xf32, #tpu.memory_space<any>>
    %c10_i32_502 = arith.constant 10 : i32
    %c0_i32_503 = arith.constant 0 : i32
    %618 = tpu.memref_slice %arg10[%c10_i32_502, %c0_i32_503] : memref<64x32xf32, #tpu.memory_space<vmem>> -> memref<1x32xf32, #tpu.memory_space<vmem>>
    %619 = tpu.memref_slice %arg12[%c1_i32_499, %c2_i32_500] : memref<8x8x!tpu.dma_semaphore, #tpu.memory_space<semaphore_mem>> -> memref<1x1x!tpu.dma_semaphore, #tpu.memory_space<semaphore_mem>>
    %620 = tpu.memref_squeeze %619 : memref<1x1x!tpu.dma_semaphore, #tpu.memory_space<semaphore_mem>> -> memref<!tpu.dma_semaphore, #tpu.memory_space<semaphore_mem>>
    tpu.wait_dma2 semaphore(%620 : memref<!tpu.dma_semaphore, #tpu.memory_space<semaphore_mem>>) src(%617 : memref<1x32xf32, #tpu.memory_space<any>>) dst(%618 : memref<1x32xf32, #tpu.memory_space<vmem>>)
    %c1_i32_504 = arith.constant 1 : i32
    %c3_i32_505 = arith.constant 3 : i32
    %c0_i32_506 = arith.constant 0 : i32
    %621 = tpu.memref_slice %arg3[%104, %c0_i32_506] : memref<100x32xf32, #tpu.memory_space<any>> -> memref<1x32xf32, #tpu.memory_space<any>>
    %c11_i32_507 = arith.constant 11 : i32
    %c0_i32_508 = arith.constant 0 : i32
    %622 = tpu.memref_slice %arg10[%c11_i32_507, %c0_i32_508] : memref<64x32xf32, #tpu.memory_space<vmem>> -> memref<1x32xf32, #tpu.memory_space<vmem>>
    %623 = tpu.memref_slice %arg12[%c1_i32_504, %c3_i32_505] : memref<8x8x!tpu.dma_semaphore, #tpu.memory_space<semaphore_mem>> -> memref<1x1x!tpu.dma_semaphore, #tpu.memory_space<semaphore_mem>>
    %624 = tpu.memref_squeeze %623 : memref<1x1x!tpu.dma_semaphore, #tpu.memory_space<semaphore_mem>> -> memref<!tpu.dma_semaphore, #tpu.memory_space<semaphore_mem>>
    tpu.wait_dma2 semaphore(%624 : memref<!tpu.dma_semaphore, #tpu.memory_space<semaphore_mem>>) src(%621 : memref<1x32xf32, #tpu.memory_space<any>>) dst(%622 : memref<1x32xf32, #tpu.memory_space<vmem>>)
    %c1_i32_509 = arith.constant 1 : i32
    %c4_i32_510 = arith.constant 4 : i32
    %c0_i32_511 = arith.constant 0 : i32
    %625 = tpu.memref_slice %arg3[%113, %c0_i32_511] : memref<100x32xf32, #tpu.memory_space<any>> -> memref<1x32xf32, #tpu.memory_space<any>>
    %c12_i32_512 = arith.constant 12 : i32
    %c0_i32_513 = arith.constant 0 : i32
    %626 = tpu.memref_slice %arg10[%c12_i32_512, %c0_i32_513] : memref<64x32xf32, #tpu.memory_space<vmem>> -> memref<1x32xf32, #tpu.memory_space<vmem>>
    %627 = tpu.memref_slice %arg12[%c1_i32_509, %c4_i32_510] : memref<8x8x!tpu.dma_semaphore, #tpu.memory_space<semaphore_mem>> -> memref<1x1x!tpu.dma_semaphore, #tpu.memory_space<semaphore_mem>>
    %628 = tpu.memref_squeeze %627 : memref<1x1x!tpu.dma_semaphore, #tpu.memory_space<semaphore_mem>> -> memref<!tpu.dma_semaphore, #tpu.memory_space<semaphore_mem>>
    tpu.wait_dma2 semaphore(%628 : memref<!tpu.dma_semaphore, #tpu.memory_space<semaphore_mem>>) src(%625 : memref<1x32xf32, #tpu.memory_space<any>>) dst(%626 : memref<1x32xf32, #tpu.memory_space<vmem>>)
    %c1_i32_514 = arith.constant 1 : i32
    %c5_i32_515 = arith.constant 5 : i32
    %c0_i32_516 = arith.constant 0 : i32
    %629 = tpu.memref_slice %arg3[%122, %c0_i32_516] : memref<100x32xf32, #tpu.memory_space<any>> -> memref<1x32xf32, #tpu.memory_space<any>>
    %c13_i32_517 = arith.constant 13 : i32
    %c0_i32_518 = arith.constant 0 : i32
    %630 = tpu.memref_slice %arg10[%c13_i32_517, %c0_i32_518] : memref<64x32xf32, #tpu.memory_space<vmem>> -> memref<1x32xf32, #tpu.memory_space<vmem>>
    %631 = tpu.memref_slice %arg12[%c1_i32_514, %c5_i32_515] : memref<8x8x!tpu.dma_semaphore, #tpu.memory_space<semaphore_mem>> -> memref<1x1x!tpu.dma_semaphore, #tpu.memory_space<semaphore_mem>>
    %632 = tpu.memref_squeeze %631 : memref<1x1x!tpu.dma_semaphore, #tpu.memory_space<semaphore_mem>> -> memref<!tpu.dma_semaphore, #tpu.memory_space<semaphore_mem>>
    tpu.wait_dma2 semaphore(%632 : memref<!tpu.dma_semaphore, #tpu.memory_space<semaphore_mem>>) src(%629 : memref<1x32xf32, #tpu.memory_space<any>>) dst(%630 : memref<1x32xf32, #tpu.memory_space<vmem>>)
    %c1_i32_519 = arith.constant 1 : i32
    %c6_i32_520 = arith.constant 6 : i32
    %c0_i32_521 = arith.constant 0 : i32
    %633 = tpu.memref_slice %arg3[%131, %c0_i32_521] : memref<100x32xf32, #tpu.memory_space<any>> -> memref<1x32xf32, #tpu.memory_space<any>>
    %c14_i32_522 = arith.constant 14 : i32
    %c0_i32_523 = arith.constant 0 : i32
    %634 = tpu.memref_slice %arg10[%c14_i32_522, %c0_i32_523] : memref<64x32xf32, #tpu.memory_space<vmem>> -> memref<1x32xf32, #tpu.memory_space<vmem>>
    %635 = tpu.memref_slice %arg12[%c1_i32_519, %c6_i32_520] : memref<8x8x!tpu.dma_semaphore, #tpu.memory_space<semaphore_mem>> -> memref<1x1x!tpu.dma_semaphore, #tpu.memory_space<semaphore_mem>>
    %636 = tpu.memref_squeeze %635 : memref<1x1x!tpu.dma_semaphore, #tpu.memory_space<semaphore_mem>> -> memref<!tpu.dma_semaphore, #tpu.memory_space<semaphore_mem>>
    tpu.wait_dma2 semaphore(%636 : memref<!tpu.dma_semaphore, #tpu.memory_space<semaphore_mem>>) src(%633 : memref<1x32xf32, #tpu.memory_space<any>>) dst(%634 : memref<1x32xf32, #tpu.memory_space<vmem>>)
    %c1_i32_524 = arith.constant 1 : i32
    %c7_i32_525 = arith.constant 7 : i32
    %c0_i32_526 = arith.constant 0 : i32
    %637 = tpu.memref_slice %arg3[%140, %c0_i32_526] : memref<100x32xf32, #tpu.memory_space<any>> -> memref<1x32xf32, #tpu.memory_space<any>>
    %c15_i32_527 = arith.constant 15 : i32
    %c0_i32_528 = arith.constant 0 : i32
    %638 = tpu.memref_slice %arg10[%c15_i32_527, %c0_i32_528] : memref<64x32xf32, #tpu.memory_space<vmem>> -> memref<1x32xf32, #tpu.memory_space<vmem>>
    %639 = tpu.memref_slice %arg12[%c1_i32_524, %c7_i32_525] : memref<8x8x!tpu.dma_semaphore, #tpu.memory_space<semaphore_mem>> -> memref<1x1x!tpu.dma_semaphore, #tpu.memory_space<semaphore_mem>>
    %640 = tpu.memref_squeeze %639 : memref<1x1x!tpu.dma_semaphore, #tpu.memory_space<semaphore_mem>> -> memref<!tpu.dma_semaphore, #tpu.memory_space<semaphore_mem>>
    tpu.wait_dma2 semaphore(%640 : memref<!tpu.dma_semaphore, #tpu.memory_space<semaphore_mem>>) src(%637 : memref<1x32xf32, #tpu.memory_space<any>>) dst(%638 : memref<1x32xf32, #tpu.memory_space<vmem>>)
    %c2_i32_529 = arith.constant 2 : i32
    %c0_i32_530 = arith.constant 0 : i32
    %c0_i32_531 = arith.constant 0 : i32
    %641 = tpu.memref_slice %arg3[%149, %c0_i32_531] : memref<100x32xf32, #tpu.memory_space<any>> -> memref<1x32xf32, #tpu.memory_space<any>>
    %c16_i32_532 = arith.constant 16 : i32
    %c0_i32_533 = arith.constant 0 : i32
    %642 = tpu.memref_slice %arg10[%c16_i32_532, %c0_i32_533] : memref<64x32xf32, #tpu.memory_space<vmem>> -> memref<1x32xf32, #tpu.memory_space<vmem>>
    %643 = tpu.memref_slice %arg12[%c2_i32_529, %c0_i32_530] : memref<8x8x!tpu.dma_semaphore, #tpu.memory_space<semaphore_mem>> -> memref<1x1x!tpu.dma_semaphore, #tpu.memory_space<semaphore_mem>>
    %644 = tpu.memref_squeeze %643 : memref<1x1x!tpu.dma_semaphore, #tpu.memory_space<semaphore_mem>> -> memref<!tpu.dma_semaphore, #tpu.memory_space<semaphore_mem>>
    tpu.wait_dma2 semaphore(%644 : memref<!tpu.dma_semaphore, #tpu.memory_space<semaphore_mem>>) src(%641 : memref<1x32xf32, #tpu.memory_space<any>>) dst(%642 : memref<1x32xf32, #tpu.memory_space<vmem>>)
    %c2_i32_534 = arith.constant 2 : i32
    %c1_i32_535 = arith.constant 1 : i32
    %c0_i32_536 = arith.constant 0 : i32
    %645 = tpu.memref_slice %arg3[%158, %c0_i32_536] : memref<100x32xf32, #tpu.memory_space<any>> -> memref<1x32xf32, #tpu.memory_space<any>>
    %c17_i32_537 = arith.constant 17 : i32
    %c0_i32_538 = arith.constant 0 : i32
    %646 = tpu.memref_slice %arg10[%c17_i32_537, %c0_i32_538] : memref<64x32xf32, #tpu.memory_space<vmem>> -> memref<1x32xf32, #tpu.memory_space<vmem>>
    %647 = tpu.memref_slice %arg12[%c2_i32_534, %c1_i32_535] : memref<8x8x!tpu.dma_semaphore, #tpu.memory_space<semaphore_mem>> -> memref<1x1x!tpu.dma_semaphore, #tpu.memory_space<semaphore_mem>>
    %648 = tpu.memref_squeeze %647 : memref<1x1x!tpu.dma_semaphore, #tpu.memory_space<semaphore_mem>> -> memref<!tpu.dma_semaphore, #tpu.memory_space<semaphore_mem>>
    tpu.wait_dma2 semaphore(%648 : memref<!tpu.dma_semaphore, #tpu.memory_space<semaphore_mem>>) src(%645 : memref<1x32xf32, #tpu.memory_space<any>>) dst(%646 : memref<1x32xf32, #tpu.memory_space<vmem>>)
    %c2_i32_539 = arith.constant 2 : i32
    %c2_i32_540 = arith.constant 2 : i32
    %c0_i32_541 = arith.constant 0 : i32
    %649 = tpu.memref_slice %arg3[%167, %c0_i32_541] : memref<100x32xf32, #tpu.memory_space<any>> -> memref<1x32xf32, #tpu.memory_space<any>>
    %c18_i32_542 = arith.constant 18 : i32
    %c0_i32_543 = arith.constant 0 : i32
    %650 = tpu.memref_slice %arg10[%c18_i32_542, %c0_i32_543] : memref<64x32xf32, #tpu.memory_space<vmem>> -> memref<1x32xf32, #tpu.memory_space<vmem>>
    %651 = tpu.memref_slice %arg12[%c2_i32_539, %c2_i32_540] : memref<8x8x!tpu.dma_semaphore, #tpu.memory_space<semaphore_mem>> -> memref<1x1x!tpu.dma_semaphore, #tpu.memory_space<semaphore_mem>>
    %652 = tpu.memref_squeeze %651 : memref<1x1x!tpu.dma_semaphore, #tpu.memory_space<semaphore_mem>> -> memref<!tpu.dma_semaphore, #tpu.memory_space<semaphore_mem>>
    tpu.wait_dma2 semaphore(%652 : memref<!tpu.dma_semaphore, #tpu.memory_space<semaphore_mem>>) src(%649 : memref<1x32xf32, #tpu.memory_space<any>>) dst(%650 : memref<1x32xf32, #tpu.memory_space<vmem>>)
    %c2_i32_544 = arith.constant 2 : i32
    %c3_i32_545 = arith.constant 3 : i32
    %c0_i32_546 = arith.constant 0 : i32
    %653 = tpu.memref_slice %arg3[%176, %c0_i32_546] : memref<100x32xf32, #tpu.memory_space<any>> -> memref<1x32xf32, #tpu.memory_space<any>>
    %c19_i32_547 = arith.constant 19 : i32
    %c0_i32_548 = arith.constant 0 : i32
    %654 = tpu.memref_slice %arg10[%c19_i32_547, %c0_i32_548] : memref<64x32xf32, #tpu.memory_space<vmem>> -> memref<1x32xf32, #tpu.memory_space<vmem>>
    %655 = tpu.memref_slice %arg12[%c2_i32_544, %c3_i32_545] : memref<8x8x!tpu.dma_semaphore, #tpu.memory_space<semaphore_mem>> -> memref<1x1x!tpu.dma_semaphore, #tpu.memory_space<semaphore_mem>>
    %656 = tpu.memref_squeeze %655 : memref<1x1x!tpu.dma_semaphore, #tpu.memory_space<semaphore_mem>> -> memref<!tpu.dma_semaphore, #tpu.memory_space<semaphore_mem>>
    tpu.wait_dma2 semaphore(%656 : memref<!tpu.dma_semaphore, #tpu.memory_space<semaphore_mem>>) src(%653 : memref<1x32xf32, #tpu.memory_space<any>>) dst(%654 : memref<1x32xf32, #tpu.memory_space<vmem>>)
    %c2_i32_549 = arith.constant 2 : i32
    %c4_i32_550 = arith.constant 4 : i32
    %c0_i32_551 = arith.constant 0 : i32
    %657 = tpu.memref_slice %arg3[%185, %c0_i32_551] : memref<100x32xf32, #tpu.memory_space<any>> -> memref<1x32xf32, #tpu.memory_space<any>>
    %c20_i32_552 = arith.constant 20 : i32
    %c0_i32_553 = arith.constant 0 : i32
    %658 = tpu.memref_slice %arg10[%c20_i32_552, %c0_i32_553] : memref<64x32xf32, #tpu.memory_space<vmem>> -> memref<1x32xf32, #tpu.memory_space<vmem>>
    %659 = tpu.memref_slice %arg12[%c2_i32_549, %c4_i32_550] : memref<8x8x!tpu.dma_semaphore, #tpu.memory_space<semaphore_mem>> -> memref<1x1x!tpu.dma_semaphore, #tpu.memory_space<semaphore_mem>>
    %660 = tpu.memref_squeeze %659 : memref<1x1x!tpu.dma_semaphore, #tpu.memory_space<semaphore_mem>> -> memref<!tpu.dma_semaphore, #tpu.memory_space<semaphore_mem>>
    tpu.wait_dma2 semaphore(%660 : memref<!tpu.dma_semaphore, #tpu.memory_space<semaphore_mem>>) src(%657 : memref<1x32xf32, #tpu.memory_space<any>>) dst(%658 : memref<1x32xf32, #tpu.memory_space<vmem>>)
    %c2_i32_554 = arith.constant 2 : i32
    %c5_i32_555 = arith.constant 5 : i32
    %c0_i32_556 = arith.constant 0 : i32
    %661 = tpu.memref_slice %arg3[%194, %c0_i32_556] : memref<100x32xf32, #tpu.memory_space<any>> -> memref<1x32xf32, #tpu.memory_space<any>>
    %c21_i32_557 = arith.constant 21 : i32
    %c0_i32_558 = arith.constant 0 : i32
    %662 = tpu.memref_slice %arg10[%c21_i32_557, %c0_i32_558] : memref<64x32xf32, #tpu.memory_space<vmem>> -> memref<1x32xf32, #tpu.memory_space<vmem>>
    %663 = tpu.memref_slice %arg12[%c2_i32_554, %c5_i32_555] : memref<8x8x!tpu.dma_semaphore, #tpu.memory_space<semaphore_mem>> -> memref<1x1x!tpu.dma_semaphore, #tpu.memory_space<semaphore_mem>>
    %664 = tpu.memref_squeeze %663 : memref<1x1x!tpu.dma_semaphore, #tpu.memory_space<semaphore_mem>> -> memref<!tpu.dma_semaphore, #tpu.memory_space<semaphore_mem>>
    tpu.wait_dma2 semaphore(%664 : memref<!tpu.dma_semaphore, #tpu.memory_space<semaphore_mem>>) src(%661 : memref<1x32xf32, #tpu.memory_space<any>>) dst(%662 : memref<1x32xf32, #tpu.memory_space<vmem>>)
    %c2_i32_559 = arith.constant 2 : i32
    %c6_i32_560 = arith.constant 6 : i32
    %c0_i32_561 = arith.constant 0 : i32
    %665 = tpu.memref_slice %arg3[%203, %c0_i32_561] : memref<100x32xf32, #tpu.memory_space<any>> -> memref<1x32xf32, #tpu.memory_space<any>>
    %c22_i32_562 = arith.constant 22 : i32
    %c0_i32_563 = arith.constant 0 : i32
    %666 = tpu.memref_slice %arg10[%c22_i32_562, %c0_i32_563] : memref<64x32xf32, #tpu.memory_space<vmem>> -> memref<1x32xf32, #tpu.memory_space<vmem>>
    %667 = tpu.memref_slice %arg12[%c2_i32_559, %c6_i32_560] : memref<8x8x!tpu.dma_semaphore, #tpu.memory_space<semaphore_mem>> -> memref<1x1x!tpu.dma_semaphore, #tpu.memory_space<semaphore_mem>>
    %668 = tpu.memref_squeeze %667 : memref<1x1x!tpu.dma_semaphore, #tpu.memory_space<semaphore_mem>> -> memref<!tpu.dma_semaphore, #tpu.memory_space<semaphore_mem>>
    tpu.wait_dma2 semaphore(%668 : memref<!tpu.dma_semaphore, #tpu.memory_space<semaphore_mem>>) src(%665 : memref<1x32xf32, #tpu.memory_space<any>>) dst(%666 : memref<1x32xf32, #tpu.memory_space<vmem>>)
    %c2_i32_564 = arith.constant 2 : i32
    %c7_i32_565 = arith.constant 7 : i32
    %c0_i32_566 = arith.constant 0 : i32
    %669 = tpu.memref_slice %arg3[%212, %c0_i32_566] : memref<100x32xf32, #tpu.memory_space<any>> -> memref<1x32xf32, #tpu.memory_space<any>>
    %c23_i32_567 = arith.constant 23 : i32
    %c0_i32_568 = arith.constant 0 : i32
    %670 = tpu.memref_slice %arg10[%c23_i32_567, %c0_i32_568] : memref<64x32xf32, #tpu.memory_space<vmem>> -> memref<1x32xf32, #tpu.memory_space<vmem>>
    %671 = tpu.memref_slice %arg12[%c2_i32_564, %c7_i32_565] : memref<8x8x!tpu.dma_semaphore, #tpu.memory_space<semaphore_mem>> -> memref<1x1x!tpu.dma_semaphore, #tpu.memory_space<semaphore_mem>>
    %672 = tpu.memref_squeeze %671 : memref<1x1x!tpu.dma_semaphore, #tpu.memory_space<semaphore_mem>> -> memref<!tpu.dma_semaphore, #tpu.memory_space<semaphore_mem>>
    tpu.wait_dma2 semaphore(%672 : memref<!tpu.dma_semaphore, #tpu.memory_space<semaphore_mem>>) src(%669 : memref<1x32xf32, #tpu.memory_space<any>>) dst(%670 : memref<1x32xf32, #tpu.memory_space<vmem>>)
    %c3_i32_569 = arith.constant 3 : i32
    %c0_i32_570 = arith.constant 0 : i32
    %c0_i32_571 = arith.constant 0 : i32
    %673 = tpu.memref_slice %arg3[%221, %c0_i32_571] : memref<100x32xf32, #tpu.memory_space<any>> -> memref<1x32xf32, #tpu.memory_space<any>>
    %c24_i32_572 = arith.constant 24 : i32
    %c0_i32_573 = arith.constant 0 : i32
    %674 = tpu.memref_slice %arg10[%c24_i32_572, %c0_i32_573] : memref<64x32xf32, #tpu.memory_space<vmem>> -> memref<1x32xf32, #tpu.memory_space<vmem>>
    %675 = tpu.memref_slice %arg12[%c3_i32_569, %c0_i32_570] : memref<8x8x!tpu.dma_semaphore, #tpu.memory_space<semaphore_mem>> -> memref<1x1x!tpu.dma_semaphore, #tpu.memory_space<semaphore_mem>>
    %676 = tpu.memref_squeeze %675 : memref<1x1x!tpu.dma_semaphore, #tpu.memory_space<semaphore_mem>> -> memref<!tpu.dma_semaphore, #tpu.memory_space<semaphore_mem>>
    tpu.wait_dma2 semaphore(%676 : memref<!tpu.dma_semaphore, #tpu.memory_space<semaphore_mem>>) src(%673 : memref<1x32xf32, #tpu.memory_space<any>>) dst(%674 : memref<1x32xf32, #tpu.memory_space<vmem>>)
    %c3_i32_574 = arith.constant 3 : i32
    %c1_i32_575 = arith.constant 1 : i32
    %c0_i32_576 = arith.constant 0 : i32
    %677 = tpu.memref_slice %arg3[%230, %c0_i32_576] : memref<100x32xf32, #tpu.memory_space<any>> -> memref<1x32xf32, #tpu.memory_space<any>>
    %c25_i32_577 = arith.constant 25 : i32
    %c0_i32_578 = arith.constant 0 : i32
    %678 = tpu.memref_slice %arg10[%c25_i32_577, %c0_i32_578] : memref<64x32xf32, #tpu.memory_space<vmem>> -> memref<1x32xf32, #tpu.memory_space<vmem>>
    %679 = tpu.memref_slice %arg12[%c3_i32_574, %c1_i32_575] : memref<8x8x!tpu.dma_semaphore, #tpu.memory_space<semaphore_mem>> -> memref<1x1x!tpu.dma_semaphore, #tpu.memory_space<semaphore_mem>>
    %680 = tpu.memref_squeeze %679 : memref<1x1x!tpu.dma_semaphore, #tpu.memory_space<semaphore_mem>> -> memref<!tpu.dma_semaphore, #tpu.memory_space<semaphore_mem>>
    tpu.wait_dma2 semaphore(%680 : memref<!tpu.dma_semaphore, #tpu.memory_space<semaphore_mem>>) src(%677 : memref<1x32xf32, #tpu.memory_space<any>>) dst(%678 : memref<1x32xf32, #tpu.memory_space<vmem>>)
    %c3_i32_579 = arith.constant 3 : i32
    %c2_i32_580 = arith.constant 2 : i32
    %c0_i32_581 = arith.constant 0 : i32
    %681 = tpu.memref_slice %arg3[%239, %c0_i32_581] : memref<100x32xf32, #tpu.memory_space<any>> -> memref<1x32xf32, #tpu.memory_space<any>>
    %c26_i32_582 = arith.constant 26 : i32
    %c0_i32_583 = arith.constant 0 : i32
    %682 = tpu.memref_slice %arg10[%c26_i32_582, %c0_i32_583] : memref<64x32xf32, #tpu.memory_space<vmem>> -> memref<1x32xf32, #tpu.memory_space<vmem>>
    %683 = tpu.memref_slice %arg12[%c3_i32_579, %c2_i32_580] : memref<8x8x!tpu.dma_semaphore, #tpu.memory_space<semaphore_mem>> -> memref<1x1x!tpu.dma_semaphore, #tpu.memory_space<semaphore_mem>>
    %684 = tpu.memref_squeeze %683 : memref<1x1x!tpu.dma_semaphore, #tpu.memory_space<semaphore_mem>> -> memref<!tpu.dma_semaphore, #tpu.memory_space<semaphore_mem>>
    tpu.wait_dma2 semaphore(%684 : memref<!tpu.dma_semaphore, #tpu.memory_space<semaphore_mem>>) src(%681 : memref<1x32xf32, #tpu.memory_space<any>>) dst(%682 : memref<1x32xf32, #tpu.memory_space<vmem>>)
    %c3_i32_584 = arith.constant 3 : i32
    %c3_i32_585 = arith.constant 3 : i32
    %c0_i32_586 = arith.constant 0 : i32
    %685 = tpu.memref_slice %arg3[%248, %c0_i32_586] : memref<100x32xf32, #tpu.memory_space<any>> -> memref<1x32xf32, #tpu.memory_space<any>>
    %c27_i32_587 = arith.constant 27 : i32
    %c0_i32_588 = arith.constant 0 : i32
    %686 = tpu.memref_slice %arg10[%c27_i32_587, %c0_i32_588] : memref<64x32xf32, #tpu.memory_space<vmem>> -> memref<1x32xf32, #tpu.memory_space<vmem>>
    %687 = tpu.memref_slice %arg12[%c3_i32_584, %c3_i32_585] : memref<8x8x!tpu.dma_semaphore, #tpu.memory_space<semaphore_mem>> -> memref<1x1x!tpu.dma_semaphore, #tpu.memory_space<semaphore_mem>>
    %688 = tpu.memref_squeeze %687 : memref<1x1x!tpu.dma_semaphore, #tpu.memory_space<semaphore_mem>> -> memref<!tpu.dma_semaphore, #tpu.memory_space<semaphore_mem>>
    tpu.wait_dma2 semaphore(%688 : memref<!tpu.dma_semaphore, #tpu.memory_space<semaphore_mem>>) src(%685 : memref<1x32xf32, #tpu.memory_space<any>>) dst(%686 : memref<1x32xf32, #tpu.memory_space<vmem>>)
    %c3_i32_589 = arith.constant 3 : i32
    %c4_i32_590 = arith.constant 4 : i32
    %c0_i32_591 = arith.constant 0 : i32
    %689 = tpu.memref_slice %arg3[%257, %c0_i32_591] : memref<100x32xf32, #tpu.memory_space<any>> -> memref<1x32xf32, #tpu.memory_space<any>>
    %c28_i32_592 = arith.constant 28 : i32
    %c0_i32_593 = arith.constant 0 : i32
    %690 = tpu.memref_slice %arg10[%c28_i32_592, %c0_i32_593] : memref<64x32xf32, #tpu.memory_space<vmem>> -> memref<1x32xf32, #tpu.memory_space<vmem>>
    %691 = tpu.memref_slice %arg12[%c3_i32_589, %c4_i32_590] : memref<8x8x!tpu.dma_semaphore, #tpu.memory_space<semaphore_mem>> -> memref<1x1x!tpu.dma_semaphore, #tpu.memory_space<semaphore_mem>>
    %692 = tpu.memref_squeeze %691 : memref<1x1x!tpu.dma_semaphore, #tpu.memory_space<semaphore_mem>> -> memref<!tpu.dma_semaphore, #tpu.memory_space<semaphore_mem>>
    tpu.wait_dma2 semaphore(%692 : memref<!tpu.dma_semaphore, #tpu.memory_space<semaphore_mem>>) src(%689 : memref<1x32xf32, #tpu.memory_space<any>>) dst(%690 : memref<1x32xf32, #tpu.memory_space<vmem>>)
    %c3_i32_594 = arith.constant 3 : i32
    %c5_i32_595 = arith.constant 5 : i32
    %c0_i32_596 = arith.constant 0 : i32
    %693 = tpu.memref_slice %arg3[%266, %c0_i32_596] : memref<100x32xf32, #tpu.memory_space<any>> -> memref<1x32xf32, #tpu.memory_space<any>>
    %c29_i32_597 = arith.constant 29 : i32
    %c0_i32_598 = arith.constant 0 : i32
    %694 = tpu.memref_slice %arg10[%c29_i32_597, %c0_i32_598] : memref<64x32xf32, #tpu.memory_space<vmem>> -> memref<1x32xf32, #tpu.memory_space<vmem>>
    %695 = tpu.memref_slice %arg12[%c3_i32_594, %c5_i32_595] : memref<8x8x!tpu.dma_semaphore, #tpu.memory_space<semaphore_mem>> -> memref<1x1x!tpu.dma_semaphore, #tpu.memory_space<semaphore_mem>>
    %696 = tpu.memref_squeeze %695 : memref<1x1x!tpu.dma_semaphore, #tpu.memory_space<semaphore_mem>> -> memref<!tpu.dma_semaphore, #tpu.memory_space<semaphore_mem>>
    tpu.wait_dma2 semaphore(%696 : memref<!tpu.dma_semaphore, #tpu.memory_space<semaphore_mem>>) src(%693 : memref<1x32xf32, #tpu.memory_space<any>>) dst(%694 : memref<1x32xf32, #tpu.memory_space<vmem>>)
    %c3_i32_599 = arith.constant 3 : i32
    %c6_i32_600 = arith.constant 6 : i32
    %c0_i32_601 = arith.constant 0 : i32
    %697 = tpu.memref_slice %arg3[%275, %c0_i32_601] : memref<100x32xf32, #tpu.memory_space<any>> -> memref<1x32xf32, #tpu.memory_space<any>>
    %c30_i32_602 = arith.constant 30 : i32
    %c0_i32_603 = arith.constant 0 : i32
    %698 = tpu.memref_slice %arg10[%c30_i32_602, %c0_i32_603] : memref<64x32xf32, #tpu.memory_space<vmem>> -> memref<1x32xf32, #tpu.memory_space<vmem>>
    %699 = tpu.memref_slice %arg12[%c3_i32_599, %c6_i32_600] : memref<8x8x!tpu.dma_semaphore, #tpu.memory_space<semaphore_mem>> -> memref<1x1x!tpu.dma_semaphore, #tpu.memory_space<semaphore_mem>>
    %700 = tpu.memref_squeeze %699 : memref<1x1x!tpu.dma_semaphore, #tpu.memory_space<semaphore_mem>> -> memref<!tpu.dma_semaphore, #tpu.memory_space<semaphore_mem>>
    tpu.wait_dma2 semaphore(%700 : memref<!tpu.dma_semaphore, #tpu.memory_space<semaphore_mem>>) src(%697 : memref<1x32xf32, #tpu.memory_space<any>>) dst(%698 : memref<1x32xf32, #tpu.memory_space<vmem>>)
    %c3_i32_604 = arith.constant 3 : i32
    %c7_i32_605 = arith.constant 7 : i32
    %c0_i32_606 = arith.constant 0 : i32
    %701 = tpu.memref_slice %arg3[%284, %c0_i32_606] : memref<100x32xf32, #tpu.memory_space<any>> -> memref<1x32xf32, #tpu.memory_space<any>>
    %c31_i32_607 = arith.constant 31 : i32
    %c0_i32_608 = arith.constant 0 : i32
    %702 = tpu.memref_slice %arg10[%c31_i32_607, %c0_i32_608] : memref<64x32xf32, #tpu.memory_space<vmem>> -> memref<1x32xf32, #tpu.memory_space<vmem>>
    %703 = tpu.memref_slice %arg12[%c3_i32_604, %c7_i32_605] : memref<8x8x!tpu.dma_semaphore, #tpu.memory_space<semaphore_mem>> -> memref<1x1x!tpu.dma_semaphore, #tpu.memory_space<semaphore_mem>>
    %704 = tpu.memref_squeeze %703 : memref<1x1x!tpu.dma_semaphore, #tpu.memory_space<semaphore_mem>> -> memref<!tpu.dma_semaphore, #tpu.memory_space<semaphore_mem>>
    tpu.wait_dma2 semaphore(%704 : memref<!tpu.dma_semaphore, #tpu.memory_space<semaphore_mem>>) src(%701 : memref<1x32xf32, #tpu.memory_space<any>>) dst(%702 : memref<1x32xf32, #tpu.memory_space<vmem>>)
    %c4_i32_609 = arith.constant 4 : i32
    %c0_i32_610 = arith.constant 0 : i32
    %c0_i32_611 = arith.constant 0 : i32
    %705 = tpu.memref_slice %arg3[%293, %c0_i32_611] : memref<100x32xf32, #tpu.memory_space<any>> -> memref<1x32xf32, #tpu.memory_space<any>>
    %c32_i32_612 = arith.constant 32 : i32
    %c0_i32_613 = arith.constant 0 : i32
    %706 = tpu.memref_slice %arg10[%c32_i32_612, %c0_i32_613] : memref<64x32xf32, #tpu.memory_space<vmem>> -> memref<1x32xf32, #tpu.memory_space<vmem>>
    %707 = tpu.memref_slice %arg12[%c4_i32_609, %c0_i32_610] : memref<8x8x!tpu.dma_semaphore, #tpu.memory_space<semaphore_mem>> -> memref<1x1x!tpu.dma_semaphore, #tpu.memory_space<semaphore_mem>>
    %708 = tpu.memref_squeeze %707 : memref<1x1x!tpu.dma_semaphore, #tpu.memory_space<semaphore_mem>> -> memref<!tpu.dma_semaphore, #tpu.memory_space<semaphore_mem>>
    tpu.wait_dma2 semaphore(%708 : memref<!tpu.dma_semaphore, #tpu.memory_space<semaphore_mem>>) src(%705 : memref<1x32xf32, #tpu.memory_space<any>>) dst(%706 : memref<1x32xf32, #tpu.memory_space<vmem>>)
    %c4_i32_614 = arith.constant 4 : i32
    %c1_i32_615 = arith.constant 1 : i32
    %c0_i32_616 = arith.constant 0 : i32
    %709 = tpu.memref_slice %arg3[%302, %c0_i32_616] : memref<100x32xf32, #tpu.memory_space<any>> -> memref<1x32xf32, #tpu.memory_space<any>>
    %c33_i32_617 = arith.constant 33 : i32
    %c0_i32_618 = arith.constant 0 : i32
    %710 = tpu.memref_slice %arg10[%c33_i32_617, %c0_i32_618] : memref<64x32xf32, #tpu.memory_space<vmem>> -> memref<1x32xf32, #tpu.memory_space<vmem>>
    %711 = tpu.memref_slice %arg12[%c4_i32_614, %c1_i32_615] : memref<8x8x!tpu.dma_semaphore, #tpu.memory_space<semaphore_mem>> -> memref<1x1x!tpu.dma_semaphore, #tpu.memory_space<semaphore_mem>>
    %712 = tpu.memref_squeeze %711 : memref<1x1x!tpu.dma_semaphore, #tpu.memory_space<semaphore_mem>> -> memref<!tpu.dma_semaphore, #tpu.memory_space<semaphore_mem>>
    tpu.wait_dma2 semaphore(%712 : memref<!tpu.dma_semaphore, #tpu.memory_space<semaphore_mem>>) src(%709 : memref<1x32xf32, #tpu.memory_space<any>>) dst(%710 : memref<1x32xf32, #tpu.memory_space<vmem>>)
    %c4_i32_619 = arith.constant 4 : i32
    %c2_i32_620 = arith.constant 2 : i32
    %c0_i32_621 = arith.constant 0 : i32
    %713 = tpu.memref_slice %arg3[%311, %c0_i32_621] : memref<100x32xf32, #tpu.memory_space<any>> -> memref<1x32xf32, #tpu.memory_space<any>>
    %c34_i32_622 = arith.constant 34 : i32
    %c0_i32_623 = arith.constant 0 : i32
    %714 = tpu.memref_slice %arg10[%c34_i32_622, %c0_i32_623] : memref<64x32xf32, #tpu.memory_space<vmem>> -> memref<1x32xf32, #tpu.memory_space<vmem>>
    %715 = tpu.memref_slice %arg12[%c4_i32_619, %c2_i32_620] : memref<8x8x!tpu.dma_semaphore, #tpu.memory_space<semaphore_mem>> -> memref<1x1x!tpu.dma_semaphore, #tpu.memory_space<semaphore_mem>>
    %716 = tpu.memref_squeeze %715 : memref<1x1x!tpu.dma_semaphore, #tpu.memory_space<semaphore_mem>> -> memref<!tpu.dma_semaphore, #tpu.memory_space<semaphore_mem>>
    tpu.wait_dma2 semaphore(%716 : memref<!tpu.dma_semaphore, #tpu.memory_space<semaphore_mem>>) src(%713 : memref<1x32xf32, #tpu.memory_space<any>>) dst(%714 : memref<1x32xf32, #tpu.memory_space<vmem>>)
    %c4_i32_624 = arith.constant 4 : i32
    %c3_i32_625 = arith.constant 3 : i32
    %c0_i32_626 = arith.constant 0 : i32
    %717 = tpu.memref_slice %arg3[%320, %c0_i32_626] : memref<100x32xf32, #tpu.memory_space<any>> -> memref<1x32xf32, #tpu.memory_space<any>>
    %c35_i32_627 = arith.constant 35 : i32
    %c0_i32_628 = arith.constant 0 : i32
    %718 = tpu.memref_slice %arg10[%c35_i32_627, %c0_i32_628] : memref<64x32xf32, #tpu.memory_space<vmem>> -> memref<1x32xf32, #tpu.memory_space<vmem>>
    %719 = tpu.memref_slice %arg12[%c4_i32_624, %c3_i32_625] : memref<8x8x!tpu.dma_semaphore, #tpu.memory_space<semaphore_mem>> -> memref<1x1x!tpu.dma_semaphore, #tpu.memory_space<semaphore_mem>>
    %720 = tpu.memref_squeeze %719 : memref<1x1x!tpu.dma_semaphore, #tpu.memory_space<semaphore_mem>> -> memref<!tpu.dma_semaphore, #tpu.memory_space<semaphore_mem>>
    tpu.wait_dma2 semaphore(%720 : memref<!tpu.dma_semaphore, #tpu.memory_space<semaphore_mem>>) src(%717 : memref<1x32xf32, #tpu.memory_space<any>>) dst(%718 : memref<1x32xf32, #tpu.memory_space<vmem>>)
    %c4_i32_629 = arith.constant 4 : i32
    %c4_i32_630 = arith.constant 4 : i32
    %c0_i32_631 = arith.constant 0 : i32
    %721 = tpu.memref_slice %arg3[%329, %c0_i32_631] : memref<100x32xf32, #tpu.memory_space<any>> -> memref<1x32xf32, #tpu.memory_space<any>>
    %c36_i32_632 = arith.constant 36 : i32
    %c0_i32_633 = arith.constant 0 : i32
    %722 = tpu.memref_slice %arg10[%c36_i32_632, %c0_i32_633] : memref<64x32xf32, #tpu.memory_space<vmem>> -> memref<1x32xf32, #tpu.memory_space<vmem>>
    %723 = tpu.memref_slice %arg12[%c4_i32_629, %c4_i32_630] : memref<8x8x!tpu.dma_semaphore, #tpu.memory_space<semaphore_mem>> -> memref<1x1x!tpu.dma_semaphore, #tpu.memory_space<semaphore_mem>>
    %724 = tpu.memref_squeeze %723 : memref<1x1x!tpu.dma_semaphore, #tpu.memory_space<semaphore_mem>> -> memref<!tpu.dma_semaphore, #tpu.memory_space<semaphore_mem>>
    tpu.wait_dma2 semaphore(%724 : memref<!tpu.dma_semaphore, #tpu.memory_space<semaphore_mem>>) src(%721 : memref<1x32xf32, #tpu.memory_space<any>>) dst(%722 : memref<1x32xf32, #tpu.memory_space<vmem>>)
    %c4_i32_634 = arith.constant 4 : i32
    %c5_i32_635 = arith.constant 5 : i32
    %c0_i32_636 = arith.constant 0 : i32
    %725 = tpu.memref_slice %arg3[%338, %c0_i32_636] : memref<100x32xf32, #tpu.memory_space<any>> -> memref<1x32xf32, #tpu.memory_space<any>>
    %c37_i32_637 = arith.constant 37 : i32
    %c0_i32_638 = arith.constant 0 : i32
    %726 = tpu.memref_slice %arg10[%c37_i32_637, %c0_i32_638] : memref<64x32xf32, #tpu.memory_space<vmem>> -> memref<1x32xf32, #tpu.memory_space<vmem>>
    %727 = tpu.memref_slice %arg12[%c4_i32_634, %c5_i32_635] : memref<8x8x!tpu.dma_semaphore, #tpu.memory_space<semaphore_mem>> -> memref<1x1x!tpu.dma_semaphore, #tpu.memory_space<semaphore_mem>>
    %728 = tpu.memref_squeeze %727 : memref<1x1x!tpu.dma_semaphore, #tpu.memory_space<semaphore_mem>> -> memref<!tpu.dma_semaphore, #tpu.memory_space<semaphore_mem>>
    tpu.wait_dma2 semaphore(%728 : memref<!tpu.dma_semaphore, #tpu.memory_space<semaphore_mem>>) src(%725 : memref<1x32xf32, #tpu.memory_space<any>>) dst(%726 : memref<1x32xf32, #tpu.memory_space<vmem>>)
    %c4_i32_639 = arith.constant 4 : i32
    %c6_i32_640 = arith.constant 6 : i32
    %c0_i32_641 = arith.constant 0 : i32
    %729 = tpu.memref_slice %arg3[%347, %c0_i32_641] : memref<100x32xf32, #tpu.memory_space<any>> -> memref<1x32xf32, #tpu.memory_space<any>>
    %c38_i32_642 = arith.constant 38 : i32
    %c0_i32_643 = arith.constant 0 : i32
    %730 = tpu.memref_slice %arg10[%c38_i32_642, %c0_i32_643] : memref<64x32xf32, #tpu.memory_space<vmem>> -> memref<1x32xf32, #tpu.memory_space<vmem>>
    %731 = tpu.memref_slice %arg12[%c4_i32_639, %c6_i32_640] : memref<8x8x!tpu.dma_semaphore, #tpu.memory_space<semaphore_mem>> -> memref<1x1x!tpu.dma_semaphore, #tpu.memory_space<semaphore_mem>>
    %732 = tpu.memref_squeeze %731 : memref<1x1x!tpu.dma_semaphore, #tpu.memory_space<semaphore_mem>> -> memref<!tpu.dma_semaphore, #tpu.memory_space<semaphore_mem>>
    tpu.wait_dma2 semaphore(%732 : memref<!tpu.dma_semaphore, #tpu.memory_space<semaphore_mem>>) src(%729 : memref<1x32xf32, #tpu.memory_space<any>>) dst(%730 : memref<1x32xf32, #tpu.memory_space<vmem>>)
    %c4_i32_644 = arith.constant 4 : i32
    %c7_i32_645 = arith.constant 7 : i32
    %c0_i32_646 = arith.constant 0 : i32
    %733 = tpu.memref_slice %arg3[%356, %c0_i32_646] : memref<100x32xf32, #tpu.memory_space<any>> -> memref<1x32xf32, #tpu.memory_space<any>>
    %c39_i32_647 = arith.constant 39 : i32
    %c0_i32_648 = arith.constant 0 : i32
    %734 = tpu.memref_slice %arg10[%c39_i32_647, %c0_i32_648] : memref<64x32xf32, #tpu.memory_space<vmem>> -> memref<1x32xf32, #tpu.memory_space<vmem>>
    %735 = tpu.memref_slice %arg12[%c4_i32_644, %c7_i32_645] : memref<8x8x!tpu.dma_semaphore, #tpu.memory_space<semaphore_mem>> -> memref<1x1x!tpu.dma_semaphore, #tpu.memory_space<semaphore_mem>>
    %736 = tpu.memref_squeeze %735 : memref<1x1x!tpu.dma_semaphore, #tpu.memory_space<semaphore_mem>> -> memref<!tpu.dma_semaphore, #tpu.memory_space<semaphore_mem>>
    tpu.wait_dma2 semaphore(%736 : memref<!tpu.dma_semaphore, #tpu.memory_space<semaphore_mem>>) src(%733 : memref<1x32xf32, #tpu.memory_space<any>>) dst(%734 : memref<1x32xf32, #tpu.memory_space<vmem>>)
    %c5_i32_649 = arith.constant 5 : i32
    %c0_i32_650 = arith.constant 0 : i32
    %c0_i32_651 = arith.constant 0 : i32
    %737 = tpu.memref_slice %arg3[%365, %c0_i32_651] : memref<100x32xf32, #tpu.memory_space<any>> -> memref<1x32xf32, #tpu.memory_space<any>>
    %c40_i32_652 = arith.constant 40 : i32
    %c0_i32_653 = arith.constant 0 : i32
    %738 = tpu.memref_slice %arg10[%c40_i32_652, %c0_i32_653] : memref<64x32xf32, #tpu.memory_space<vmem>> -> memref<1x32xf32, #tpu.memory_space<vmem>>
    %739 = tpu.memref_slice %arg12[%c5_i32_649, %c0_i32_650] : memref<8x8x!tpu.dma_semaphore, #tpu.memory_space<semaphore_mem>> -> memref<1x1x!tpu.dma_semaphore, #tpu.memory_space<semaphore_mem>>
    %740 = tpu.memref_squeeze %739 : memref<1x1x!tpu.dma_semaphore, #tpu.memory_space<semaphore_mem>> -> memref<!tpu.dma_semaphore, #tpu.memory_space<semaphore_mem>>
    tpu.wait_dma2 semaphore(%740 : memref<!tpu.dma_semaphore, #tpu.memory_space<semaphore_mem>>) src(%737 : memref<1x32xf32, #tpu.memory_space<any>>) dst(%738 : memref<1x32xf32, #tpu.memory_space<vmem>>)
    %c5_i32_654 = arith.constant 5 : i32
    %c1_i32_655 = arith.constant 1 : i32
    %c0_i32_656 = arith.constant 0 : i32
    %741 = tpu.memref_slice %arg3[%374, %c0_i32_656] : memref<100x32xf32, #tpu.memory_space<any>> -> memref<1x32xf32, #tpu.memory_space<any>>
    %c41_i32_657 = arith.constant 41 : i32
    %c0_i32_658 = arith.constant 0 : i32
    %742 = tpu.memref_slice %arg10[%c41_i32_657, %c0_i32_658] : memref<64x32xf32, #tpu.memory_space<vmem>> -> memref<1x32xf32, #tpu.memory_space<vmem>>
    %743 = tpu.memref_slice %arg12[%c5_i32_654, %c1_i32_655] : memref<8x8x!tpu.dma_semaphore, #tpu.memory_space<semaphore_mem>> -> memref<1x1x!tpu.dma_semaphore, #tpu.memory_space<semaphore_mem>>
    %744 = tpu.memref_squeeze %743 : memref<1x1x!tpu.dma_semaphore, #tpu.memory_space<semaphore_mem>> -> memref<!tpu.dma_semaphore, #tpu.memory_space<semaphore_mem>>
    tpu.wait_dma2 semaphore(%744 : memref<!tpu.dma_semaphore, #tpu.memory_space<semaphore_mem>>) src(%741 : memref<1x32xf32, #tpu.memory_space<any>>) dst(%742 : memref<1x32xf32, #tpu.memory_space<vmem>>)
    %c5_i32_659 = arith.constant 5 : i32
    %c2_i32_660 = arith.constant 2 : i32
    %c0_i32_661 = arith.constant 0 : i32
    %745 = tpu.memref_slice %arg3[%383, %c0_i32_661] : memref<100x32xf32, #tpu.memory_space<any>> -> memref<1x32xf32, #tpu.memory_space<any>>
    %c42_i32_662 = arith.constant 42 : i32
    %c0_i32_663 = arith.constant 0 : i32
    %746 = tpu.memref_slice %arg10[%c42_i32_662, %c0_i32_663] : memref<64x32xf32, #tpu.memory_space<vmem>> -> memref<1x32xf32, #tpu.memory_space<vmem>>
    %747 = tpu.memref_slice %arg12[%c5_i32_659, %c2_i32_660] : memref<8x8x!tpu.dma_semaphore, #tpu.memory_space<semaphore_mem>> -> memref<1x1x!tpu.dma_semaphore, #tpu.memory_space<semaphore_mem>>
    %748 = tpu.memref_squeeze %747 : memref<1x1x!tpu.dma_semaphore, #tpu.memory_space<semaphore_mem>> -> memref<!tpu.dma_semaphore, #tpu.memory_space<semaphore_mem>>
    tpu.wait_dma2 semaphore(%748 : memref<!tpu.dma_semaphore, #tpu.memory_space<semaphore_mem>>) src(%745 : memref<1x32xf32, #tpu.memory_space<any>>) dst(%746 : memref<1x32xf32, #tpu.memory_space<vmem>>)
    %c5_i32_664 = arith.constant 5 : i32
    %c3_i32_665 = arith.constant 3 : i32
    %c0_i32_666 = arith.constant 0 : i32
    %749 = tpu.memref_slice %arg3[%392, %c0_i32_666] : memref<100x32xf32, #tpu.memory_space<any>> -> memref<1x32xf32, #tpu.memory_space<any>>
    %c43_i32_667 = arith.constant 43 : i32
    %c0_i32_668 = arith.constant 0 : i32
    %750 = tpu.memref_slice %arg10[%c43_i32_667, %c0_i32_668] : memref<64x32xf32, #tpu.memory_space<vmem>> -> memref<1x32xf32, #tpu.memory_space<vmem>>
    %751 = tpu.memref_slice %arg12[%c5_i32_664, %c3_i32_665] : memref<8x8x!tpu.dma_semaphore, #tpu.memory_space<semaphore_mem>> -> memref<1x1x!tpu.dma_semaphore, #tpu.memory_space<semaphore_mem>>
    %752 = tpu.memref_squeeze %751 : memref<1x1x!tpu.dma_semaphore, #tpu.memory_space<semaphore_mem>> -> memref<!tpu.dma_semaphore, #tpu.memory_space<semaphore_mem>>
    tpu.wait_dma2 semaphore(%752 : memref<!tpu.dma_semaphore, #tpu.memory_space<semaphore_mem>>) src(%749 : memref<1x32xf32, #tpu.memory_space<any>>) dst(%750 : memref<1x32xf32, #tpu.memory_space<vmem>>)
    %c5_i32_669 = arith.constant 5 : i32
    %c4_i32_670 = arith.constant 4 : i32
    %c0_i32_671 = arith.constant 0 : i32
    %753 = tpu.memref_slice %arg3[%401, %c0_i32_671] : memref<100x32xf32, #tpu.memory_space<any>> -> memref<1x32xf32, #tpu.memory_space<any>>
    %c44_i32_672 = arith.constant 44 : i32
    %c0_i32_673 = arith.constant 0 : i32
    %754 = tpu.memref_slice %arg10[%c44_i32_672, %c0_i32_673] : memref<64x32xf32, #tpu.memory_space<vmem>> -> memref<1x32xf32, #tpu.memory_space<vmem>>
    %755 = tpu.memref_slice %arg12[%c5_i32_669, %c4_i32_670] : memref<8x8x!tpu.dma_semaphore, #tpu.memory_space<semaphore_mem>> -> memref<1x1x!tpu.dma_semaphore, #tpu.memory_space<semaphore_mem>>
    %756 = tpu.memref_squeeze %755 : memref<1x1x!tpu.dma_semaphore, #tpu.memory_space<semaphore_mem>> -> memref<!tpu.dma_semaphore, #tpu.memory_space<semaphore_mem>>
    tpu.wait_dma2 semaphore(%756 : memref<!tpu.dma_semaphore, #tpu.memory_space<semaphore_mem>>) src(%753 : memref<1x32xf32, #tpu.memory_space<any>>) dst(%754 : memref<1x32xf32, #tpu.memory_space<vmem>>)
    %c5_i32_674 = arith.constant 5 : i32
    %c5_i32_675 = arith.constant 5 : i32
    %c0_i32_676 = arith.constant 0 : i32
    %757 = tpu.memref_slice %arg3[%410, %c0_i32_676] : memref<100x32xf32, #tpu.memory_space<any>> -> memref<1x32xf32, #tpu.memory_space<any>>
    %c45_i32_677 = arith.constant 45 : i32
    %c0_i32_678 = arith.constant 0 : i32
    %758 = tpu.memref_slice %arg10[%c45_i32_677, %c0_i32_678] : memref<64x32xf32, #tpu.memory_space<vmem>> -> memref<1x32xf32, #tpu.memory_space<vmem>>
    %759 = tpu.memref_slice %arg12[%c5_i32_674, %c5_i32_675] : memref<8x8x!tpu.dma_semaphore, #tpu.memory_space<semaphore_mem>> -> memref<1x1x!tpu.dma_semaphore, #tpu.memory_space<semaphore_mem>>
    %760 = tpu.memref_squeeze %759 : memref<1x1x!tpu.dma_semaphore, #tpu.memory_space<semaphore_mem>> -> memref<!tpu.dma_semaphore, #tpu.memory_space<semaphore_mem>>
    tpu.wait_dma2 semaphore(%760 : memref<!tpu.dma_semaphore, #tpu.memory_space<semaphore_mem>>) src(%757 : memref<1x32xf32, #tpu.memory_space<any>>) dst(%758 : memref<1x32xf32, #tpu.memory_space<vmem>>)
    %c5_i32_679 = arith.constant 5 : i32
    %c6_i32_680 = arith.constant 6 : i32
    %c0_i32_681 = arith.constant 0 : i32
    %761 = tpu.memref_slice %arg3[%419, %c0_i32_681] : memref<100x32xf32, #tpu.memory_space<any>> -> memref<1x32xf32, #tpu.memory_space<any>>
    %c46_i32_682 = arith.constant 46 : i32
    %c0_i32_683 = arith.constant 0 : i32
    %762 = tpu.memref_slice %arg10[%c46_i32_682, %c0_i32_683] : memref<64x32xf32, #tpu.memory_space<vmem>> -> memref<1x32xf32, #tpu.memory_space<vmem>>
    %763 = tpu.memref_slice %arg12[%c5_i32_679, %c6_i32_680] : memref<8x8x!tpu.dma_semaphore, #tpu.memory_space<semaphore_mem>> -> memref<1x1x!tpu.dma_semaphore, #tpu.memory_space<semaphore_mem>>
    %764 = tpu.memref_squeeze %763 : memref<1x1x!tpu.dma_semaphore, #tpu.memory_space<semaphore_mem>> -> memref<!tpu.dma_semaphore, #tpu.memory_space<semaphore_mem>>
    tpu.wait_dma2 semaphore(%764 : memref<!tpu.dma_semaphore, #tpu.memory_space<semaphore_mem>>) src(%761 : memref<1x32xf32, #tpu.memory_space<any>>) dst(%762 : memref<1x32xf32, #tpu.memory_space<vmem>>)
    %c5_i32_684 = arith.constant 5 : i32
    %c7_i32_685 = arith.constant 7 : i32
    %c0_i32_686 = arith.constant 0 : i32
    %765 = tpu.memref_slice %arg3[%428, %c0_i32_686] : memref<100x32xf32, #tpu.memory_space<any>> -> memref<1x32xf32, #tpu.memory_space<any>>
    %c47_i32_687 = arith.constant 47 : i32
    %c0_i32_688 = arith.constant 0 : i32
    %766 = tpu.memref_slice %arg10[%c47_i32_687, %c0_i32_688] : memref<64x32xf32, #tpu.memory_space<vmem>> -> memref<1x32xf32, #tpu.memory_space<vmem>>
    %767 = tpu.memref_slice %arg12[%c5_i32_684, %c7_i32_685] : memref<8x8x!tpu.dma_semaphore, #tpu.memory_space<semaphore_mem>> -> memref<1x1x!tpu.dma_semaphore, #tpu.memory_space<semaphore_mem>>
    %768 = tpu.memref_squeeze %767 : memref<1x1x!tpu.dma_semaphore, #tpu.memory_space<semaphore_mem>> -> memref<!tpu.dma_semaphore, #tpu.memory_space<semaphore_mem>>
    tpu.wait_dma2 semaphore(%768 : memref<!tpu.dma_semaphore, #tpu.memory_space<semaphore_mem>>) src(%765 : memref<1x32xf32, #tpu.memory_space<any>>) dst(%766 : memref<1x32xf32, #tpu.memory_space<vmem>>)
    %c6_i32_689 = arith.constant 6 : i32
    %c0_i32_690 = arith.constant 0 : i32
    %c0_i32_691 = arith.constant 0 : i32
    %769 = tpu.memref_slice %arg3[%437, %c0_i32_691] : memref<100x32xf32, #tpu.memory_space<any>> -> memref<1x32xf32, #tpu.memory_space<any>>
    %c48_i32_692 = arith.constant 48 : i32
    %c0_i32_693 = arith.constant 0 : i32
    %770 = tpu.memref_slice %arg10[%c48_i32_692, %c0_i32_693] : memref<64x32xf32, #tpu.memory_space<vmem>> -> memref<1x32xf32, #tpu.memory_space<vmem>>
    %771 = tpu.memref_slice %arg12[%c6_i32_689, %c0_i32_690] : memref<8x8x!tpu.dma_semaphore, #tpu.memory_space<semaphore_mem>> -> memref<1x1x!tpu.dma_semaphore, #tpu.memory_space<semaphore_mem>>
    %772 = tpu.memref_squeeze %771 : memref<1x1x!tpu.dma_semaphore, #tpu.memory_space<semaphore_mem>> -> memref<!tpu.dma_semaphore, #tpu.memory_space<semaphore_mem>>
    tpu.wait_dma2 semaphore(%772 : memref<!tpu.dma_semaphore, #tpu.memory_space<semaphore_mem>>) src(%769 : memref<1x32xf32, #tpu.memory_space<any>>) dst(%770 : memref<1x32xf32, #tpu.memory_space<vmem>>)
    %c6_i32_694 = arith.constant 6 : i32
    %c1_i32_695 = arith.constant 1 : i32
    %c0_i32_696 = arith.constant 0 : i32
    %773 = tpu.memref_slice %arg3[%446, %c0_i32_696] : memref<100x32xf32, #tpu.memory_space<any>> -> memref<1x32xf32, #tpu.memory_space<any>>
    %c49_i32_697 = arith.constant 49 : i32
    %c0_i32_698 = arith.constant 0 : i32
    %774 = tpu.memref_slice %arg10[%c49_i32_697, %c0_i32_698] : memref<64x32xf32, #tpu.memory_space<vmem>> -> memref<1x32xf32, #tpu.memory_space<vmem>>
    %775 = tpu.memref_slice %arg12[%c6_i32_694, %c1_i32_695] : memref<8x8x!tpu.dma_semaphore, #tpu.memory_space<semaphore_mem>> -> memref<1x1x!tpu.dma_semaphore, #tpu.memory_space<semaphore_mem>>
    %776 = tpu.memref_squeeze %775 : memref<1x1x!tpu.dma_semaphore, #tpu.memory_space<semaphore_mem>> -> memref<!tpu.dma_semaphore, #tpu.memory_space<semaphore_mem>>
    tpu.wait_dma2 semaphore(%776 : memref<!tpu.dma_semaphore, #tpu.memory_space<semaphore_mem>>) src(%773 : memref<1x32xf32, #tpu.memory_space<any>>) dst(%774 : memref<1x32xf32, #tpu.memory_space<vmem>>)
    %c6_i32_699 = arith.constant 6 : i32
    %c2_i32_700 = arith.constant 2 : i32
    %c0_i32_701 = arith.constant 0 : i32
    %777 = tpu.memref_slice %arg3[%455, %c0_i32_701] : memref<100x32xf32, #tpu.memory_space<any>> -> memref<1x32xf32, #tpu.memory_space<any>>
    %c50_i32_702 = arith.constant 50 : i32
    %c0_i32_703 = arith.constant 0 : i32
    %778 = tpu.memref_slice %arg10[%c50_i32_702, %c0_i32_703] : memref<64x32xf32, #tpu.memory_space<vmem>> -> memref<1x32xf32, #tpu.memory_space<vmem>>
    %779 = tpu.memref_slice %arg12[%c6_i32_699, %c2_i32_700] : memref<8x8x!tpu.dma_semaphore, #tpu.memory_space<semaphore_mem>> -> memref<1x1x!tpu.dma_semaphore, #tpu.memory_space<semaphore_mem>>
    %780 = tpu.memref_squeeze %779 : memref<1x1x!tpu.dma_semaphore, #tpu.memory_space<semaphore_mem>> -> memref<!tpu.dma_semaphore, #tpu.memory_space<semaphore_mem>>
    tpu.wait_dma2 semaphore(%780 : memref<!tpu.dma_semaphore, #tpu.memory_space<semaphore_mem>>) src(%777 : memref<1x32xf32, #tpu.memory_space<any>>) dst(%778 : memref<1x32xf32, #tpu.memory_space<vmem>>)
    %c6_i32_704 = arith.constant 6 : i32
    %c3_i32_705 = arith.constant 3 : i32
    %c0_i32_706 = arith.constant 0 : i32
    %781 = tpu.memref_slice %arg3[%464, %c0_i32_706] : memref<100x32xf32, #tpu.memory_space<any>> -> memref<1x32xf32, #tpu.memory_space<any>>
    %c51_i32_707 = arith.constant 51 : i32
    %c0_i32_708 = arith.constant 0 : i32
    %782 = tpu.memref_slice %arg10[%c51_i32_707, %c0_i32_708] : memref<64x32xf32, #tpu.memory_space<vmem>> -> memref<1x32xf32, #tpu.memory_space<vmem>>
    %783 = tpu.memref_slice %arg12[%c6_i32_704, %c3_i32_705] : memref<8x8x!tpu.dma_semaphore, #tpu.memory_space<semaphore_mem>> -> memref<1x1x!tpu.dma_semaphore, #tpu.memory_space<semaphore_mem>>
    %784 = tpu.memref_squeeze %783 : memref<1x1x!tpu.dma_semaphore, #tpu.memory_space<semaphore_mem>> -> memref<!tpu.dma_semaphore, #tpu.memory_space<semaphore_mem>>
    tpu.wait_dma2 semaphore(%784 : memref<!tpu.dma_semaphore, #tpu.memory_space<semaphore_mem>>) src(%781 : memref<1x32xf32, #tpu.memory_space<any>>) dst(%782 : memref<1x32xf32, #tpu.memory_space<vmem>>)
    %c6_i32_709 = arith.constant 6 : i32
    %c4_i32_710 = arith.constant 4 : i32
    %c0_i32_711 = arith.constant 0 : i32
    %785 = tpu.memref_slice %arg3[%473, %c0_i32_711] : memref<100x32xf32, #tpu.memory_space<any>> -> memref<1x32xf32, #tpu.memory_space<any>>
    %c52_i32_712 = arith.constant 52 : i32
    %c0_i32_713 = arith.constant 0 : i32
    %786 = tpu.memref_slice %arg10[%c52_i32_712, %c0_i32_713] : memref<64x32xf32, #tpu.memory_space<vmem>> -> memref<1x32xf32, #tpu.memory_space<vmem>>
    %787 = tpu.memref_slice %arg12[%c6_i32_709, %c4_i32_710] : memref<8x8x!tpu.dma_semaphore, #tpu.memory_space<semaphore_mem>> -> memref<1x1x!tpu.dma_semaphore, #tpu.memory_space<semaphore_mem>>
    %788 = tpu.memref_squeeze %787 : memref<1x1x!tpu.dma_semaphore, #tpu.memory_space<semaphore_mem>> -> memref<!tpu.dma_semaphore, #tpu.memory_space<semaphore_mem>>
    tpu.wait_dma2 semaphore(%788 : memref<!tpu.dma_semaphore, #tpu.memory_space<semaphore_mem>>) src(%785 : memref<1x32xf32, #tpu.memory_space<any>>) dst(%786 : memref<1x32xf32, #tpu.memory_space<vmem>>)
    %c6_i32_714 = arith.constant 6 : i32
    %c5_i32_715 = arith.constant 5 : i32
    %c0_i32_716 = arith.constant 0 : i32
    %789 = tpu.memref_slice %arg3[%482, %c0_i32_716] : memref<100x32xf32, #tpu.memory_space<any>> -> memref<1x32xf32, #tpu.memory_space<any>>
    %c53_i32_717 = arith.constant 53 : i32
    %c0_i32_718 = arith.constant 0 : i32
    %790 = tpu.memref_slice %arg10[%c53_i32_717, %c0_i32_718] : memref<64x32xf32, #tpu.memory_space<vmem>> -> memref<1x32xf32, #tpu.memory_space<vmem>>
    %791 = tpu.memref_slice %arg12[%c6_i32_714, %c5_i32_715] : memref<8x8x!tpu.dma_semaphore, #tpu.memory_space<semaphore_mem>> -> memref<1x1x!tpu.dma_semaphore, #tpu.memory_space<semaphore_mem>>
    %792 = tpu.memref_squeeze %791 : memref<1x1x!tpu.dma_semaphore, #tpu.memory_space<semaphore_mem>> -> memref<!tpu.dma_semaphore, #tpu.memory_space<semaphore_mem>>
    tpu.wait_dma2 semaphore(%792 : memref<!tpu.dma_semaphore, #tpu.memory_space<semaphore_mem>>) src(%789 : memref<1x32xf32, #tpu.memory_space<any>>) dst(%790 : memref<1x32xf32, #tpu.memory_space<vmem>>)
    %c6_i32_719 = arith.constant 6 : i32
    %c6_i32_720 = arith.constant 6 : i32
    %c0_i32_721 = arith.constant 0 : i32
    %793 = tpu.memref_slice %arg3[%491, %c0_i32_721] : memref<100x32xf32, #tpu.memory_space<any>> -> memref<1x32xf32, #tpu.memory_space<any>>
    %c54_i32_722 = arith.constant 54 : i32
    %c0_i32_723 = arith.constant 0 : i32
    %794 = tpu.memref_slice %arg10[%c54_i32_722, %c0_i32_723] : memref<64x32xf32, #tpu.memory_space<vmem>> -> memref<1x32xf32, #tpu.memory_space<vmem>>
    %795 = tpu.memref_slice %arg12[%c6_i32_719, %c6_i32_720] : memref<8x8x!tpu.dma_semaphore, #tpu.memory_space<semaphore_mem>> -> memref<1x1x!tpu.dma_semaphore, #tpu.memory_space<semaphore_mem>>
    %796 = tpu.memref_squeeze %795 : memref<1x1x!tpu.dma_semaphore, #tpu.memory_space<semaphore_mem>> -> memref<!tpu.dma_semaphore, #tpu.memory_space<semaphore_mem>>
    tpu.wait_dma2 semaphore(%796 : memref<!tpu.dma_semaphore, #tpu.memory_space<semaphore_mem>>) src(%793 : memref<1x32xf32, #tpu.memory_space<any>>) dst(%794 : memref<1x32xf32, #tpu.memory_space<vmem>>)
    %c6_i32_724 = arith.constant 6 : i32
    %c7_i32_725 = arith.constant 7 : i32
    %c0_i32_726 = arith.constant 0 : i32
    %797 = tpu.memref_slice %arg3[%500, %c0_i32_726] : memref<100x32xf32, #tpu.memory_space<any>> -> memref<1x32xf32, #tpu.memory_space<any>>
    %c55_i32_727 = arith.constant 55 : i32
    %c0_i32_728 = arith.constant 0 : i32
    %798 = tpu.memref_slice %arg10[%c55_i32_727, %c0_i32_728] : memref<64x32xf32, #tpu.memory_space<vmem>> -> memref<1x32xf32, #tpu.memory_space<vmem>>
    %799 = tpu.memref_slice %arg12[%c6_i32_724, %c7_i32_725] : memref<8x8x!tpu.dma_semaphore, #tpu.memory_space<semaphore_mem>> -> memref<1x1x!tpu.dma_semaphore, #tpu.memory_space<semaphore_mem>>
    %800 = tpu.memref_squeeze %799 : memref<1x1x!tpu.dma_semaphore, #tpu.memory_space<semaphore_mem>> -> memref<!tpu.dma_semaphore, #tpu.memory_space<semaphore_mem>>
    tpu.wait_dma2 semaphore(%800 : memref<!tpu.dma_semaphore, #tpu.memory_space<semaphore_mem>>) src(%797 : memref<1x32xf32, #tpu.memory_space<any>>) dst(%798 : memref<1x32xf32, #tpu.memory_space<vmem>>)
    %c7_i32_729 = arith.constant 7 : i32
    %c0_i32_730 = arith.constant 0 : i32
    %c0_i32_731 = arith.constant 0 : i32
    %801 = tpu.memref_slice %arg3[%509, %c0_i32_731] : memref<100x32xf32, #tpu.memory_space<any>> -> memref<1x32xf32, #tpu.memory_space<any>>
    %c56_i32_732 = arith.constant 56 : i32
    %c0_i32_733 = arith.constant 0 : i32
    %802 = tpu.memref_slice %arg10[%c56_i32_732, %c0_i32_733] : memref<64x32xf32, #tpu.memory_space<vmem>> -> memref<1x32xf32, #tpu.memory_space<vmem>>
    %803 = tpu.memref_slice %arg12[%c7_i32_729, %c0_i32_730] : memref<8x8x!tpu.dma_semaphore, #tpu.memory_space<semaphore_mem>> -> memref<1x1x!tpu.dma_semaphore, #tpu.memory_space<semaphore_mem>>
    %804 = tpu.memref_squeeze %803 : memref<1x1x!tpu.dma_semaphore, #tpu.memory_space<semaphore_mem>> -> memref<!tpu.dma_semaphore, #tpu.memory_space<semaphore_mem>>
    tpu.wait_dma2 semaphore(%804 : memref<!tpu.dma_semaphore, #tpu.memory_space<semaphore_mem>>) src(%801 : memref<1x32xf32, #tpu.memory_space<any>>) dst(%802 : memref<1x32xf32, #tpu.memory_space<vmem>>)
    %c7_i32_734 = arith.constant 7 : i32
    %c1_i32_735 = arith.constant 1 : i32
    %c0_i32_736 = arith.constant 0 : i32
    %805 = tpu.memref_slice %arg3[%518, %c0_i32_736] : memref<100x32xf32, #tpu.memory_space<any>> -> memref<1x32xf32, #tpu.memory_space<any>>
    %c57_i32_737 = arith.constant 57 : i32
    %c0_i32_738 = arith.constant 0 : i32
    %806 = tpu.memref_slice %arg10[%c57_i32_737, %c0_i32_738] : memref<64x32xf32, #tpu.memory_space<vmem>> -> memref<1x32xf32, #tpu.memory_space<vmem>>
    %807 = tpu.memref_slice %arg12[%c7_i32_734, %c1_i32_735] : memref<8x8x!tpu.dma_semaphore, #tpu.memory_space<semaphore_mem>> -> memref<1x1x!tpu.dma_semaphore, #tpu.memory_space<semaphore_mem>>
    %808 = tpu.memref_squeeze %807 : memref<1x1x!tpu.dma_semaphore, #tpu.memory_space<semaphore_mem>> -> memref<!tpu.dma_semaphore, #tpu.memory_space<semaphore_mem>>
    tpu.wait_dma2 semaphore(%808 : memref<!tpu.dma_semaphore, #tpu.memory_space<semaphore_mem>>) src(%805 : memref<1x32xf32, #tpu.memory_space<any>>) dst(%806 : memref<1x32xf32, #tpu.memory_space<vmem>>)
    %c7_i32_739 = arith.constant 7 : i32
    %c2_i32_740 = arith.constant 2 : i32
    %c0_i32_741 = arith.constant 0 : i32
    %809 = tpu.memref_slice %arg3[%527, %c0_i32_741] : memref<100x32xf32, #tpu.memory_space<any>> -> memref<1x32xf32, #tpu.memory_space<any>>
    %c58_i32_742 = arith.constant 58 : i32
    %c0_i32_743 = arith.constant 0 : i32
    %810 = tpu.memref_slice %arg10[%c58_i32_742, %c0_i32_743] : memref<64x32xf32, #tpu.memory_space<vmem>> -> memref<1x32xf32, #tpu.memory_space<vmem>>
    %811 = tpu.memref_slice %arg12[%c7_i32_739, %c2_i32_740] : memref<8x8x!tpu.dma_semaphore, #tpu.memory_space<semaphore_mem>> -> memref<1x1x!tpu.dma_semaphore, #tpu.memory_space<semaphore_mem>>
    %812 = tpu.memref_squeeze %811 : memref<1x1x!tpu.dma_semaphore, #tpu.memory_space<semaphore_mem>> -> memref<!tpu.dma_semaphore, #tpu.memory_space<semaphore_mem>>
    tpu.wait_dma2 semaphore(%812 : memref<!tpu.dma_semaphore, #tpu.memory_space<semaphore_mem>>) src(%809 : memref<1x32xf32, #tpu.memory_space<any>>) dst(%810 : memref<1x32xf32, #tpu.memory_space<vmem>>)
    %c7_i32_744 = arith.constant 7 : i32
    %c3_i32_745 = arith.constant 3 : i32
    %c0_i32_746 = arith.constant 0 : i32
    %813 = tpu.memref_slice %arg3[%536, %c0_i32_746] : memref<100x32xf32, #tpu.memory_space<any>> -> memref<1x32xf32, #tpu.memory_space<any>>
    %c59_i32_747 = arith.constant 59 : i32
    %c0_i32_748 = arith.constant 0 : i32
    %814 = tpu.memref_slice %arg10[%c59_i32_747, %c0_i32_748] : memref<64x32xf32, #tpu.memory_space<vmem>> -> memref<1x32xf32, #tpu.memory_space<vmem>>
    %815 = tpu.memref_slice %arg12[%c7_i32_744, %c3_i32_745] : memref<8x8x!tpu.dma_semaphore, #tpu.memory_space<semaphore_mem>> -> memref<1x1x!tpu.dma_semaphore, #tpu.memory_space<semaphore_mem>>
    %816 = tpu.memref_squeeze %815 : memref<1x1x!tpu.dma_semaphore, #tpu.memory_space<semaphore_mem>> -> memref<!tpu.dma_semaphore, #tpu.memory_space<semaphore_mem>>
    tpu.wait_dma2 semaphore(%816 : memref<!tpu.dma_semaphore, #tpu.memory_space<semaphore_mem>>) src(%813 : memref<1x32xf32, #tpu.memory_space<any>>) dst(%814 : memref<1x32xf32, #tpu.memory_space<vmem>>)
    %c7_i32_749 = arith.constant 7 : i32
    %c4_i32_750 = arith.constant 4 : i32
    %c0_i32_751 = arith.constant 0 : i32
    %817 = tpu.memref_slice %arg3[%545, %c0_i32_751] : memref<100x32xf32, #tpu.memory_space<any>> -> memref<1x32xf32, #tpu.memory_space<any>>
    %c60_i32_752 = arith.constant 60 : i32
    %c0_i32_753 = arith.constant 0 : i32
    %818 = tpu.memref_slice %arg10[%c60_i32_752, %c0_i32_753] : memref<64x32xf32, #tpu.memory_space<vmem>> -> memref<1x32xf32, #tpu.memory_space<vmem>>
    %819 = tpu.memref_slice %arg12[%c7_i32_749, %c4_i32_750] : memref<8x8x!tpu.dma_semaphore, #tpu.memory_space<semaphore_mem>> -> memref<1x1x!tpu.dma_semaphore, #tpu.memory_space<semaphore_mem>>
    %820 = tpu.memref_squeeze %819 : memref<1x1x!tpu.dma_semaphore, #tpu.memory_space<semaphore_mem>> -> memref<!tpu.dma_semaphore, #tpu.memory_space<semaphore_mem>>
    tpu.wait_dma2 semaphore(%820 : memref<!tpu.dma_semaphore, #tpu.memory_space<semaphore_mem>>) src(%817 : memref<1x32xf32, #tpu.memory_space<any>>) dst(%818 : memref<1x32xf32, #tpu.memory_space<vmem>>)
    %c7_i32_754 = arith.constant 7 : i32
    %c5_i32_755 = arith.constant 5 : i32
    %c0_i32_756 = arith.constant 0 : i32
    %821 = tpu.memref_slice %arg3[%554, %c0_i32_756] : memref<100x32xf32, #tpu.memory_space<any>> -> memref<1x32xf32, #tpu.memory_space<any>>
    %c61_i32_757 = arith.constant 61 : i32
    %c0_i32_758 = arith.constant 0 : i32
    %822 = tpu.memref_slice %arg10[%c61_i32_757, %c0_i32_758] : memref<64x32xf32, #tpu.memory_space<vmem>> -> memref<1x32xf32, #tpu.memory_space<vmem>>
    %823 = tpu.memref_slice %arg12[%c7_i32_754, %c5_i32_755] : memref<8x8x!tpu.dma_semaphore, #tpu.memory_space<semaphore_mem>> -> memref<1x1x!tpu.dma_semaphore, #tpu.memory_space<semaphore_mem>>
    %824 = tpu.memref_squeeze %823 : memref<1x1x!tpu.dma_semaphore, #tpu.memory_space<semaphore_mem>> -> memref<!tpu.dma_semaphore, #tpu.memory_space<semaphore_mem>>
    tpu.wait_dma2 semaphore(%824 : memref<!tpu.dma_semaphore, #tpu.memory_space<semaphore_mem>>) src(%821 : memref<1x32xf32, #tpu.memory_space<any>>) dst(%822 : memref<1x32xf32, #tpu.memory_space<vmem>>)
    %c7_i32_759 = arith.constant 7 : i32
    %c6_i32_760 = arith.constant 6 : i32
    %c0_i32_761 = arith.constant 0 : i32
    %825 = tpu.memref_slice %arg3[%563, %c0_i32_761] : memref<100x32xf32, #tpu.memory_space<any>> -> memref<1x32xf32, #tpu.memory_space<any>>
    %c62_i32_762 = arith.constant 62 : i32
    %c0_i32_763 = arith.constant 0 : i32
    %826 = tpu.memref_slice %arg10[%c62_i32_762, %c0_i32_763] : memref<64x32xf32, #tpu.memory_space<vmem>> -> memref<1x32xf32, #tpu.memory_space<vmem>>
    %827 = tpu.memref_slice %arg12[%c7_i32_759, %c6_i32_760] : memref<8x8x!tpu.dma_semaphore, #tpu.memory_space<semaphore_mem>> -> memref<1x1x!tpu.dma_semaphore, #tpu.memory_space<semaphore_mem>>
    %828 = tpu.memref_squeeze %827 : memref<1x1x!tpu.dma_semaphore, #tpu.memory_space<semaphore_mem>> -> memref<!tpu.dma_semaphore, #tpu.memory_space<semaphore_mem>>
    tpu.wait_dma2 semaphore(%828 : memref<!tpu.dma_semaphore, #tpu.memory_space<semaphore_mem>>) src(%825 : memref<1x32xf32, #tpu.memory_space<any>>) dst(%826 : memref<1x32xf32, #tpu.memory_space<vmem>>)
    %c7_i32_764 = arith.constant 7 : i32
    %c7_i32_765 = arith.constant 7 : i32
    %c0_i32_766 = arith.constant 0 : i32
    %829 = tpu.memref_slice %arg3[%572, %c0_i32_766] : memref<100x32xf32, #tpu.memory_space<any>> -> memref<1x32xf32, #tpu.memory_space<any>>
    %c63_i32_767 = arith.constant 63 : i32
    %c0_i32_768 = arith.constant 0 : i32
    %830 = tpu.memref_slice %arg10[%c63_i32_767, %c0_i32_768] : memref<64x32xf32, #tpu.memory_space<vmem>> -> memref<1x32xf32, #tpu.memory_space<vmem>>
    %831 = tpu.memref_slice %arg12[%c7_i32_764, %c7_i32_765] : memref<8x8x!tpu.dma_semaphore, #tpu.memory_space<semaphore_mem>> -> memref<1x1x!tpu.dma_semaphore, #tpu.memory_space<semaphore_mem>>
    %832 = tpu.memref_squeeze %831 : memref<1x1x!tpu.dma_semaphore, #tpu.memory_space<semaphore_mem>> -> memref<!tpu.dma_semaphore, #tpu.memory_space<semaphore_mem>>
    tpu.wait_dma2 semaphore(%832 : memref<!tpu.dma_semaphore, #tpu.memory_space<semaphore_mem>>) src(%829 : memref<1x32xf32, #tpu.memory_space<any>>) dst(%830 : memref<1x32xf32, #tpu.memory_space<vmem>>)
    %c0 = arith.constant 0 : index
    %c0_769 = arith.constant 0 : index
    %833 = vector.load %arg10[%c0, %c0_769] : memref<64x32xf32, #tpu.memory_space<vmem>>, vector<64x32xf32>
    %c0_770 = arith.constant 0 : index
    %c0_771 = arith.constant 0 : index
    %834 = vector.load %arg4[%c0_770, %c0_771] : memref<32x128xf32, #tpu.memory_space<vmem>>, vector<32x128xf32>
    %cst = arith.constant dense<0.000000e+00> : vector<64x128xf32>
    %835 = tpu.matmul %833, %834, %cst {dimension_numbers = #tpu.dot_dimension_numbers<[1], [0], [0], [1], [0, 0, 1, 1], [], []>} : vector<64x32xf32>, vector<32x128xf32>, vector<64x128xf32> -> vector<64x128xf32>
    %c0_772 = arith.constant 0 : index
    %c0_773 = arith.constant 0 : index
    %836 = vector.load %arg6[%c0_772, %c0_773] : memref<1x128xf32, #tpu.memory_space<vmem>>, vector<1x128xf32>
    %837 = vector.broadcast %836 : vector<1x128xf32> to vector<64x128xf32>
    %838 = arith.addf %835, %837 : vector<64x128xf32>
    %c0_774 = arith.constant 0 : index
    %c0_775 = arith.constant 0 : index
    %839 = vector.load %arg11[%c0_774, %c0_775] : memref<64x128xf32, #tpu.memory_space<vmem>>, vector<64x128xf32>
    tpu.vector_store %arg11[%c0_774, %c0_775], %838 {strides = array<i32>} : memref<64x128xf32, #tpu.memory_space<vmem>>, vector<64x128xf32>,
    %c0_776 = arith.constant 0 : index
    %c0_777 = arith.constant 0 : index
    %840 = vector.load %arg5[%c0_776, %c0_777] : memref<32x128xf32, #tpu.memory_space<vmem>>, vector<32x128xf32>
    %c0_778 = arith.constant 0 : index
    %c0_779 = arith.constant 0 : index
    %841 = vector.load %arg2[%c0_778, %c0_779] : memref<8x1xi32, #tpu.memory_space<vmem>>, vector<8x1xi32>
    %cst_780 = arith.constant 0.000000e+00 : f32
    %842 = vector.broadcast %cst_780 : f32 to vector<8x32xf32>
    %cst_781 = arith.constant 0.000000e+00 : f32
    %843 = vector.broadcast %cst_781 : f32 to vector<8x32xf32>
    %cst_782 = arith.constant 0.000000e+00 : f32
    %844 = vector.broadcast %cst_782 : f32 to vector<8x32xf32>
    %c0_783 = arith.constant 0 : index
    %c0_784 = arith.constant 0 : index
    %845 = vector.load %arg11[%c0_783, %c0_784] : memref<64x128xf32, #tpu.memory_space<vmem>>, vector<8x128xf32>
    %cst_785 = arith.constant dense<0.000000e+00> : vector<8x128xf32>
    %846 = tpu.matmul %842, %840, %cst_785 {dimension_numbers = #tpu.dot_dimension_numbers<[1], [0], [0], [1], [0, 0, 1, 1], [], []>} : vector<8x32xf32>, vector<32x128xf32>, vector<8x128xf32> -> vector<8x128xf32>
    %847 = arith.addf %845, %846 : vector<8x128xf32>
    %848 = arith.negf %847 : vector<8x128xf32>
    %849 = math.exp %848 : vector<8x128xf32>
    %cst_786 = arith.constant 1.000000e+00 : f32
    %850 = vector.broadcast %cst_786 : f32 to vector<8x128xf32>
    %851 = arith.addf %850, %849 : vector<8x128xf32>
    %852 = arith.divf %850, %851 : vector<8x128xf32>
    %853 = vector.extract_strided_slice %852 {offsets = [0, 0], sizes = [8, 32], strides = [1, 1]} : vector<8x128xf32> to vector<8x32xf32>
    %854 = vector.extract_strided_slice %852 {offsets = [0, 32], sizes = [8, 32], strides = [1, 1]} : vector<8x128xf32> to vector<8x32xf32>
    %855 = vector.extract_strided_slice %852 {offsets = [0, 96], sizes = [8, 32], strides = [1, 1]} : vector<8x128xf32> to vector<8x32xf32>
    %856 = vector.extract_strided_slice %847 {offsets = [0, 64], sizes = [8, 32], strides = [1, 1]} : vector<8x128xf32> to vector<8x32xf32>
    %857 = math.tanh %856 : vector<8x32xf32>
    %858 = arith.mulf %854, %843 : vector<8x32xf32>
    %859 = arith.mulf %853, %857 : vector<8x32xf32>
    %860 = arith.addf %858, %859 : vector<8x32xf32>
    %861 = math.tanh %860 : vector<8x32xf32>
    %862 = arith.mulf %855, %861 : vector<8x32xf32>
    %c1_i32_787 = arith.constant 1 : i32
    %863 = vector.broadcast %c1_i32_787 : i32 to vector<8x1xi32>
    %864 = arith.cmpi eq, %841, %863 : vector<8x1xi32>
    %865 = vector.shape_cast %864 : vector<8x1xi1> to vector<8x1xi1>
    %866 = vector.broadcast %865 : vector<8x1xi1> to vector<8x32xi1>
    %867 = arith.select %866, %862, %844 : vector<8x32xi1>, vector<8x32xf32>
    %c8 = arith.constant 8 : index
    %c0_788 = arith.constant 0 : index
    %868 = vector.load %arg11[%c8, %c0_788] : memref<64x128xf32, #tpu.memory_space<vmem>>, vector<8x128xf32>
    %cst_789 = arith.constant dense<0.000000e+00> : vector<8x128xf32>
    %869 = tpu.matmul %862, %840, %cst_789 {dimension_numbers = #tpu.dot_dimension_numbers<[1], [0], [0], [1], [0, 0, 1, 1], [], []>} : vector<8x32xf32>, vector<32x128xf32>, vector<8x128xf32> -> vector<8x128xf32>
    %870 = arith.addf %868, %869 : vector<8x128xf32>
    %871 = arith.negf %870 : vector<8x128xf32>
    %872 = math.exp %871 : vector<8x128xf32>
    %cst_790 = arith.constant 1.000000e+00 : f32
    %873 = vector.broadcast %cst_790 : f32 to vector<8x128xf32>
    %874 = arith.addf %873, %872 : vector<8x128xf32>
    %875 = arith.divf %873, %874 : vector<8x128xf32>
    %876 = vector.extract_strided_slice %875 {offsets = [0, 0], sizes = [8, 32], strides = [1, 1]} : vector<8x128xf32> to vector<8x32xf32>
    %877 = vector.extract_strided_slice %875 {offsets = [0, 32], sizes = [8, 32], strides = [1, 1]} : vector<8x128xf32> to vector<8x32xf32>
    %878 = vector.extract_strided_slice %875 {offsets = [0, 96], sizes = [8, 32], strides = [1, 1]} : vector<8x128xf32> to vector<8x32xf32>
    %879 = vector.extract_strided_slice %870 {offsets = [0, 64], sizes = [8, 32], strides = [1, 1]} : vector<8x128xf32> to vector<8x32xf32>
    %880 = math.tanh %879 : vector<8x32xf32>
    %881 = arith.mulf %877, %860 : vector<8x32xf32>
    %882 = arith.mulf %876, %880 : vector<8x32xf32>
    %883 = arith.addf %881, %882 : vector<8x32xf32>
    %884 = math.tanh %883 : vector<8x32xf32>
    %885 = arith.mulf %878, %884 : vector<8x32xf32>
    %c2_i32_791 = arith.constant 2 : i32
    %886 = vector.broadcast %c2_i32_791 : i32 to vector<8x1xi32>
    %887 = arith.cmpi eq, %841, %886 : vector<8x1xi32>
    %888 = vector.shape_cast %887 : vector<8x1xi1> to vector<8x1xi1>
    %889 = vector.broadcast %888 : vector<8x1xi1> to vector<8x32xi1>
    %890 = arith.select %889, %885, %867 : vector<8x32xi1>, vector<8x32xf32>
    %c16 = arith.constant 16 : index
    %c0_792 = arith.constant 0 : index
    %891 = vector.load %arg11[%c16, %c0_792] : memref<64x128xf32, #tpu.memory_space<vmem>>, vector<8x128xf32>
    %cst_793 = arith.constant dense<0.000000e+00> : vector<8x128xf32>
    %892 = tpu.matmul %885, %840, %cst_793 {dimension_numbers = #tpu.dot_dimension_numbers<[1], [0], [0], [1], [0, 0, 1, 1], [], []>} : vector<8x32xf32>, vector<32x128xf32>, vector<8x128xf32> -> vector<8x128xf32>
    %893 = arith.addf %891, %892 : vector<8x128xf32>
    %894 = arith.negf %893 : vector<8x128xf32>
    %895 = math.exp %894 : vector<8x128xf32>
    %cst_794 = arith.constant 1.000000e+00 : f32
    %896 = vector.broadcast %cst_794 : f32 to vector<8x128xf32>
    %897 = arith.addf %896, %895 : vector<8x128xf32>
    %898 = arith.divf %896, %897 : vector<8x128xf32>
    %899 = vector.extract_strided_slice %898 {offsets = [0, 0], sizes = [8, 32], strides = [1, 1]} : vector<8x128xf32> to vector<8x32xf32>
    %900 = vector.extract_strided_slice %898 {offsets = [0, 32], sizes = [8, 32], strides = [1, 1]} : vector<8x128xf32> to vector<8x32xf32>
    %901 = vector.extract_strided_slice %898 {offsets = [0, 96], sizes = [8, 32], strides = [1, 1]} : vector<8x128xf32> to vector<8x32xf32>
    %902 = vector.extract_strided_slice %893 {offsets = [0, 64], sizes = [8, 32], strides = [1, 1]} : vector<8x128xf32> to vector<8x32xf32>
    %903 = math.tanh %902 : vector<8x32xf32>
    %904 = arith.mulf %900, %883 : vector<8x32xf32>
    %905 = arith.mulf %899, %903 : vector<8x32xf32>
    %906 = arith.addf %904, %905 : vector<8x32xf32>
    %907 = math.tanh %906 : vector<8x32xf32>
    %908 = arith.mulf %901, %907 : vector<8x32xf32>
    %c3_i32_795 = arith.constant 3 : i32
    %909 = vector.broadcast %c3_i32_795 : i32 to vector<8x1xi32>
    %910 = arith.cmpi eq, %841, %909 : vector<8x1xi32>
    %911 = vector.shape_cast %910 : vector<8x1xi1> to vector<8x1xi1>
    %912 = vector.broadcast %911 : vector<8x1xi1> to vector<8x32xi1>
    %913 = arith.select %912, %908, %890 : vector<8x32xi1>, vector<8x32xf32>
    %c24 = arith.constant 24 : index
    %c0_796 = arith.constant 0 : index
    %914 = vector.load %arg11[%c24, %c0_796] : memref<64x128xf32, #tpu.memory_space<vmem>>, vector<8x128xf32>
    %cst_797 = arith.constant dense<0.000000e+00> : vector<8x128xf32>
    %915 = tpu.matmul %908, %840, %cst_797 {dimension_numbers = #tpu.dot_dimension_numbers<[1], [0], [0], [1], [0, 0, 1, 1], [], []>} : vector<8x32xf32>, vector<32x128xf32>, vector<8x128xf32> -> vector<8x128xf32>
    %916 = arith.addf %914, %915 : vector<8x128xf32>
    %917 = arith.negf %916 : vector<8x128xf32>
    %918 = math.exp %917 : vector<8x128xf32>
    %cst_798 = arith.constant 1.000000e+00 : f32
    %919 = vector.broadcast %cst_798 : f32 to vector<8x128xf32>
    %920 = arith.addf %919, %918 : vector<8x128xf32>
    %921 = arith.divf %919, %920 : vector<8x128xf32>
    %922 = vector.extract_strided_slice %921 {offsets = [0, 0], sizes = [8, 32], strides = [1, 1]} : vector<8x128xf32> to vector<8x32xf32>
    %923 = vector.extract_strided_slice %921 {offsets = [0, 32], sizes = [8, 32], strides = [1, 1]} : vector<8x128xf32> to vector<8x32xf32>
    %924 = vector.extract_strided_slice %921 {offsets = [0, 96], sizes = [8, 32], strides = [1, 1]} : vector<8x128xf32> to vector<8x32xf32>
    %925 = vector.extract_strided_slice %916 {offsets = [0, 64], sizes = [8, 32], strides = [1, 1]} : vector<8x128xf32> to vector<8x32xf32>
    %926 = math.tanh %925 : vector<8x32xf32>
    %927 = arith.mulf %923, %906 : vector<8x32xf32>
    %928 = arith.mulf %922, %926 : vector<8x32xf32>
    %929 = arith.addf %927, %928 : vector<8x32xf32>
    %930 = math.tanh %929 : vector<8x32xf32>
    %931 = arith.mulf %924, %930 : vector<8x32xf32>
    %c4_i32_799 = arith.constant 4 : i32
    %932 = vector.broadcast %c4_i32_799 : i32 to vector<8x1xi32>
    %933 = arith.cmpi eq, %841, %932 : vector<8x1xi32>
    %934 = vector.shape_cast %933 : vector<8x1xi1> to vector<8x1xi1>
    %935 = vector.broadcast %934 : vector<8x1xi1> to vector<8x32xi1>
    %936 = arith.select %935, %931, %913 : vector<8x32xi1>, vector<8x32xf32>
    %c32 = arith.constant 32 : index
    %c0_800 = arith.constant 0 : index
    %937 = vector.load %arg11[%c32, %c0_800] : memref<64x128xf32, #tpu.memory_space<vmem>>, vector<8x128xf32>
    %cst_801 = arith.constant dense<0.000000e+00> : vector<8x128xf32>
    %938 = tpu.matmul %931, %840, %cst_801 {dimension_numbers = #tpu.dot_dimension_numbers<[1], [0], [0], [1], [0, 0, 1, 1], [], []>} : vector<8x32xf32>, vector<32x128xf32>, vector<8x128xf32> -> vector<8x128xf32>
    %939 = arith.addf %937, %938 : vector<8x128xf32>
    %940 = arith.negf %939 : vector<8x128xf32>
    %941 = math.exp %940 : vector<8x128xf32>
    %cst_802 = arith.constant 1.000000e+00 : f32
    %942 = vector.broadcast %cst_802 : f32 to vector<8x128xf32>
    %943 = arith.addf %942, %941 : vector<8x128xf32>
    %944 = arith.divf %942, %943 : vector<8x128xf32>
    %945 = vector.extract_strided_slice %944 {offsets = [0, 0], sizes = [8, 32], strides = [1, 1]} : vector<8x128xf32> to vector<8x32xf32>
    %946 = vector.extract_strided_slice %944 {offsets = [0, 32], sizes = [8, 32], strides = [1, 1]} : vector<8x128xf32> to vector<8x32xf32>
    %947 = vector.extract_strided_slice %944 {offsets = [0, 96], sizes = [8, 32], strides = [1, 1]} : vector<8x128xf32> to vector<8x32xf32>
    %948 = vector.extract_strided_slice %939 {offsets = [0, 64], sizes = [8, 32], strides = [1, 1]} : vector<8x128xf32> to vector<8x32xf32>
    %949 = math.tanh %948 : vector<8x32xf32>
    %950 = arith.mulf %946, %929 : vector<8x32xf32>
    %951 = arith.mulf %945, %949 : vector<8x32xf32>
    %952 = arith.addf %950, %951 : vector<8x32xf32>
    %953 = math.tanh %952 : vector<8x32xf32>
    %954 = arith.mulf %947, %953 : vector<8x32xf32>
    %c5_i32_803 = arith.constant 5 : i32
    %955 = vector.broadcast %c5_i32_803 : i32 to vector<8x1xi32>
    %956 = arith.cmpi eq, %841, %955 : vector<8x1xi32>
    %957 = vector.shape_cast %956 : vector<8x1xi1> to vector<8x1xi1>
    %958 = vector.broadcast %957 : vector<8x1xi1> to vector<8x32xi1>
    %959 = arith.select %958, %954, %936 : vector<8x32xi1>, vector<8x32xf32>
    %c40 = arith.constant 40 : index
    %c0_804 = arith.constant 0 : index
    %960 = vector.load %arg11[%c40, %c0_804] : memref<64x128xf32, #tpu.memory_space<vmem>>, vector<8x128xf32>
    %cst_805 = arith.constant dense<0.000000e+00> : vector<8x128xf32>
    %961 = tpu.matmul %954, %840, %cst_805 {dimension_numbers = #tpu.dot_dimension_numbers<[1], [0], [0], [1], [0, 0, 1, 1], [], []>} : vector<8x32xf32>, vector<32x128xf32>, vector<8x128xf32> -> vector<8x128xf32>
    %962 = arith.addf %960, %961 : vector<8x128xf32>
    %963 = arith.negf %962 : vector<8x128xf32>
    %964 = math.exp %963 : vector<8x128xf32>
    %cst_806 = arith.constant 1.000000e+00 : f32
    %965 = vector.broadcast %cst_806 : f32 to vector<8x128xf32>
    %966 = arith.addf %965, %964 : vector<8x128xf32>
    %967 = arith.divf %965, %966 : vector<8x128xf32>
    %968 = vector.extract_strided_slice %967 {offsets = [0, 0], sizes = [8, 32], strides = [1, 1]} : vector<8x128xf32> to vector<8x32xf32>
    %969 = vector.extract_strided_slice %967 {offsets = [0, 32], sizes = [8, 32], strides = [1, 1]} : vector<8x128xf32> to vector<8x32xf32>
    %970 = vector.extract_strided_slice %967 {offsets = [0, 96], sizes = [8, 32], strides = [1, 1]} : vector<8x128xf32> to vector<8x32xf32>
    %971 = vector.extract_strided_slice %962 {offsets = [0, 64], sizes = [8, 32], strides = [1, 1]} : vector<8x128xf32> to vector<8x32xf32>
    %972 = math.tanh %971 : vector<8x32xf32>
    %973 = arith.mulf %969, %952 : vector<8x32xf32>
    %974 = arith.mulf %968, %972 : vector<8x32xf32>
    %975 = arith.addf %973, %974 : vector<8x32xf32>
    %976 = math.tanh %975 : vector<8x32xf32>
    %977 = arith.mulf %970, %976 : vector<8x32xf32>
    %c6_i32_807 = arith.constant 6 : i32
    %978 = vector.broadcast %c6_i32_807 : i32 to vector<8x1xi32>
    %979 = arith.cmpi eq, %841, %978 : vector<8x1xi32>
    %980 = vector.shape_cast %979 : vector<8x1xi1> to vector<8x1xi1>
    %981 = vector.broadcast %980 : vector<8x1xi1> to vector<8x32xi1>
    %982 = arith.select %981, %977, %959 : vector<8x32xi1>, vector<8x32xf32>
    %c48 = arith.constant 48 : index
    %c0_808 = arith.constant 0 : index
    %983 = vector.load %arg11[%c48, %c0_808] : memref<64x128xf32, #tpu.memory_space<vmem>>, vector<8x128xf32>
    %cst_809 = arith.constant dense<0.000000e+00> : vector<8x128xf32>
    %984 = tpu.matmul %977, %840, %cst_809 {dimension_numbers = #tpu.dot_dimension_numbers<[1], [0], [0], [1], [0, 0, 1, 1], [], []>} : vector<8x32xf32>, vector<32x128xf32>, vector<8x128xf32> -> vector<8x128xf32>
    %985 = arith.addf %983, %984 : vector<8x128xf32>
    %986 = arith.negf %985 : vector<8x128xf32>
    %987 = math.exp %986 : vector<8x128xf32>
    %cst_810 = arith.constant 1.000000e+00 : f32
    %988 = vector.broadcast %cst_810 : f32 to vector<8x128xf32>
    %989 = arith.addf %988, %987 : vector<8x128xf32>
    %990 = arith.divf %988, %989 : vector<8x128xf32>
    %991 = vector.extract_strided_slice %990 {offsets = [0, 0], sizes = [8, 32], strides = [1, 1]} : vector<8x128xf32> to vector<8x32xf32>
    %992 = vector.extract_strided_slice %990 {offsets = [0, 32], sizes = [8, 32], strides = [1, 1]} : vector<8x128xf32> to vector<8x32xf32>
    %993 = vector.extract_strided_slice %990 {offsets = [0, 96], sizes = [8, 32], strides = [1, 1]} : vector<8x128xf32> to vector<8x32xf32>
    %994 = vector.extract_strided_slice %985 {offsets = [0, 64], sizes = [8, 32], strides = [1, 1]} : vector<8x128xf32> to vector<8x32xf32>
    %995 = math.tanh %994 : vector<8x32xf32>
    %996 = arith.mulf %992, %975 : vector<8x32xf32>
    %997 = arith.mulf %991, %995 : vector<8x32xf32>
    %998 = arith.addf %996, %997 : vector<8x32xf32>
    %999 = math.tanh %998 : vector<8x32xf32>
    %1000 = arith.mulf %993, %999 : vector<8x32xf32>
    %c7_i32_811 = arith.constant 7 : i32
    %1001 = vector.broadcast %c7_i32_811 : i32 to vector<8x1xi32>
    %1002 = arith.cmpi eq, %841, %1001 : vector<8x1xi32>
    %1003 = vector.shape_cast %1002 : vector<8x1xi1> to vector<8x1xi1>
    %1004 = vector.broadcast %1003 : vector<8x1xi1> to vector<8x32xi1>
    %1005 = arith.select %1004, %1000, %982 : vector<8x32xi1>, vector<8x32xf32>
    %c56 = arith.constant 56 : index
    %c0_812 = arith.constant 0 : index
    %1006 = vector.load %arg11[%c56, %c0_812] : memref<64x128xf32, #tpu.memory_space<vmem>>, vector<8x128xf32>
    %cst_813 = arith.constant dense<0.000000e+00> : vector<8x128xf32>
    %1007 = tpu.matmul %1000, %840, %cst_813 {dimension_numbers = #tpu.dot_dimension_numbers<[1], [0], [0], [1], [0, 0, 1, 1], [], []>} : vector<8x32xf32>, vector<32x128xf32>, vector<8x128xf32> -> vector<8x128xf32>
    %1008 = arith.addf %1006, %1007 : vector<8x128xf32>
    %1009 = arith.negf %1008 : vector<8x128xf32>
    %1010 = math.exp %1009 : vector<8x128xf32>
    %cst_814 = arith.constant 1.000000e+00 : f32
    %1011 = vector.broadcast %cst_814 : f32 to vector<8x128xf32>
    %1012 = arith.addf %1011, %1010 : vector<8x128xf32>
    %1013 = arith.divf %1011, %1012 : vector<8x128xf32>
    %1014 = vector.extract_strided_slice %1013 {offsets = [0, 0], sizes = [8, 32], strides = [1, 1]} : vector<8x128xf32> to vector<8x32xf32>
    %1015 = vector.extract_strided_slice %1013 {offsets = [0, 32], sizes = [8, 32], strides = [1, 1]} : vector<8x128xf32> to vector<8x32xf32>
    %1016 = vector.extract_strided_slice %1013 {offsets = [0, 96], sizes = [8, 32], strides = [1, 1]} : vector<8x128xf32> to vector<8x32xf32>
    %1017 = vector.extract_strided_slice %1008 {offsets = [0, 64], sizes = [8, 32], strides = [1, 1]} : vector<8x128xf32> to vector<8x32xf32>
    %1018 = math.tanh %1017 : vector<8x32xf32>
    %1019 = arith.mulf %1015, %998 : vector<8x32xf32>
    %1020 = arith.mulf %1014, %1018 : vector<8x32xf32>
    %1021 = arith.addf %1019, %1020 : vector<8x32xf32>
    %1022 = math.tanh %1021 : vector<8x32xf32>
    %1023 = arith.mulf %1016, %1022 : vector<8x32xf32>
    %c8_i32_815 = arith.constant 8 : i32
    %1024 = vector.broadcast %c8_i32_815 : i32 to vector<8x1xi32>
    %1025 = arith.cmpi eq, %841, %1024 : vector<8x1xi32>
    %1026 = vector.shape_cast %1025 : vector<8x1xi1> to vector<8x1xi1>
    %1027 = vector.broadcast %1026 : vector<8x1xi1> to vector<8x32xi1>
    %1028 = arith.select %1027, %1023, %1005 : vector<8x32xi1>, vector<8x32xf32>
    %c0_816 = arith.constant 0 : index
    %c0_817 = arith.constant 0 : index
    %1029 = vector.load %arg7[%c0_816, %c0_817] : memref<1x32xf32, #tpu.memory_space<vmem>>, vector<1x32xf32>
    %1030 = vector.broadcast %1029 : vector<1x32xf32> to vector<8x32xf32>
    %1031 = arith.mulf %1028, %1030 : vector<8x32xf32>
    %cst_818 = arith.constant dense<0.000000e+00> : vector<8xf32>
    %1032 = vector.multi_reduction <add>, %1031, %cst_818 [1] : vector<8x32xf32> to vector<8xf32>
    %1033 = vector.shape_cast %1032 : vector<8xf32> to vector<8x1xf32>
    %c0_819 = arith.constant 0 : index
    %c0_820 = arith.constant 0 : index
    %1034 = memref.load %arg8[%c0_819, %c0_820] : memref<1x1xf32, #tpu.memory_space<smem>>
    %1035 = vector.broadcast %1034 : f32 to vector<8x1xf32>
    %1036 = arith.addf %1033, %1035 : vector<8x1xf32>
    %1037 = vector.shape_cast %1036 : vector<8x1xf32> to vector<8x1xf32>
    %1038 = vector.broadcast %1037 : vector<8x1xf32> to vector<8x128xf32>
    %c0_821 = arith.constant 0 : index
    %c0_822 = arith.constant 0 : index
    %1039 = vector.load %arg9[%c0_821, %c0_822] : memref<8x128xf32, #tpu.memory_space<vmem>>, vector<8x128xf32>
    tpu.vector_store %arg9[%c0_821, %c0_822], %1038 {strides = array<i32>} : memref<8x128xf32, #tpu.memory_space<vmem>>, vector<8x128xf32>,
    return
  }
  func.func @transform_0(%arg0: i32, %arg1: memref<64xi32, #tpu.memory_space<smem>>) -> (i32, i32) {
    %c0_i32 = arith.constant 0 : i32
    %c0_i32_0 = arith.constant 0 : i32
    return %arg0, %c0_i32 : i32, i32
  }
  func.func @transform_2(%arg0: i32, %arg1: memref<64xi32, #tpu.memory_space<smem>>) -> (i32, i32) {
    %c0_i32 = arith.constant 0 : i32
    %c0_i32_0 = arith.constant 0 : i32
    %c0_i32_1 = arith.constant 0 : i32
    return %c0_i32, %c0_i32_0 : i32, i32
  }
  func.func @transform_3(%arg0: i32, %arg1: memref<64xi32, #tpu.memory_space<smem>>) -> (i32, i32) {
    %c0_i32 = arith.constant 0 : i32
    %c0_i32_0 = arith.constant 0 : i32
    %c0_i32_1 = arith.constant 0 : i32
    return %c0_i32, %c0_i32_0 : i32, i32
  }
  func.func @transform_4(%arg0: i32, %arg1: memref<64xi32, #tpu.memory_space<smem>>) -> (i32, i32) {
    %c0_i32 = arith.constant 0 : i32
    %c0_i32_0 = arith.constant 0 : i32
    %c0_i32_1 = arith.constant 0 : i32
    return %c0_i32, %c0_i32_0 : i32, i32
  }
  func.func @transform_5(%arg0: i32, %arg1: memref<64xi32, #tpu.memory_space<smem>>) -> (i32, i32) {
    %c0_i32 = arith.constant 0 : i32
    %c0_i32_0 = arith.constant 0 : i32
    %c0_i32_1 = arith.constant 0 : i32
    return %c0_i32, %c0_i32_0 : i32, i32
  }
  func.func @transform_6(%arg0: i32, %arg1: memref<64xi32, #tpu.memory_space<smem>>) -> (i32, i32) {
    %c0_i32 = arith.constant 0 : i32
    %c0_i32_0 = arith.constant 0 : i32
    %c0_i32_1 = arith.constant 0 : i32
    return %c0_i32, %c0_i32_0 : i32, i32
  }
  func.func @transform_7(%arg0: i32, %arg1: memref<64xi32, #tpu.memory_space<smem>>) -> (i32, i32) {
    %c0_i32 = arith.constant 0 : i32
    %c0_i32_0 = arith.constant 0 : i32
    return %arg0, %c0_i32 : i32, i32
  }
}

</mosaic_0001>

<bundles_post_ra>
// kernel: tpu_custom_call.1
= control target key start
LH: loop header
LB: loop body
LE: loop exit
PB: predicated region body
PF: predicated region fallthrough
CT: control target
= control target key end

     0   :  { %s6634_s0 = inlined_call_operand.vmem [shape: s32[64], index: 0, kind: input, shape index: {}]   ;;  %s6635_s1 = inlined_call_operand.vmem [shape: s32[8,1], index: 1, kind: input, shape index: {}]   ;;  %s6636_s2 = inlined_call_operand.vmem [shape: f32[100,32], index: 2, kind: input, shape index: {}]   ;;  %s6637_s3 = inlined_call_operand.vmem [shape: f32[32,128], index: 3, kind: input, shape index: {}]   ;;  %s6638_s4 = inlined_call_operand.vmem [shape: f32[32,128], index: 4, kind: input, shape index: {}]   ;;  %s6639_s5 = inlined_call_operand.vmem [shape: f32[1,128], index: 5, kind: input, shape index: {}]   ;;  %s6640_s6 = inlined_call_operand.vmem [shape: f32[1,32], index: 6, kind: input, shape index: {}]   ;;  %s6641_s7 = inlined_call_operand.<no memory space> [shape: f32[1,1], index: 7, kind: input, shape index: {}]   ;;  %s6642_s8 = inlined_call_operand.hbm [shape: f32[8,128], index: 8, kind: output, shape index: {}]  }
   0x1   :  { %s13_s29 = sshll.u32 %s6634_s0, 4  ;;  %s14_s29 = int_to_ptr.vmem [resolvable:$true] %s13_s29 }
   0x2   :  { %s6020_s30 = scalar_lea.vmem %s14_s29, 16  ;;  %p6025_p1 = scmp.lt.s32.totalorder %s14_s29, %s14_s29 }
   0x3   :  { %p6021_p0 = scmp.ne.s32.totalorder %s14_s29, %s6020_s30  ;;  %p6026_p2 = scmp.lt.s32.totalorder %s6020_s30, %s6020_s30 }
   0x5   :  { %p6027_p3 = por %p6026_p2, %p6025_p1 }
   0x7   :  { %p6028_p4 = pnand %p6027_p3, %p6021_p0 }
   0x9   :  { %6031 = shalt.err (!%p6028_p4)  }
   0xa   :  { %s6186_s9 = smov [#allocation6]  }
   0xb   :  { %16 = dma.vmem_to_smem %s14_s29, 16, %s6186_s9, [#allocation5] }
   0xc   :  { %6054 = dma.done.wait [#allocation5], 16 }
   0xd   :  { %6055 = vsyncadd [#allocation5], 4294967280 }
   0xe   :  { %19 = sfence }
   0xf   :  { %20 = vsyncpa [#allocation9], 0  ;;  %s35_s10 = sld [smem:[#allocation6]] }
  0x15   :  { %s36_s13 = scalar_lea.vmem %s6636_s2, %s35_s10 }
  0x16   :  { %v54_v0 = vld [vmem:[%s36_s13] sm:$0x1] }
  0x17   :  { %55 = vst [vmem:[#allocation2] sm:$0x1] %v54_v0 }
  0x18   :  { %80 = vsyncadd [#allocation4], 16  ;;  %s5577_s0 = sld [smem:[#allocation6 + $0x8]] }
  0x1e   :  { %s84_s16 = scalar_lea.vmem %s6636_s2, %s5577_s0 }
  0x1f   :  { %v104_v1 = vld [vmem:[%s84_s16] sm:$0x1] }
  0x20   :  { %105 = vst [vmem:[#allocation2 + $0x1] sm:$0x1] %v104_v1 }
  0x21   :  { %130 = vsyncadd [#allocation4 + $0x1], 16  ;;  %s5578_s17 = sld [smem:[#allocation6 + $0x10]] }
  0x27   :  { %s134_s20 = scalar_lea.vmem %s6636_s2, %s5578_s17 }
  0x28   :  { %v154_v2 = vld [vmem:[%s134_s20] sm:$0x1] }
  0x29   :  { %155 = vst [vmem:[#allocation2 + $0x2] sm:$0x1] %v154_v2 }
  0x2a   :  { %180 = vsyncadd [#allocation4 + $0x2], 16  ;;  %s5579_s21 = sld [smem:[#allocation6 + $0x18]] }
  0x30   :  { %s184_s24 = scalar_lea.vmem %s6636_s2, %s5579_s21 }
  0x31   :  { %v204_v3 = vld [vmem:[%s184_s24] sm:$0x1] }
  0x32   :  { %205 = vst [vmem:[#allocation2 + $0x3] sm:$0x1] %v204_v3 }
  0x33   :  { %230 = vsyncadd [#allocation4 + $0x3], 16  ;;  %s5580_s25 = sld [smem:[#allocation6 + $0x20]] }
  0x39   :  { %s234_s28 = scalar_lea.vmem %s6636_s2, %s5580_s25 }
  0x3a   :  { %v254_v4 = vld [vmem:[%s234_s28] sm:$0x1] }
  0x3b   :  { %255 = vst [vmem:[#allocation2 + $0x4] sm:$0x1] %v254_v4 }
  0x3c   :  { %280 = vsyncadd [#allocation4 + $0x4], 16  ;;  %s5581_s29 = sld [smem:[#allocation6 + $0x28]] }
  0x42   :  { %s284_s10 = scalar_lea.vmem %s6636_s2, %s5581_s29 }
  0x43   :  { %v304_v5 = vld [vmem:[%s284_s10] sm:$0x1] }
  0x44   :  { %305 = vst [vmem:[#allocation2 + $0x5] sm:$0x1] %v304_v5 }
  0x45   :  { %330 = vsyncadd [#allocation4 + $0x5], 16  ;;  %s5582_s11 = sld [smem:[#allocation6 + $0x30]] }
  0x4b   :  { %s334_s0 = scalar_lea.vmem %s6636_s2, %s5582_s11 }
  0x4c   :  { %v354_v6 = vld [vmem:[%s334_s0] sm:$0x1] }
  0x4d   :  { %355 = vst [vmem:[#allocation2 + $0x6] sm:$0x1] %v354_v6 }
  0x4e   :  { %380 = vsyncadd [#allocation4 + $0x6], 16  ;;  %s5583_s14 = sld [smem:[#allocation6 + $0x38]] }
  0x54   :  { %s384_s17 = scalar_lea.vmem %s6636_s2, %s5583_s14 }
  0x55   :  { %v404_v7 = vld [vmem:[%s384_s17] sm:$0x1] }
  0x56   :  { %405 = vst [vmem:[#allocation2 + $0x7] sm:$0x1] %v404_v7 }
  0x57   :  { %430 = vsyncadd [#allocation4 + $0x7], 16  ;;  %s5584_s18 = sld [smem:[#allocation6 + $0x1]] }
  0x5d   :  { %s433_s21 = scalar_lea.vmem %s6636_s2, %s5584_s18 }
  0x5e   :  { %v453_v8 = vld [vmem:[%s433_s21] sm:$0x1] }
  0x5f   :  { %454 = vst [vmem:[#allocation2 + $0x8] sm:$0x1] %v453_v8 }
  0x60   :  { %479 = vsyncadd [#allocation4 + $0x8], 16  ;;  %s5585_s22 = sld [smem:[#allocation6 + $0x9]] }
  0x66   :  { %s482_s25 = scalar_lea.vmem %s6636_s2, %s5585_s22 }
  0x67   :  { %v502_v9 = vld [vmem:[%s482_s25] sm:$0x1] }
  0x68   :  { %503 = vst [vmem:[#allocation2 + $0x9] sm:$0x1] %v502_v9 }
  0x69   :  { %528 = vsyncadd [#allocation4 + $0x9], 16  ;;  %s5586_s26 = sld [smem:[#allocation6 + $0x11]] }
  0x6f   :  { %s531_s29 = scalar_lea.vmem %s6636_s2, %s5586_s26 }
  0x70   :  { %v551_v10 = vld [vmem:[%s531_s29] sm:$0x1] }
  0x71   :  { %552 = vst [vmem:[#allocation2 + $0xa] sm:$0x1] %v551_v10 }
  0x72   :  { %577 = vsyncadd [#allocation4 + $0xa], 16  ;;  %s5587_s30 = sld [smem:[#allocation6 + $0x19]] }
  0x78   :  { %s580_s11 = scalar_lea.vmem %s6636_s2, %s5587_s30 }
  0x79   :  { %v600_v11 = vld [vmem:[%s580_s11] sm:$0x1] }
  0x7a   :  { %601 = vst [vmem:[#allocation2 + $0xb] sm:$0x1] %v600_v11 }
  0x7b   :  { %626 = vsyncadd [#allocation4 + $0xb], 16  ;;  %s5588_s12 = sld [smem:[#allocation6 + $0x21]] }
  0x81   :  { %s629_s14 = scalar_lea.vmem %s6636_s2, %s5588_s12 }
  0x82   :  { %v649_v12 = vld [vmem:[%s629_s14] sm:$0x1] }
  0x83   :  { %650 = vst [vmem:[#allocation2 + $0xc] sm:$0x1] %v649_v12 }
  0x84   :  { %675 = vsyncadd [#allocation4 + $0xc], 16  ;;  %s5589_s15 = sld [smem:[#allocation6 + $0x29]] }
  0x8a   :  { %s678_s18 = scalar_lea.vmem %s6636_s2, %s5589_s15 }
  0x8b   :  { %v698_v13 = vld [vmem:[%s678_s18] sm:$0x1] }
  0x8c   :  { %699 = vst [vmem:[#allocation2 + $0xd] sm:$0x1] %v698_v13 }
  0x8d   :  { %724 = vsyncadd [#allocation4 + $0xd], 16  ;;  %s5590_s19 = sld [smem:[#allocation6 + $0x31]] }
  0x93   :  { %s727_s22 = scalar_lea.vmem %s6636_s2, %s5590_s19 }
  0x94   :  { %v747_v14 = vld [vmem:[%s727_s22] sm:$0x1] }
  0x95   :  { %748 = vst [vmem:[#allocation2 + $0xe] sm:$0x1] %v747_v14 }
  0x96   :  { %773 = vsyncadd [#allocation4 + $0xe], 16  ;;  %s5591_s23 = sld [smem:[#allocation6 + $0x39]] }
  0x9c   :  { %s776_s26 = scalar_lea.vmem %s6636_s2, %s5591_s23 }
  0x9d   :  { %v796_v15 = vld [vmem:[%s776_s26] sm:$0x1] }
  0x9e   :  { %797 = vst [vmem:[#allocation2 + $0xf] sm:$0x1] %v796_v15 }
  0x9f   :  { %822 = vsyncadd [#allocation4 + $0xf], 16  ;;  %s5592_s27 = sld [smem:[#allocation6 + $0x2]] }
  0xa5   :  { %s825_s30 = scalar_lea.vmem %s6636_s2, %s5592_s27 }
  0xa6   :  { %v845_v16 = vld [vmem:[%s825_s30] sm:$0x1] }
  0xa7   :  { %846 = vst [vmem:[#allocation2 + $0x10] sm:$0x1] %v845_v16 }
  0xa8   :  { %871 = vsyncadd [#allocation4 + $0x10], 16  ;;  %s5593_s9 = sld [smem:[#allocation6 + $0xa]] }
  0xae   :  { %s874_s12 = scalar_lea.vmem %s6636_s2, %s5593_s9 }
  0xaf   :  { %v894_v17 = vld [vmem:[%s874_s12] sm:$0x1] }
  0xb0   :  { %895 = vst [vmem:[#allocation2 + $0x11] sm:$0x1] %v894_v17 }
  0xb1   :  { %920 = vsyncadd [#allocation4 + $0x11], 16  ;;  %s5594_s13 = sld [smem:[#allocation6 + $0x12]] }
  0xb7   :  { %s923_s15 = scalar_lea.vmem %s6636_s2, %s5594_s13 }
  0xb8   :  { %v943_v18 = vld [vmem:[%s923_s15] sm:$0x1] }
  0xb9   :  { %944 = vst [vmem:[#allocation2 + $0x12] sm:$0x1] %v943_v18 }
  0xba   :  { %969 = vsyncadd [#allocation4 + $0x12], 16  ;;  %s5595_s16 = sld [smem:[#allocation6 + $0x1a]] }
  0xc0   :  { %s972_s19 = scalar_lea.vmem %s6636_s2, %s5595_s16 }
  0xc1   :  { %v992_v19 = vld [vmem:[%s972_s19] sm:$0x1] }
  0xc2   :  { %993 = vst [vmem:[#allocation2 + $0x13] sm:$0x1] %v992_v19 }
  0xc3   :  { %1018 = vsyncadd [#allocation4 + $0x13], 16  ;;  %s5596_s20 = sld [smem:[#allocation6 + $0x22]] }
  0xc9   :  { %s1021_s23 = scalar_lea.vmem %s6636_s2, %s5596_s20 }
  0xca   :  { %v1041_v20 = vld [vmem:[%s1021_s23] sm:$0x1] }
  0xcb   :  { %1042 = vst [vmem:[#allocation2 + $0x14] sm:$0x1] %v1041_v20 }
  0xcc   :  { %1067 = vsyncadd [#allocation4 + $0x14], 16  ;;  %s5597_s24 = sld [smem:[#allocation6 + $0x2a]] }
  0xd2   :  { %s1070_s27 = scalar_lea.vmem %s6636_s2, %s5597_s24 }
  0xd3   :  { %v1090_v21 = vld [vmem:[%s1070_s27] sm:$0x1] }
  0xd4   :  { %1091 = vst [vmem:[#allocation2 + $0x15] sm:$0x1] %v1090_v21 }
  0xd5   :  { %1116 = vsyncadd [#allocation4 + $0x15], 16  ;;  %s5598_s28 = sld [smem:[#allocation6 + $0x32]] }
  0xdb   :  { %s1119_s9 = scalar_lea.vmem %s6636_s2, %s5598_s28 }
  0xdc   :  { %v1139_v22 = vld [vmem:[%s1119_s9] sm:$0x1] }
  0xdd   :  { %1140 = vst [vmem:[#allocation2 + $0x16] sm:$0x1] %v1139_v22 }
  0xde   :  { %1165 = vsyncadd [#allocation4 + $0x16], 16  ;;  %s5599_s10 = sld [smem:[#allocation6 + $0x3a]] }
  0xe4   :  { %s1168_s13 = scalar_lea.vmem %s6636_s2, %s5599_s10 }
  0xe5   :  { %v1188_v23 = vld [vmem:[%s1168_s13] sm:$0x1] }
  0xe6   :  { %1189 = vst [vmem:[#allocation2 + $0x17] sm:$0x1] %v1188_v23 }
  0xe7   :  { %1214 = vsyncadd [#allocation4 + $0x17], 16  ;;  %s5600_s0 = sld [smem:[#allocation6 + $0x3]] }
  0xed   :  { %s1217_s16 = scalar_lea.vmem %s6636_s2, %s5600_s0 }
  0xee   :  { %v1237_v24 = vld [vmem:[%s1217_s16] sm:$0x1] }
  0xef   :  { %1238 = vst [vmem:[#allocation2 + $0x18] sm:$0x1] %v1237_v24 }
  0xf0   :  { %1263 = vsyncadd [#allocation4 + $0x18], 16  ;;  %s5601_s17 = sld [smem:[#allocation6 + $0xb]] }
  0xf6   :  { %s1266_s20 = scalar_lea.vmem %s6636_s2, %s5601_s17 }
  0xf7   :  { %v1286_v25 = vld [vmem:[%s1266_s20] sm:$0x1] }
  0xf8   :  { %1287 = vst [vmem:[#allocation2 + $0x19] sm:$0x1] %v1286_v25 }
  0xf9   :  { %1312 = vsyncadd [#allocation4 + $0x19], 16  ;;  %s5602_s21 = sld [smem:[#allocation6 + $0x13]] }
  0xff   :  { %s1315_s24 = scalar_lea.vmem %s6636_s2, %s5602_s21 }
 0x100   :  { %v1335_v26 = vld [vmem:[%s1315_s24] sm:$0x1] }
 0x101   :  { %1336 = vst [vmem:[#allocation2 + $0x1a] sm:$0x1] %v1335_v26 }
 0x102   :  { %1361 = vsyncadd [#allocation4 + $0x1a], 16  ;;  %s5603_s25 = sld [smem:[#allocation6 + $0x1b]] }
 0x108   :  { %s1364_s28 = scalar_lea.vmem %s6636_s2, %s5603_s25 }
 0x109   :  { %v1384_v27 = vld [vmem:[%s1364_s28] sm:$0x1] }
 0x10a   :  { %1385 = vst [vmem:[#allocation2 + $0x1b] sm:$0x1] %v1384_v27 }
 0x10b   :  { %1410 = vsyncadd [#allocation4 + $0x1b], 16  ;;  %s5604_s29 = sld [smem:[#allocation6 + $0x23]] }
 0x111   :  { %s1413_s10 = scalar_lea.vmem %s6636_s2, %s5604_s29 }
 0x112   :  { %v1433_v28 = vld [vmem:[%s1413_s10] sm:$0x1] }
 0x113   :  { %1434 = vst [vmem:[#allocation2 + $0x1c] sm:$0x1] %v1433_v28 }
 0x114   :  { %1459 = vsyncadd [#allocation4 + $0x1c], 16  ;;  %s5605_s11 = sld [smem:[#allocation6 + $0x2b]] }
 0x11a   :  { %s1462_s0 = scalar_lea.vmem %s6636_s2, %s5605_s11 }
 0x11b   :  { %v1482_v29 = vld [vmem:[%s1462_s0] sm:$0x1] }
 0x11c   :  { %1483 = vst [vmem:[#allocation2 + $0x1d] sm:$0x1] %v1482_v29 }
 0x11d   :  { %1508 = vsyncadd [#allocation4 + $0x1d], 16  ;;  %s5606_s14 = sld [smem:[#allocation6 + $0x33]] }
 0x123   :  { %s1511_s17 = scalar_lea.vmem %s6636_s2, %s5606_s14 }
 0x124   :  { %v1531_v30 = vld [vmem:[%s1511_s17] sm:$0x1] }
 0x125   :  { %1532 = vst [vmem:[#allocation2 + $0x1e] sm:$0x1] %v1531_v30 }
 0x126   :  { %1557 = vsyncadd [#allocation4 + $0x1e], 16  ;;  %s5607_s18 = sld [smem:[#allocation6 + $0x3b]] }
 0x12c   :  { %s1560_s21 = scalar_lea.vmem %s6636_s2, %s5607_s18 }
 0x12d   :  { %v1580_v31 = vld [vmem:[%s1560_s21] sm:$0x1] }
 0x12e   :  { %1581 = vst [vmem:[#allocation2 + $0x1f] sm:$0x1] %v1580_v31 }
 0x12f   :  { %1606 = vsyncadd [#allocation4 + $0x1f], 16  ;;  %s5608_s22 = sld [smem:[#allocation6 + $0x4]] }
 0x135   :  { %s1609_s25 = scalar_lea.vmem %s6636_s2, %s5608_s22 }
 0x136   :  { %v1629_v32 = vld [vmem:[%s1609_s25] sm:$0x1] }
 0x137   :  { %1630 = vst [vmem:[#allocation2 + $0x20] sm:$0x1] %v1629_v32 }
 0x138   :  { %1655 = vsyncadd [#allocation4 + $0x20], 16  ;;  %s5609_s26 = sld [smem:[#allocation6 + $0xc]] }
 0x13e   :  { %s1658_s29 = scalar_lea.vmem %s6636_s2, %s5609_s26 }
 0x13f   :  { %v1678_v33 = vld [vmem:[%s1658_s29] sm:$0x1] }
 0x140   :  { %1679 = vst [vmem:[#allocation2 + $0x21] sm:$0x1] %v1678_v33 }
 0x141   :  { %1704 = vsyncadd [#allocation4 + $0x21], 16  ;;  %s5610_s30 = sld [smem:[#allocation6 + $0x14]] }
 0x147   :  { %s1707_s11 = scalar_lea.vmem %s6636_s2, %s5610_s30 }
 0x148   :  { %v1727_v34 = vld [vmem:[%s1707_s11] sm:$0x1] }
 0x149   :  { %1728 = vst [vmem:[#allocation2 + $0x22] sm:$0x1] %v1727_v34 }
 0x14a   :  { %1753 = vsyncadd [#allocation4 + $0x22], 16  ;;  %s5611_s12 = sld [smem:[#allocation6 + $0x1c]] }
 0x150   :  { %s1756_s14 = scalar_lea.vmem %s6636_s2, %s5611_s12 }
 0x151   :  { %v1776_v35 = vld [vmem:[%s1756_s14] sm:$0x1] }
 0x152   :  { %1777 = vst [vmem:[#allocation2 + $0x23] sm:$0x1] %v1776_v35 }
 0x153   :  { %1802 = vsyncadd [#allocation4 + $0x23], 16  ;;  %s5612_s15 = sld [smem:[#allocation6 + $0x24]] }
 0x159   :  { %s1805_s18 = scalar_lea.vmem %s6636_s2, %s5612_s15 }
 0x15a   :  { %v1825_v36 = vld [vmem:[%s1805_s18] sm:$0x1] }
 0x15b   :  { %1826 = vst [vmem:[#allocation2 + $0x24] sm:$0x1] %v1825_v36 }
 0x15c   :  { %1851 = vsyncadd [#allocation4 + $0x24], 16  ;;  %s5613_s19 = sld [smem:[#allocation6 + $0x2c]] }
 0x162   :  { %s1854_s22 = scalar_lea.vmem %s6636_s2, %s5613_s19 }
 0x163   :  { %v1874_v37 = vld [vmem:[%s1854_s22] sm:$0x1] }
 0x164   :  { %1875 = vst [vmem:[#allocation2 + $0x25] sm:$0x1] %v1874_v37 }
 0x165   :  { %1900 = vsyncadd [#allocation4 + $0x25], 16  ;;  %s5614_s23 = sld [smem:[#allocation6 + $0x34]] }
 0x16b   :  { %s1903_s26 = scalar_lea.vmem %s6636_s2, %s5614_s23 }
 0x16c   :  { %v1923_v38 = vld [vmem:[%s1903_s26] sm:$0x1] }
 0x16d   :  { %1924 = vst [vmem:[#allocation2 + $0x26] sm:$0x1] %v1923_v38 }
 0x16e   :  { %1949 = vsyncadd [#allocation4 + $0x26], 16  ;;  %s5615_s27 = sld [smem:[#allocation6 + $0x3c]] }
 0x174   :  { %s1952_s30 = scalar_lea.vmem %s6636_s2, %s5615_s27 }
 0x175   :  { %v1972_v39 = vld [vmem:[%s1952_s30] sm:$0x1] }
 0x176   :  { %1973 = vst [vmem:[#allocation2 + $0x27] sm:$0x1] %v1972_v39 }
 0x177   :  { %1998 = vsyncadd [#allocation4 + $0x27], 16  ;;  %s5616_s9 = sld [smem:[#allocation6 + $0x5]] }
 0x17d   :  { %s2001_s12 = scalar_lea.vmem %s6636_s2, %s5616_s9 }
 0x17e   :  { %v2021_v40 = vld [vmem:[%s2001_s12] sm:$0x1] }
 0x17f   :  { %2022 = vst [vmem:[#allocation2 + $0x28] sm:$0x1] %v2021_v40 }
 0x180   :  { %2047 = vsyncadd [#allocation4 + $0x28], 16  ;;  %s5617_s13 = sld [smem:[#allocation6 + $0xd]] }
 0x186   :  { %s2050_s15 = scalar_lea.vmem %s6636_s2, %s5617_s13 }
 0x187   :  { %v2070_v41 = vld [vmem:[%s2050_s15] sm:$0x1] }
 0x188   :  { %2071 = vst [vmem:[#allocation2 + $0x29] sm:$0x1] %v2070_v41 }
 0x189   :  { %2096 = vsyncadd [#allocation4 + $0x29], 16  ;;  %s5618_s16 = sld [smem:[#allocation6 + $0x15]] }
 0x18f   :  { %s2099_s19 = scalar_lea.vmem %s6636_s2, %s5618_s16 }
 0x190   :  { %v2119_v42 = vld [vmem:[%s2099_s19] sm:$0x1] }
 0x191   :  { %2120 = vst [vmem:[#allocation2 + $0x2a] sm:$0x1] %v2119_v42 }
 0x192   :  { %2145 = vsyncadd [#allocation4 + $0x2a], 16  ;;  %s5619_s20 = sld [smem:[#allocation6 + $0x1d]] }
 0x198   :  { %s2148_s23 = scalar_lea.vmem %s6636_s2, %s5619_s20 }
 0x199   :  { %v2168_v43 = vld [vmem:[%s2148_s23] sm:$0x1] }
 0x19a   :  { %2169 = vst [vmem:[#allocation2 + $0x2b] sm:$0x1] %v2168_v43 }
 0x19b   :  { %2194 = vsyncadd [#allocation4 + $0x2b], 16  ;;  %s5620_s24 = sld [smem:[#allocation6 + $0x25]] }
 0x1a1   :  { %s2197_s27 = scalar_lea.vmem %s6636_s2, %s5620_s24 }
 0x1a2   :  { %v2217_v44 = vld [vmem:[%s2197_s27] sm:$0x1] }
 0x1a3   :  { %2218 = vst [vmem:[#allocation2 + $0x2c] sm:$0x1] %v2217_v44 }
 0x1a4   :  { %2243 = vsyncadd [#allocation4 + $0x2c], 16  ;;  %s5621_s28 = sld [smem:[#allocation6 + $0x2d]] }
 0x1aa   :  { %s2246_s9 = scalar_lea.vmem %s6636_s2, %s5621_s28 }
 0x1ab   :  { %v2266_v45 = vld [vmem:[%s2246_s9] sm:$0x1] }
 0x1ac   :  { %2267 = vst [vmem:[#allocation2 + $0x2d] sm:$0x1] %v2266_v45 }
 0x1ad   :  { %2292 = vsyncadd [#allocation4 + $0x2d], 16  ;;  %s5622_s10 = sld [smem:[#allocation6 + $0x35]] }
 0x1b3   :  { %s2295_s13 = scalar_lea.vmem %s6636_s2, %s5622_s10 }
 0x1b4   :  { %v2315_v46 = vld [vmem:[%s2295_s13] sm:$0x1] }
 0x1b5   :  { %2316 = vst [vmem:[#allocation2 + $0x2e] sm:$0x1] %v2315_v46 }
 0x1b6   :  { %2341 = vsyncadd [#allocation4 + $0x2e], 16  ;;  %s5623_s0 = sld [smem:[#allocation6 + $0x3d]] }
 0x1bc   :  { %s2344_s16 = scalar_lea.vmem %s6636_s2, %s5623_s0 }
 0x1bd   :  { %v2364_v47 = vld [vmem:[%s2344_s16] sm:$0x1] }
 0x1be   :  { %2365 = vst [vmem:[#allocation2 + $0x2f] sm:$0x1] %v2364_v47 }
 0x1bf   :  { %2390 = vsyncadd [#allocation4 + $0x2f], 16  ;;  %s5624_s17 = sld [smem:[#allocation6 + $0x6]] }
 0x1c5   :  { %s2393_s20 = scalar_lea.vmem %s6636_s2, %s5624_s17 }
 0x1c6   :  { %v2413_v48 = vld [vmem:[%s2393_s20] sm:$0x1] }
 0x1c7   :  { %2414 = vst [vmem:[#allocation2 + $0x30] sm:$0x1] %v2413_v48 }
 0x1c8   :  { %2439 = vsyncadd [#allocation4 + $0x30], 16  ;;  %s5625_s21 = sld [smem:[#allocation6 + $0xe]] }
 0x1ce   :  { %s2442_s24 = scalar_lea.vmem %s6636_s2, %s5625_s21 }
 0x1cf   :  { %v2462_v49 = vld [vmem:[%s2442_s24] sm:$0x1] }
 0x1d0   :  { %2463 = vst [vmem:[#allocation2 + $0x31] sm:$0x1] %v2462_v49 }
 0x1d1   :  { %2488 = vsyncadd [#allocation4 + $0x31], 16  ;;  %s5626_s25 = sld [smem:[#allocation6 + $0x16]] }
 0x1d7   :  { %s2491_s28 = scalar_lea.vmem %s6636_s2, %s5626_s25 }
 0x1d8   :  { %v2511_v50 = vld [vmem:[%s2491_s28] sm:$0x1] }
 0x1d9   :  { %2512 = vst [vmem:[#allocation2 + $0x32] sm:$0x1] %v2511_v50 }
 0x1da   :  { %2537 = vsyncadd [#allocation4 + $0x32], 16  ;;  %s5627_s29 = sld [smem:[#allocation6 + $0x1e]] }
 0x1e0   :  { %s2540_s10 = scalar_lea.vmem %s6636_s2, %s5627_s29 }
 0x1e1   :  { %v2560_v51 = vld [vmem:[%s2540_s10] sm:$0x1] }
 0x1e2   :  { %2561 = vst [vmem:[#allocation2 + $0x33] sm:$0x1] %v2560_v51 }
 0x1e3   :  { %2586 = vsyncadd [#allocation4 + $0x33], 16  ;;  %s5628_s11 = sld [smem:[#allocation6 + $0x26]] }
 0x1e9   :  { %s2589_s0 = scalar_lea.vmem %s6636_s2, %s5628_s11 }
 0x1ea   :  { %v2609_v52 = vld [vmem:[%s2589_s0] sm:$0x1] }
 0x1eb   :  { %2610 = vst [vmem:[#allocation2 + $0x34] sm:$0x1] %v2609_v52 }
 0x1ec   :  { %2635 = vsyncadd [#allocation4 + $0x34], 16  ;;  %s5629_s14 = sld [smem:[#allocation6 + $0x2e]] }
 0x1f2   :  { %s2638_s17 = scalar_lea.vmem %s6636_s2, %s5629_s14 }
 0x1f3   :  { %v2658_v53 = vld [vmem:[%s2638_s17] sm:$0x1] }
 0x1f4   :  { %2659 = vst [vmem:[#allocation2 + $0x35] sm:$0x1] %v2658_v53 }
 0x1f5   :  { %2684 = vsyncadd [#allocation4 + $0x35], 16  ;;  %s5630_s18 = sld [smem:[#allocation6 + $0x36]] }
 0x1fb   :  { %s2687_s21 = scalar_lea.vmem %s6636_s2, %s5630_s18 }
 0x1fc   :  { %v2707_v54 = vld [vmem:[%s2687_s21] sm:$0x1] }
 0x1fd   :  { %2708 = vst [vmem:[#allocation2 + $0x36] sm:$0x1] %v2707_v54 }
 0x1fe   :  { %2733 = vsyncadd [#allocation4 + $0x36], 16  ;;  %s5631_s22 = sld [smem:[#allocation6 + $0x3e]] }
 0x204   :  { %s2736_s25 = scalar_lea.vmem %s6636_s2, %s5631_s22 }
 0x205   :  { %v2756_v55 = vld [vmem:[%s2736_s25] sm:$0x1] }
 0x206   :  { %2757 = vst [vmem:[#allocation2 + $0x37] sm:$0x1] %v2756_v55 }
 0x207   :  { %2782 = vsyncadd [#allocation4 + $0x37], 16  ;;  %s5632_s26 = sld [smem:[#allocation6 + $0x7]] }
 0x20d   :  { %s2785_s29 = scalar_lea.vmem %s6636_s2, %s5632_s26 }
 0x20e   :  { %v2805_v56 = vld [vmem:[%s2785_s29] sm:$0x1] }
 0x20f   :  { %2806 = vst [vmem:[#allocation2 + $0x38] sm:$0x1] %v2805_v56 }
 0x210   :  { %2831 = vsyncadd [#allocation4 + $0x38], 16  ;;  %s5633_s30 = sld [smem:[#allocation6 + $0xf]] }
 0x216   :  { %s2834_s11 = scalar_lea.vmem %s6636_s2, %s5633_s30 }
 0x217   :  { %v2854_v57 = vld [vmem:[%s2834_s11] sm:$0x1] }
 0x218   :  { %2855 = vst [vmem:[#allocation2 + $0x39] sm:$0x1] %v2854_v57 }
 0x219   :  { %2880 = vsyncadd [#allocation4 + $0x39], 16  ;;  %s5634_s12 = sld [smem:[#allocation6 + $0x17]] }
 0x21f   :  { %s2883_s14 = scalar_lea.vmem %s6636_s2, %s5634_s12 }
 0x220   :  { %v2903_v58 = vld [vmem:[%s2883_s14] sm:$0x1] }
 0x221   :  { %2904 = vst [vmem:[#allocation2 + $0x3a] sm:$0x1] %v2903_v58 }
 0x222   :  { %2929 = vsyncadd [#allocation4 + $0x3a], 16  ;;  %s5635_s15 = sld [smem:[#allocation6 + $0x1f]] }
 0x228   :  { %s2932_s18 = scalar_lea.vmem %s6636_s2, %s5635_s15 }
 0x229   :  { %v2952_v59 = vld [vmem:[%s2932_s18] sm:$0x1] }
 0x22a   :  { %2953 = vst [vmem:[#allocation2 + $0x3b] sm:$0x1] %v2952_v59 }
 0x22b   :  { %2978 = vsyncadd [#allocation4 + $0x3b], 16  ;;  %s5636_s19 = sld [smem:[#allocation6 + $0x27]] }
 0x231   :  { %s2981_s22 = scalar_lea.vmem %s6636_s2, %s5636_s19 }
 0x232   :  { %v3001_v60 = vld [vmem:[%s2981_s22] sm:$0x1] }
 0x233   :  { %3002 = vst [vmem:[#allocation2 + $0x3c] sm:$0x1] %v3001_v60 }
 0x234   :  { %3027 = vsyncadd [#allocation4 + $0x3c], 16  ;;  %s5637_s23 = sld [smem:[#allocation6 + $0x2f]] }
 0x23a   :  { %s3030_s26 = scalar_lea.vmem %s6636_s2, %s5637_s23 }
 0x23b   :  { %v3050_v61 = vld [vmem:[%s3030_s26] sm:$0x1] }
 0x23c   :  { %3051 = vst [vmem:[#allocation2 + $0x3d] sm:$0x1] %v3050_v61 }
 0x23d   :  { %3076 = vsyncadd [#allocation4 + $0x3d], 16  ;;  %s5638_s27 = sld [smem:[#allocation6 + $0x37]] }
 0x243   :  { %s3079_s30 = scalar_lea.vmem %s6636_s2, %s5638_s27 }
 0x244   :  { %v3099_v62 = vld [vmem:[%s3079_s30] sm:$0x1] }
 0x245   :  { %3100 = vst [vmem:[#allocation2 + $0x3e] sm:$0x1] %v3099_v62 }
 0x246   :  { %3125 = vsyncadd [#allocation4 + $0x3e], 16  ;;  %s5639_s9 = sld [smem:[#allocation6 + $0x3f]] }
 0x24c   :  { %s3128_s12 = scalar_lea.vmem %s6636_s2, %s5639_s9 }
 0x24d   :  { %v3148_v63 = vld [vmem:[%s3128_s12] sm:$0x1] }
 0x24e   :  { %3149 = vst [vmem:[#allocation2 + $0x3f] sm:$0x1] %v3148_v63 }
 0x24f   :  { %3174 = vsyncadd [#allocation4 + $0x3f], 16 }
 0x250   :  { %6056 = dma.done.wait [#allocation4], 16 }
 0x251   :  { %6057 = vsyncadd [#allocation4], 4294967280 }
 0x252   :  { %6058 = dma.done.wait [#allocation4 + $0x1], 16 }
 0x253   :  { %6059 = vsyncadd [#allocation4 + $0x1], 4294967280 }
 0x254   :  { %6060 = dma.done.wait [#allocation4 + $0x2], 16 }
 0x255   :  { %6061 = vsyncadd [#allocation4 + $0x2], 4294967280 }
 0x256   :  { %6062 = dma.done.wait [#allocation4 + $0x3], 16 }
 0x257   :  { %6063 = vsyncadd [#allocation4 + $0x3], 4294967280 }
 0x258   :  { %6064 = dma.done.wait [#allocation4 + $0x4], 16 }
 0x259   :  { %6065 = vsyncadd [#allocation4 + $0x4], 4294967280 }
 0x25a   :  { %6066 = dma.done.wait [#allocation4 + $0x5], 16 }
 0x25b   :  { %6067 = vsyncadd [#allocation4 + $0x5], 4294967280 }
 0x25c   :  { %6068 = dma.done.wait [#allocation4 + $0x6], 16 }
 0x25d   :  { %6069 = vsyncadd [#allocation4 + $0x6], 4294967280 }
 0x25e   :  { %6070 = dma.done.wait [#allocation4 + $0x7], 16 }
 0x25f   :  { %6071 = vsyncadd [#allocation4 + $0x7], 4294967280 }
 0x260   :  { %6072 = dma.done.wait [#allocation4 + $0x8], 16 }
 0x261   :  { %6073 = vsyncadd [#allocation4 + $0x8], 4294967280 }
 0x262   :  { %6074 = dma.done.wait [#allocation4 + $0x9], 16 }
 0x263   :  { %6075 = vsyncadd [#allocation4 + $0x9], 4294967280 }
 0x264   :  { %6076 = dma.done.wait [#allocation4 + $0xa], 16 }
 0x265   :  { %6077 = vsyncadd [#allocation4 + $0xa], 4294967280 }
 0x266   :  { %6078 = dma.done.wait [#allocation4 + $0xb], 16 }
 0x267   :  { %6079 = vsyncadd [#allocation4 + $0xb], 4294967280 }
 0x268   :  { %6080 = dma.done.wait [#allocation4 + $0xc], 16 }
 0x269   :  { %6081 = vsyncadd [#allocation4 + $0xc], 4294967280 }
 0x26a   :  { %6082 = dma.done.wait [#allocation4 + $0xd], 16 }
 0x26b   :  { %6083 = vsyncadd [#allocation4 + $0xd], 4294967280 }
 0x26c   :  { %6084 = dma.done.wait [#allocation4 + $0xe], 16 }
 0x26d   :  { %6085 = vsyncadd [#allocation4 + $0xe], 4294967280 }
 0x26e   :  { %6086 = dma.done.wait [#allocation4 + $0xf], 16 }
 0x26f   :  { %6087 = vsyncadd [#allocation4 + $0xf], 4294967280 }
 0x270   :  { %6088 = dma.done.wait [#allocation4 + $0x10], 16 }
 0x271   :  { %6089 = vsyncadd [#allocation4 + $0x10], 4294967280 }
 0x272   :  { %6090 = dma.done.wait [#allocation4 + $0x11], 16 }
 0x273   :  { %6091 = vsyncadd [#allocation4 + $0x11], 4294967280 }
 0x274   :  { %6092 = dma.done.wait [#allocation4 + $0x12], 16 }
 0x275   :  { %6093 = vsyncadd [#allocation4 + $0x12], 4294967280 }
 0x276   :  { %6094 = dma.done.wait [#allocation4 + $0x13], 16 }
 0x277   :  { %6095 = vsyncadd [#allocation4 + $0x13], 4294967280 }
 0x278   :  { %6096 = dma.done.wait [#allocation4 + $0x14], 16 }
 0x279   :  { %6097 = vsyncadd [#allocation4 + $0x14], 4294967280 }
 0x27a   :  { %6098 = dma.done.wait [#allocation4 + $0x15], 16 }
 0x27b   :  { %6099 = vsyncadd [#allocation4 + $0x15], 4294967280 }
 0x27c   :  { %6100 = dma.done.wait [#allocation4 + $0x16], 16 }
 0x27d   :  { %6101 = vsyncadd [#allocation4 + $0x16], 4294967280 }
 0x27e   :  { %6102 = dma.done.wait [#allocation4 + $0x17], 16 }
 0x27f   :  { %6103 = vsyncadd [#allocation4 + $0x17], 4294967280 }
 0x280   :  { %6104 = dma.done.wait [#allocation4 + $0x18], 16 }
 0x281   :  { %6105 = vsyncadd [#allocation4 + $0x18], 4294967280 }
 0x282   :  { %6106 = dma.done.wait [#allocation4 + $0x19], 16 }
 0x283   :  { %6107 = vsyncadd [#allocation4 + $0x19], 4294967280 }
 0x284   :  { %6108 = dma.done.wait [#allocation4 + $0x1a], 16 }
 0x285   :  { %6109 = vsyncadd [#allocation4 + $0x1a], 4294967280 }
 0x286   :  { %6110 = dma.done.wait [#allocation4 + $0x1b], 16 }
 0x287   :  { %6111 = vsyncadd [#allocation4 + $0x1b], 4294967280 }
 0x288   :  { %6112 = dma.done.wait [#allocation4 + $0x1c], 16 }
 0x289   :  { %6113 = vsyncadd [#allocation4 + $0x1c], 4294967280 }
 0x28a   :  { %6114 = dma.done.wait [#allocation4 + $0x1d], 16 }
 0x28b   :  { %6115 = vsyncadd [#allocation4 + $0x1d], 4294967280 }
 0x28c   :  { %6116 = dma.done.wait [#allocation4 + $0x1e], 16 }
 0x28d   :  { %6117 = vsyncadd [#allocation4 + $0x1e], 4294967280 }
 0x28e   :  { %6118 = dma.done.wait [#allocation4 + $0x1f], 16 }
 0x28f   :  { %6119 = vsyncadd [#allocation4 + $0x1f], 4294967280 }
 0x290   :  { %6120 = dma.done.wait [#allocation4 + $0x20], 16 }
 0x291   :  { %6121 = vsyncadd [#allocation4 + $0x20], 4294967280 }
 0x292   :  { %6122 = dma.done.wait [#allocation4 + $0x21], 16 }
 0x293   :  { %6123 = vsyncadd [#allocation4 + $0x21], 4294967280 }
 0x294   :  { %6124 = dma.done.wait [#allocation4 + $0x22], 16 }
 0x295   :  { %6125 = vsyncadd [#allocation4 + $0x22], 4294967280 }
 0x296   :  { %6126 = dma.done.wait [#allocation4 + $0x23], 16 }
 0x297   :  { %6127 = vsyncadd [#allocation4 + $0x23], 4294967280 }
 0x298   :  { %6128 = dma.done.wait [#allocation4 + $0x24], 16 }
 0x299   :  { %6129 = vsyncadd [#allocation4 + $0x24], 4294967280 }
 0x29a   :  { %6130 = dma.done.wait [#allocation4 + $0x25], 16 }
 0x29b   :  { %6131 = vsyncadd [#allocation4 + $0x25], 4294967280 }
 0x29c   :  { %6132 = dma.done.wait [#allocation4 + $0x26], 16 }
 0x29d   :  { %6133 = vsyncadd [#allocation4 + $0x26], 4294967280 }
 0x29e   :  { %6134 = dma.done.wait [#allocation4 + $0x27], 16 }
 0x29f   :  { %6135 = vsyncadd [#allocation4 + $0x27], 4294967280 }
 0x2a0   :  { %6136 = dma.done.wait [#allocation4 + $0x28], 16 }
 0x2a1   :  { %6137 = vsyncadd [#allocation4 + $0x28], 4294967280 }
 0x2a2   :  { %6138 = dma.done.wait [#allocation4 + $0x29], 16 }
 0x2a3   :  { %6139 = vsyncadd [#allocation4 + $0x29], 4294967280 }
 0x2a4   :  { %6140 = dma.done.wait [#allocation4 + $0x2a], 16 }
 0x2a5   :  { %6141 = vsyncadd [#allocation4 + $0x2a], 4294967280 }
 0x2a6   :  { %6142 = dma.done.wait [#allocation4 + $0x2b], 16 }
 0x2a7   :  { %6143 = vsyncadd [#allocation4 + $0x2b], 4294967280 }
 0x2a8   :  { %6144 = dma.done.wait [#allocation4 + $0x2c], 16 }
 0x2a9   :  { %6145 = vsyncadd [#allocation4 + $0x2c], 4294967280 }
 0x2aa   :  { %6146 = dma.done.wait [#allocation4 + $0x2d], 16 }
 0x2ab   :  { %6147 = vsyncadd [#allocation4 + $0x2d], 4294967280 }
 0x2ac   :  { %6148 = dma.done.wait [#allocation4 + $0x2e], 16 }
 0x2ad   :  { %6149 = vsyncadd [#allocation4 + $0x2e], 4294967280 }
 0x2ae   :  { %6150 = dma.done.wait [#allocation4 + $0x2f], 16 }
 0x2af   :  { %6151 = vsyncadd [#allocation4 + $0x2f], 4294967280 }
 0x2b0   :  { %6152 = dma.done.wait [#allocation4 + $0x30], 16 }
 0x2b1   :  { %6153 = vsyncadd [#allocation4 + $0x30], 4294967280 }
 0x2b2   :  { %6154 = dma.done.wait [#allocation4 + $0x31], 16 }
 0x2b3   :  { %6155 = vsyncadd [#allocation4 + $0x31], 4294967280 }
 0x2b4   :  { %6156 = dma.done.wait [#allocation4 + $0x32], 16 }
 0x2b5   :  { %6157 = vsyncadd [#allocation4 + $0x32], 4294967280 }
 0x2b6   :  { %6158 = dma.done.wait [#allocation4 + $0x33], 16 }
 0x2b7   :  { %6159 = vsyncadd [#allocation4 + $0x33], 4294967280 }
 0x2b8   :  { %6160 = dma.done.wait [#allocation4 + $0x34], 16 }
 0x2b9   :  { %6161 = vsyncadd [#allocation4 + $0x34], 4294967280 }
 0x2ba   :  { %6162 = dma.done.wait [#allocation4 + $0x35], 16 }
 0x2bb   :  { %6163 = vsyncadd [#allocation4 + $0x35], 4294967280 }
 0x2bc   :  { %6164 = dma.done.wait [#allocation4 + $0x36], 16 }
 0x2bd   :  { %6165 = vsyncadd [#allocation4 + $0x36], 4294967280 }
 0x2be   :  { %6166 = dma.done.wait [#allocation4 + $0x37], 16 }
 0x2bf   :  { %6167 = vsyncadd [#allocation4 + $0x37], 4294967280 }
 0x2c0   :  { %6168 = dma.done.wait [#allocation4 + $0x38], 16 }
 0x2c1   :  { %6169 = vsyncadd [#allocation4 + $0x38], 4294967280 }
 0x2c2   :  { %6170 = dma.done.wait [#allocation4 + $0x39], 16 }
 0x2c3   :  { %6171 = vsyncadd [#allocation4 + $0x39], 4294967280 }
 0x2c4   :  { %6172 = dma.done.wait [#allocation4 + $0x3a], 16 }
 0x2c5   :  { %6173 = vsyncadd [#allocation4 + $0x3a], 4294967280 }
 0x2c6   :  { %6174 = dma.done.wait [#allocation4 + $0x3b], 16 }
 0x2c7   :  { %6175 = vsyncadd [#allocation4 + $0x3b], 4294967280 }
 0x2c8   :  { %6176 = dma.done.wait [#allocation4 + $0x3c], 16 }
 0x2c9   :  { %6177 = vsyncadd [#allocation4 + $0x3c], 4294967280 }
 0x2ca   :  { %6178 = dma.done.wait [#allocation4 + $0x3d], 16 }
 0x2cb   :  { %6179 = vsyncadd [#allocation4 + $0x3d], 4294967280 }
 0x2cc   :  { %6180 = dma.done.wait [#allocation4 + $0x3e], 16 }
 0x2cd   :  { %6181 = vsyncadd [#allocation4 + $0x3e], 4294967280 }
 0x2ce   :  { %6182 = dma.done.wait [#allocation4 + $0x3f], 16 }
 0x2cf   :  { %6183 = vsyncadd [#allocation4 + $0x3f], 4294967280  ;;  %v6187_v0 = vmov 0.0|0.0   ;;  %vm6188_vm0 = vmmov 0   ;;  %v6189_v1 = vmov 0.0   ;;  %v3312_v2 = vld [vmem:[%s6637_s3] sm:$0xff] }
 0x2d0   :  { %5897 = vmatprep.subr.bf16.mxu1 %v6187_v0  ;;  %5809 = vmatprep.mubr.msk.f32.mxu1 %vm6188_vm0, %v6189_v1  ;;  %v3313_v3 = vld [vmem:[%s6637_s3 + $0x8] sm:$0xff]  ;;  %v3461_v4 = vld [vmem:[%s6638_s4] sm:$0xff]  ;;  %vm3323_vm1 = vcmask 261120   ;;  %v3314_v7 = vld [vmem:[%s6637_s3 + $0x10] sm:$0xff]  ;;  %s6190_s27 = smov 64   ;;  %s6193_s9 = smov 96  }
 0x2d1   :  { %v5889_v5 = vpack.c.bf16 %v3313_v3, %v3312_v2  ;;  %v3462_v6 = vld [vmem:[%s6638_s4 + $0x8] sm:$0xff]  ;;  %v3315_v8 = vld [vmem:[%s6637_s3 + $0x18] sm:$0xff]  ;;  %v3304_v11 = vld [vmem:[#allocation2] sm:$0xff]  ;;  %s6194_s11 = smov [#allocation8]  }
 0x2d2   :  { %v6456_v9 = vpack.c.bf16 %v3462_v6, %v3461_v4  ;;  %v5893_v10 = vpack.c.bf16 %v3315_v8, %v3314_v7  ;;  %v3463_v12 = vld [vmem:[%s6638_s4 + $0x10] sm:$0xff]  ;;  %v3464_v13 = vld [vmem:[%s6638_s4 + $0x18] sm:$0xff]  ;;  %5789 = vmatprep.mubr.msk.f32.mxu0 %vm3323_vm1, %v3304_v11  ;;  %v3305_v15 = vld [vmem:[#allocation2 + $0x8] sm:$0xff]  ;;  %s4355_s12 = sshll.u32 %s6194_s11, 4  ;;  %s4356_s12 = int_to_ptr.vmem [resolvable:$true] %s4355_s12 }
 0x2d3   :  { %5890 = vmatprep.subr.bf16.mxu0 %v5889_v5  ;;  %v6466_v14 = vpack.c.bf16 %v3464_v13, %v3463_v12  ;;  %v6487_v16 = vld [vmem:[%s6639_s5] ss:$0 sm:$0xff]  ;;  %s6191_s5 = smov 32   ;;  %v3306_v51 = vld [vmem:[#allocation2 + $0x10] sm:$0xff]  ;;  %v3307_v52 = vld [vmem:[#allocation2 + $0x18] sm:$0xff]  ;;  %s6032_s2 = scalar_lea.vmem %s4356_s12, 128 }
 0x2d4   :  { %5892 = vmatpush3.bf16.msra.mxu0 %v5889_v5  ;;  %5899 = vmatpush3.bf16.msra.mxu1 %v6456_v9  ;;  %v3308_v53 = vld [vmem:[#allocation2 + $0x20] sm:$0xff]  ;;  %v3309_v54 = vld [vmem:[#allocation2 + $0x28] sm:$0xff]  ;;  %v3310_v55 = vld [vmem:[#allocation2 + $0x30] sm:$0xff]  ;;  %p6033_p5 = scmp.ne.s32.totalorder %s4356_s12, %s6032_s2  ;;  %p6037_p6 = scmp.lt.s32.totalorder %s4356_s12, %s4356_s12 }
 0x2d5   :  { %5894 = vmatprep.subr.bf16.mxu0 %v5893_v10  ;;  %5900 = vmatprep.subr.bf16.mxu1 %v6187_v0  ;;  %v3311_v56 = vld [vmem:[#allocation2 + $0x38] sm:$0xff]  ;;  %p6038_p7 = scmp.lt.s32.totalorder %s6032_s2, %s6032_s2 }
 0x2d7   :  { %p6039_p8 = por %p6038_p7, %p6037_p6 }
 0x2d8   :  { %5896 = vmatpush3.bf16.msra.mxu0 %v5893_v10  ;;  %5902 = vmatpush3.bf16.msra.mxu1 %v6466_v14 }
 0x2d9   :  { %5903 = vmatprep.subr.bf16.mxu1 %v6187_v0  ;;  %5909 = vmatprep.subr.bf16.mxu0 %v6187_v0  ;;  %p6040_p9 = pnand %p6039_p8, %p6033_p5 }
 0x2db   :  { %5790 = vmatmul.mubr.msk.f32.vlgmr.msra.gmra.mrb[0].mxu0 %vm3323_vm1, %v3305_v15  ;;  %5810 = vmatmul.mubr.f32.vlgmr.msra.gmra.mrb[0].mxu1 %v6189_v1 }
 0x2dc   :  { %5905 = vmatpush3.bf16.msra.mxu1 %v6456_v9  ;;  %5820 = vmatprep.mubr.msk.f32.mxu1 %vm6188_vm0, %v6189_v1 }
 0x2dd   :  { %5906 = vmatprep.subr.bf16.mxu1 %v6187_v0  ;;  %5911 = vmatpush3.bf16.msra.mxu0 %v6456_v9 }
 0x2de   :  { %5912 = vmatprep.subr.bf16.mxu0 %v6187_v0  ;;  %5792 = vmatprep.mubr.msk.f32.mxu0 %vm3323_vm1, %v3306_v51 }
 0x2df   :  { %5793 = vmatmul.mubr.msk.f32.gmra.mrb[2].mxu0 %vm3323_vm1, %v3307_v52 }
 0x2e0   :  { %5908 = vmatpush3.bf16.msra.mxu1 %v6466_v14  ;;  %5795 = vmatprep.mubr.msk.f32.mxu0 %vm3323_vm1, %v3308_v53 }
 0x2e1   :  { %5914 = vmatpush3.bf16.msra.mxu0 %v6466_v14  ;;  %5915 = vmatprep.subr.bf16.mxu1 %v6187_v0 }
 0x2e2   :  { %5921 = vmatprep.subr.bf16.mxu0 %v6187_v0 }
 0x2e3   :  { %5796 = vmatmul.mubr.msk.f32.gmra.mrb[4].mxu0 %vm3323_vm1, %v3309_v54 }
 0x2e4   :  { %5798 = vmatprep.mubr.msk.f32.mxu0 %vm3323_vm1, %v3310_v55 }
 0x2e7   :  { %5799 = vmatmul.mubr.msk.f32.gmra.mrb[6].mxu0 %vm3323_vm1, %v3311_v56 }
 0x2e8   :  { %5831 = vmatprep.mubr.msk.f32.mxu0 %vm6188_vm0, %v6189_v1 }
 0x3ae   :  { %v5791_v17 = vpop.f32.mrb[0].mxu0  ;;  %v3536_v18 = vpop.f32.mrb[0].mxu1 }
 0x3af   :  { %v3414_v19 = vpop.f32.mrb[1].mxu0  ;;  %v5811_v20 = vpop.f32.mrb[1].mxu1  ;;  %v3420_v37 = vadd.f32 %v5791_v17, %v6487_v16 }
 0x3b0   :  { %v3415_v21 = vadd.f32 %v6487_v16, %v3414_v19 }
 0x3b2   :  { %v3540_v22 = vadd.f32 %v3536_v18, %v3415_v21  ;;  %v5794_v60 = vpop.f32.mrb[2].mxu0 }
 0x3b3   :  { %v3424_v61 = vpop.f32.mrb[3].mxu0 }
 0x3b4   :  { %5956 = vtanh.f32 %v3540_v22  ;;  %v5649_v24 = vmul.f32 -1.442695, %v3540_v22  ;;  %v3425_v5 = vadd.f32 %v6487_v16, %v3424_v61 }
 0x3b6   :  { %5958 = vpow2.f32 %v5649_v24  ;;  %v6520_v62 = vpop.f32.mrb[4].mxu0 }
 0x3b7   :  { %v6522_v63 = vpop.f32.mrb[5].mxu0 }
 0x3ba   :  { %v6524_v2 = vpop.f32.mrb[6].mxu0 }
 0x3bb   :  { %v6526_v3 = vpop.f32.mrb[7].mxu0 }
 0x3be   :  { %v5957_v23 = vpop.eup %5956 }
 0x3bf   :  { %3550 = vrot.lane.b32.xlu0 %v5957_v23, %s6190_s27 }
 0x3c0   :  { %v5959_v25 = vpop.eup %5958 }
 0x3c1   :  { %v3544_v26 = vadd.f32 1.0, %v5959_v25 }
 0x3c3   :  { %5960 = vrcp.f32 %v3544_v26  ;;  %v3430_v26 = vadd.f32 %v5794_v60, %v6487_v16 }
 0x3cd   :  { %v5961_v27 = vpop.eup %5960 }
 0x3ce   :  { %v3548_v30 = vmul.f32 0.0, %v5961_v27 }
 0x431   :  { %v3551_v28 = vpop.permute.xlu0 %3550 }
 0x432   :  { %v3553_v29 = vmul.f32 %v5961_v27, %v3551_v28 }
 0x434   :  { %3555 = vrot.lane.b32.xlu0 %v3553_v29, %s6191_s5 }
 0x4a6   :  { %v3556_v31 = vpop.permute.xlu0 %3555 }
 0x4a7   :  { %v3558_v32 = vadd.f32 %v3556_v31, %v3548_v30 }
 0x4a9   :  { %5962 = vtanh.f32 %v3558_v32 }
 0x4b3   :  { %v5963_v33 = vpop.eup %5962 }
 0x4b4   :  { %3561 = vrot.lane.b32.xlu1 %v5963_v33, %s6190_s27 }
 0x526   :  { %v3562_v34 = vpop.permute.xlu1 %3561 }
 0x527   :  { %v6493_v35 = vmul.f32 %v5961_v27, %v3562_v34 }
 0x529   :  { %3574 = vrot.lane.b32.xlu1 %v6493_v35, %s6191_s5 }
 0x59b   :  { %v3575_v36 = vpop.permute.xlu1 %3574 }
 0x59c   :  { %5821 = vmatmul.mubr.msk.f32.vlgmr.msra.gmra.mrb[2].mxu1 %vm3323_vm1, %v3575_v36 }
 0x59d   :  { %5917 = vmatpush3.bf16.msra.mxu1 %v6456_v9  ;;  %5842 = vmatprep.mubr.msk.f32.mxu1 %vm6188_vm0, %v6189_v1 }
 0x59e   :  { %5918 = vmatprep.subr.bf16.mxu1 %v6187_v0 }
 0x5a1   :  { %5920 = vmatpush3.bf16.msra.mxu1 %v6466_v14 }
 0x5a2   :  { %5927 = vmatprep.subr.bf16.mxu1 %v6187_v0 }
 0x66f   :  { %v3644_v38 = vpop.f32.mrb[2].mxu1 }
 0x670   :  { %v3648_v39 = vadd.f32 %v3644_v38, %v3420_v37  ;;  %v5822_v40 = vpop.f32.mrb[3].mxu1 }
 0x672   :  { %5964 = vtanh.f32 %v3648_v39  ;;  %v5651_v42 = vmul.f32 -1.442695, %v3648_v39 }
 0x674   :  { %5966 = vpow2.f32 %v5651_v42 }
 0x67c   :  { %v5965_v41 = vpop.eup %5964 }
 0x67d   :  { %3658 = vrot.lane.b32.xlu0 %v5965_v41, %s6190_s27 }
 0x67e   :  { %v5967_v43 = vpop.eup %5966 }
 0x67f   :  { %v3652_v44 = vadd.f32 1.0, %v5967_v43 }
 0x681   :  { %5968 = vrcp.f32 %v3652_v44 }
 0x68b   :  { %v5969_v45 = vpop.eup %5968 }
 0x68c   :  { %v3656_v48 = vmul.f32 %v5969_v45, %v3558_v32 }
 0x6ef   :  { %v3659_v46 = vpop.permute.xlu0 %3658 }
 0x6f0   :  { %v3661_v47 = vmul.f32 %v5969_v45, %v3659_v46 }
 0x6f2   :  { %3663 = vrot.lane.b32.xlu1 %v3661_v47, %s6191_s5 }
 0x764   :  { %v3664_v49 = vpop.permute.xlu1 %3663 }
 0x765   :  { %v3666_v50 = vadd.f32 %v3664_v49, %v3656_v48 }
 0x767   :  { %5970 = vtanh.f32 %v3666_v50 }
 0x771   :  { %v5971_v57 = vpop.eup %5970 }
 0x772   :  { %3669 = vrot.lane.b32.xlu0 %v5971_v57, %s6190_s27 }
 0x7e4   :  { %v3670_v58 = vpop.permute.xlu0 %3669 }
 0x7e5   :  { %v6516_v59 = vmul.f32 %v5969_v45, %v3670_v58  ;;  %v3435_v45 = vadd.f32 %v6487_v16, %v6522_v63 }
 0x7e7   :  { %3682 = vrot.lane.b32.xlu1 %v6516_v59, %s6191_s5 }
 0x859   :  { %v3683_v4 = vpop.permute.xlu1 %3682 }
 0x85a   :  { %5832 = vmatmul.mubr.msk.f32.vlgmr.msra.gmra.mrb[8].mxu0 %vm3323_vm1, %v3683_v4 }
 0x85b   :  { %5923 = vmatpush3.bf16.msra.mxu0 %v6456_v9  ;;  %5853 = vmatprep.mubr.msk.f32.mxu0 %vm6188_vm0, %v6189_v1 }
 0x85c   :  { %5924 = vmatprep.subr.bf16.mxu0 %v6187_v0 }
 0x85f   :  { %5926 = vmatpush3.bf16.msra.mxu0 %v6466_v14 }
 0x860   :  { %5933 = vmatprep.subr.bf16.mxu0 %v6187_v0 }
 0x92d   :  { %v3752_v6 = vpop.f32.mrb[8].mxu0 }
 0x92e   :  { %v3756_v7 = vadd.f32 %v3752_v6, %v3425_v5  ;;  %v5833_v8 = vpop.f32.mrb[9].mxu0  ;;  %v3440_v5 = vadd.f32 %v6520_v62, %v6487_v16 }
 0x930   :  { %5972 = vtanh.f32 %v3756_v7  ;;  %v5653_v11 = vmul.f32 -1.442695, %v3756_v7 }
 0x932   :  { %5974 = vpow2.f32 %v5653_v11 }
 0x93a   :  { %v5973_v10 = vpop.eup %5972 }
 0x93b   :  { %3766 = vrot.lane.b32.xlu0 %v5973_v10, %s6190_s27 }
 0x93c   :  { %v5975_v12 = vpop.eup %5974 }
 0x93d   :  { %v3760_v13 = vadd.f32 1.0, %v5975_v12 }
 0x93f   :  { %5976 = vrcp.f32 %v3760_v13 }
 0x949   :  { %v5977_v15 = vpop.eup %5976 }
 0x94a   :  { %v3764_v19 = vmul.f32 %v5977_v15, %v3666_v50 }
 0x9ad   :  { %v3767_v17 = vpop.permute.xlu0 %3766 }
 0x9ae   :  { %v3769_v18 = vmul.f32 %v5977_v15, %v3767_v17 }
 0x9b0   :  { %3771 = vrot.lane.b32.xlu1 %v3769_v18, %s6191_s5 }
 0xa22   :  { %v3772_v20 = vpop.permute.xlu1 %3771 }
 0xa23   :  { %v3774_v21 = vadd.f32 %v3772_v20, %v3764_v19 }
 0xa25   :  { %5978 = vtanh.f32 %v3774_v21 }
 0xa2f   :  { %v5979_v22 = vpop.eup %5978 }
 0xa30   :  { %3777 = vrot.lane.b32.xlu0 %v5979_v22, %s6190_s27 }
 0xaa2   :  { %v3778_v23 = vpop.permute.xlu0 %3777 }
 0xaa3   :  { %v6539_v24 = vmul.f32 %v5977_v15, %v3778_v23 }
 0xaa5   :  { %3790 = vrot.lane.b32.xlu1 %v6539_v24, %s6191_s5 }
 0xb17   :  { %v3791_v25 = vpop.permute.xlu1 %3790 }
 0xb18   :  { %5843 = vmatmul.mubr.msk.f32.vlgmr.msra.gmra.mrb[4].mxu1 %vm3323_vm1, %v3791_v25 }
 0xb19   :  { %5929 = vmatpush3.bf16.msra.mxu1 %v6456_v9  ;;  %5864 = vmatprep.mubr.msk.f32.mxu1 %vm6188_vm0, %v6189_v1 }
 0xb1a   :  { %5930 = vmatprep.subr.bf16.mxu1 %v6187_v0 }
 0xb1d   :  { %5932 = vmatpush3.bf16.msra.mxu1 %v6466_v14 }
 0xb1e   :  { %5939 = vmatprep.subr.bf16.mxu1 %v6187_v0 }
 0xbeb   :  { %v3860_v27 = vpop.f32.mrb[4].mxu1 }
 0xbec   :  { %v3864_v28 = vadd.f32 %v3860_v27, %v3430_v26  ;;  %v5844_v29 = vpop.f32.mrb[5].mxu1 }
 0xbee   :  { %5980 = vtanh.f32 %v3864_v28  ;;  %v5655_v31 = vmul.f32 -1.442695, %v3864_v28 }
 0xbf0   :  { %5982 = vpow2.f32 %v5655_v31 }
 0xbf8   :  { %v5981_v30 = vpop.eup %5980 }
 0xbf9   :  { %3874 = vrot.lane.b32.xlu0 %v5981_v30, %s6190_s27 }
 0xbfa   :  { %v5983_v32 = vpop.eup %5982 }
 0xbfb   :  { %v3868_v33 = vadd.f32 1.0, %v5983_v32 }
 0xbfd   :  { %5984 = vrcp.f32 %v3868_v33 }
 0xc07   :  { %v5985_v34 = vpop.eup %5984 }
 0xc08   :  { %v3872_v38 = vmul.f32 %v5985_v34, %v3774_v21  ;;  %v3445_v21 = vadd.f32 %v6487_v16, %v6526_v3 }
 0xc6b   :  { %v3875_v36 = vpop.permute.xlu0 %3874 }
 0xc6c   :  { %v3877_v37 = vmul.f32 %v5985_v34, %v3875_v36 }
 0xc6e   :  { %3879 = vrot.lane.b32.xlu1 %v3877_v37, %s6191_s5 }
 0xce0   :  { %v3880_v39 = vpop.permute.xlu1 %3879 }
 0xce1   :  { %v3882_v40 = vadd.f32 %v3880_v39, %v3872_v38 }
 0xce3   :  { %5986 = vtanh.f32 %v3882_v40 }
 0xced   :  { %v5987_v41 = vpop.eup %5986 }
 0xcee   :  { %3885 = vrot.lane.b32.xlu0 %v5987_v41, %s6190_s27  ;;  %v3450_v41 = vadd.f32 %v6524_v2, %v6487_v16 }
 0xd60   :  { %v3886_v42 = vpop.permute.xlu0 %3885 }
 0xd61   :  { %v6554_v43 = vmul.f32 %v5985_v34, %v3886_v42 }
 0xd63   :  { %3898 = vrot.lane.b32.xlu1 %v6554_v43, %s6191_s5 }
 0xdd5   :  { %v3899_v44 = vpop.permute.xlu1 %3898 }
 0xdd6   :  { %5854 = vmatmul.mubr.msk.f32.vlgmr.msra.gmra.mrb[10].mxu0 %vm3323_vm1, %v3899_v44 }
 0xdd7   :  { %5935 = vmatpush3.bf16.msra.mxu0 %v6456_v9  ;;  %5875 = vmatprep.mubr.msk.f32.mxu0 %vm6188_vm0, %v6189_v1 }
 0xdd8   :  { %5936 = vmatprep.subr.bf16.mxu0 %v6187_v0 }
 0xddb   :  { %5938 = vmatpush3.bf16.msra.mxu0 %v6466_v14 }
 0xea9   :  { %v3968_v46 = vpop.f32.mrb[10].mxu0 }
 0xeaa   :  { %v3972_v47 = vadd.f32 %v3968_v46, %v3435_v45  ;;  %v5855_v48 = vpop.f32.mrb[11].mxu0  ;;  %v3465_v46 = vld [vmem:[%s6635_s1] sm:$0xff] }
 0xeab   :  { %vm3565_vm2 = vcmp.eq.s32.totalorder %v3465_v46, 1  ;;  %vm3889_vm3 = vcmp.eq.s32.totalorder %v3465_v46, 4  ;;  %vm4105_vm4 = vcmp.eq.s32.totalorder %v3465_v46, 6  ;;  %vm4321_vm5 = vcmp.eq.s32.totalorder %v3465_v46, 8 }
 0xeac   :  { %5988 = vtanh.f32 %v3972_v47  ;;  %v5657_v50 = vmul.f32 -1.442695, %v3972_v47  ;;  %vm3673_vm6 = vcmp.eq.s32.totalorder %v3465_v46, 2  ;;  %vm3781_vm7 = vcmp.eq.s32.totalorder %v3465_v46, 3 }
 0xead   :  { %vm3997_vm8 = vcmp.eq.s32.totalorder %v3465_v46, 5  ;;  %vm4213_vm9 = vcmp.eq.s32.totalorder %v3465_v46, 7 }
 0xeae   :  { %5990 = vpow2.f32 %v5657_v50 }
 0xeb6   :  { %v5989_v49 = vpop.eup %5988 }
 0xeb7   :  { %3982 = vrot.lane.b32.xlu0 %v5989_v49, %s6190_s27 }
 0xeb8   :  { %v5991_v51 = vpop.eup %5990 }
 0xeb9   :  { %v3976_v52 = vadd.f32 1.0, %v5991_v51 }
 0xebb   :  { %5992 = vrcp.f32 %v3976_v52 }
 0xec5   :  { %v5993_v53 = vpop.eup %5992 }
 0xec6   :  { %v3980_v56 = vmul.f32 %v5993_v53, %v3882_v40  ;;  %v6192_v40 = vmov 0  }
 0xec7   :  { %5954 = vset.pattern.permute.xlu0 %v6192_v40  ;;  %5955 = vset.pattern.permute.xlu1 %v6192_v40  ;;  %v3566_v48 = vsel %vm3565_vm2, 1, %v6192_v40  ;;  %v3890_v49 = vsel %vm3889_vm3, 1, %v6192_v40  ;;  %v4106_v50 = vsel %vm4105_vm4, 1, %v6192_v40  ;;  %v4322_v16 = vsel %vm4321_vm5, 1, %v6192_v40 }
 0xf29   :  { %v3983_v54 = vpop.permute.xlu0 %3982 }
 0xf2a   :  { %v3985_v55 = vmul.f32 %v5993_v53, %v3983_v54 }
 0xf2c   :  { %3987 = vrot.lane.b32.xlu1 %v3985_v55, %s6191_s5 }
 0xf9e   :  { %v3988_v57 = vpop.permute.xlu1 %3987 }
 0xf9f   :  { %v3990_v58 = vadd.f32 %v3988_v57, %v3980_v56  ;;  %v5664_v56 = vld [vmem:[%s6640_s6] ss:$0 sm:$0xff]  ;;  %v3674_v57 = vsel %vm3673_vm6, 1, %v6192_v40 }
 0xfa1   :  { %5994 = vtanh.f32 %v3990_v58 }
 0xfab   :  { %v5995_v60 = vpop.eup %5994 }
 0xfac   :  { %3993 = vrot.lane.b32.xlu0 %v5995_v60, %s6190_s27  ;;  %v3998_v60 = vsel %vm3997_vm8, 1, %v6192_v40 }
0x101e   :  { %v3994_v61 = vpop.permute.xlu0 %3993 }
0x101f   :  { %v6569_v63 = vmul.f32 %v5993_v53, %v3994_v61  ;;  %v4214_v61 = vsel %vm4213_vm9, 1, %v6192_v40 }
0x1021   :  { %4006 = vrot.lane.b32.xlu1 %v6569_v63, %s6191_s5 }
0x1093   :  { %v4007_v4 = vpop.permute.xlu1 %4006 }
0x1094   :  { %5865 = vmatmul.mubr.msk.f32.vlgmr.msra.gmra.mrb[6].mxu1 %vm3323_vm1, %v4007_v4 }
0x1095   :  { %5941 = vmatpush3.bf16.msra.mxu1 %v6456_v9  ;;  %5886 = vmatprep.mubr.msk.f32.mxu1 %vm6188_vm0, %v6189_v1 }
0x1096   :  { %5942 = vmatprep.subr.bf16.mxu1 %v6187_v0 }
0x1099   :  { %5944 = vmatpush3.bf16.msra.mxu1 %v6466_v14 }
0x1167   :  { %v4076_v6 = vpop.f32.mrb[6].mxu1 }
0x1168   :  { %v4080_v7 = vadd.f32 %v4076_v6, %v3440_v5  ;;  %v5866_v8 = vpop.f32.mrb[7].mxu1 }
0x116a   :  { %5996 = vtanh.f32 %v4080_v7  ;;  %v5659_v11 = vmul.f32 -1.442695, %v4080_v7 }
0x116c   :  { %5998 = vpow2.f32 %v5659_v11 }
0x1174   :  { %v5997_v10 = vpop.eup %5996 }
0x1175   :  { %4090 = vrot.lane.b32.xlu0 %v5997_v10, %s6190_s27 }
0x1176   :  { %v5999_v9 = vpop.eup %5998 }
0x1177   :  { %v4084_v12 = vadd.f32 1.0, %v5999_v9 }
0x1179   :  { %6000 = vrcp.f32 %v4084_v12 }
0x1183   :  { %v6001_v1 = vpop.eup %6000 }
0x1184   :  { %v4088_v14 = vmul.f32 %v6001_v1, %v3990_v58  ;;  %v3782_v58 = vsel %vm3781_vm7, 1, %v6192_v40 }
0x11e7   :  { %v4091_v13 = vpop.permute.xlu0 %4090 }
0x11e8   :  { %v4093_v0 = vmul.f32 %v6001_v1, %v4091_v13 }
0x11ea   :  { %4095 = vrot.lane.b32.xlu1 %v4093_v0, %s6191_s5 }
0x125c   :  { %v4096_v15 = vpop.permute.xlu1 %4095 }
0x125d   :  { %v4098_v62 = vadd.f32 %v4096_v15, %v4088_v14 }
0x125f   :  { %6002 = vtanh.f32 %v4098_v62 }
0x1269   :  { %v6003_v17 = vpop.eup %6002 }
0x126a   :  { %4101 = vrot.lane.b32.xlu0 %v6003_v17, %s6190_s27 }
0x12dc   :  { %v4102_v18 = vpop.permute.xlu0 %4101 }
0x12dd   :  { %v6584_v19 = vmul.f32 %v6001_v1, %v4102_v18 }
0x12df   :  { %4114 = vrot.lane.b32.xlu1 %v6584_v19, %s6191_s5 }
0x1351   :  { %v4115_v20 = vpop.permute.xlu1 %4114 }
0x1352   :  { %5876 = vmatmul.mubr.msk.f32.vlgmr.msra.gmra.mrb[12].mxu0 %vm3323_vm1, %v4115_v20 }
0x1425   :  { %v4184_v22 = vpop.f32.mrb[12].mxu0 }
0x1426   :  { %v4188_v23 = vadd.f32 %v4184_v22, %v3445_v21  ;;  %v5877_v25 = vpop.f32.mrb[13].mxu0 }
0x1428   :  { %6004 = vtanh.f32 %v4188_v23  ;;  %v5661_v27 = vmul.f32 -1.442695, %v4188_v23 }
0x142a   :  { %6006 = vpow2.f32 %v5661_v27 }
0x1432   :  { %v6005_v26 = vpop.eup %6004 }
0x1433   :  { %4198 = vrot.lane.b32.xlu0 %v6005_v26, %s6190_s27 }
0x1434   :  { %v6007_v28 = vpop.eup %6006 }
0x1435   :  { %v4192_v29 = vadd.f32 1.0, %v6007_v28 }
0x1437   :  { %6008 = vrcp.f32 %v4192_v29 }
0x1441   :  { %v6009_v30 = vpop.eup %6008 }
0x1442   :  { %v4196_v33 = vmul.f32 %v6009_v30, %v4098_v62 }
0x14a5   :  { %v4199_v31 = vpop.permute.xlu0 %4198 }
0x14a6   :  { %v4201_v32 = vmul.f32 %v6009_v30, %v4199_v31 }
0x14a8   :  { %4203 = vrot.lane.b32.xlu1 %v4201_v32, %s6191_s5 }
0x151a   :  { %v4204_v34 = vpop.permute.xlu1 %4203 }
0x151b   :  { %v4206_v3 = vadd.f32 %v4204_v34, %v4196_v33 }
0x151d   :  { %6010 = vtanh.f32 %v4206_v3 }
0x1527   :  { %v6011_v36 = vpop.eup %6010 }
0x1528   :  { %4209 = vrot.lane.b32.xlu0 %v6011_v36, %s6190_s27 }
0x159a   :  { %v4210_v37 = vpop.permute.xlu0 %4209 }
0x159b   :  { %v6594_v38 = vmul.f32 %v6009_v30, %v4210_v37 }
0x159d   :  { %4222 = vrot.lane.b32.xlu1 %v6594_v38, %s6191_s5 }
0x160f   :  { %v4223_v39 = vpop.permute.xlu1 %4222 }
0x1610   :  { %5887 = vmatmul.mubr.msk.f32.vlgmr.msra.gmra.mrb[8].mxu1 %vm3323_vm1, %v4223_v39 }
0x16e3   :  { %v4292_v42 = vpop.f32.mrb[8].mxu1 }
0x16e4   :  { %v4296_v44 = vadd.f32 %v4292_v42, %v3450_v41  ;;  %v5888_v45 = vpop.f32.mrb[9].mxu1 }
0x16e6   :  { %6012 = vtanh.f32 %v4296_v44  ;;  %v5663_v2 = vmul.f32 -1.442695, %v4296_v44 }
0x16e8   :  { %6014 = vpow2.f32 %v5663_v2 }
0x16f0   :  { %v6013_v47 = vpop.eup %6012 }
0x16f1   :  { %4306 = vrot.lane.b32.xlu0 %v6013_v47, %s6190_s27 }
0x16f2   :  { %v6015_v51 = vpop.eup %6014 }
0x16f3   :  { %v4300_v52 = vadd.f32 1.0, %v6015_v51 }
0x16f5   :  { %3568 = vperm.xlu0 %5954, %v3566_v48   ;;  %6016 = vrcp.f32 %v4300_v52 }
0x16f9   :  { %3892 = vperm.xlu0 %5954, %v3890_v49  }
0x16fd   :  { %4108 = vperm.xlu0 %5954, %v4106_v50  }
0x16ff   :  { %v6017_v53 = vpop.eup %6016 }
0x1700   :  { %v4304_v4 = vmul.f32 %v6017_v53, %v4206_v3 }
0x1701   :  { %4324 = vperm.xlu0 %5954, %v4322_v16  }
0x1705   :  { %4334 = vrot.lane.b32.xlu0 %v5664_v56, %s6193_s9 }
0x1763   :  { %v4307_v54 = vpop.permute.xlu0 %4306 }
0x1764   :  { %v4309_v55 = vmul.f32 %v6017_v53, %v4307_v54 }
0x1766   :  { %4311 = vrot.lane.b32.xlu1 %v4309_v55, %s6191_s5 }
0x176a   :  { %3676 = vperm.xlu1 %5955, %v3674_v57  }
0x176e   :  { %3784 = vperm.xlu1 %5955, %v3782_v58  }
0x1772   :  { %4000 = vperm.xlu1 %5955, %v3998_v60  }
0x1774   :  { %v3569_v10 = vpop.permute.xlu0 %3568 }
0x1775   :  { %vm3570_vm10 = vcmp.eq.s32.totalorder %v3569_v10, 1 }
0x1776   :  { %4216 = vperm.xlu1 %5955, %v4214_v61   ;;  %v3571_v1 = vsel %vm3570_vm10, %v6493_v35, 0.0 }
0x1778   :  { %v3893_v9 = vpop.permute.xlu0 %3892 }
0x1779   :  { %vm3894_vm13 = vcmp.eq.s32.totalorder %v3893_v9, 1 }
0x177c   :  { %v4109_v0 = vpop.permute.xlu0 %4108 }
0x177d   :  { %vm4110_vm15 = vcmp.eq.s32.totalorder %v4109_v0, 1 }
0x1780   :  { %v4325_v17 = vpop.permute.xlu0 %4324 }
0x1781   :  { %vm4326_vm2 = vcmp.eq.s32.totalorder %v4325_v17, 1 }
0x1784   :  { %v4335_v35 = vpop.permute.xlu0 %4334 }
0x17d8   :  { %v4312_v5 = vpop.permute.xlu1 %4311 }
0x17d9   :  { %v4314_v6 = vadd.f32 %v4312_v5, %v4304_v4 }
0x17db   :  { %6018 = vtanh.f32 %v4314_v6 }
0x17e5   :  { %v6019_v7 = vpop.eup %6018 }
0x17e6   :  { %4317 = vrot.lane.b32.xlu1 %v6019_v7, %s6190_s27 }
0x17e9   :  { %v3677_v8 = vpop.permute.xlu1 %3676 }
0x17ea   :  { %vm3678_vm11 = vcmp.eq.s32.totalorder %v3677_v8, 1 }
0x17eb   :  { %v3679_v13 = vsel %vm3678_vm11, %v6516_v59, %v3571_v1 }
0x17ed   :  { %v3785_v11 = vpop.permute.xlu1 %3784 }
0x17ee   :  { %vm3786_vm12 = vcmp.eq.s32.totalorder %v3785_v11, 1 }
0x17ef   :  { %v3787_v14 = vsel %vm3786_vm12, %v6539_v24, %v3679_v13 }
0x17f0   :  { %v3895_v62 = vsel %vm3894_vm13, %v6554_v43, %v3787_v14 }
0x17f1   :  { %v4001_v12 = vpop.permute.xlu1 %4000 }
0x17f2   :  { %vm4002_vm14 = vcmp.eq.s32.totalorder %v4001_v12, 1 }
0x17f3   :  { %v4003_v18 = vsel %vm4002_vm14, %v6569_v63, %v3895_v62  ;;  %v4346_v63 = vstv %s6641_s7 }
0x17f4   :  { %v4111_v21 = vsel %vm4110_vm15, %v6584_v19, %v4003_v18 }
0x17f5   :  { %v4217_v15 = vpop.permute.xlu1 %4216 }
0x17f6   :  { %vm4218_vm0 = vcmp.eq.s32.totalorder %v4217_v15, 1 }
0x17f7   :  { %v4219_v59 = vsel %vm4218_vm0, %v6594_v38, %v4111_v21 }
0x1858   :  { %v4318_v20 = vpop.permute.xlu1 %4317 }
0x1859   :  { %v4320_v22 = vmul.f32 %v6017_v53, %v4318_v20 }
0x185b   :  { %v4327_v23 = vsel %vm4326_vm2, %v4320_v22, %v4219_v59 }
0x185c   :  { %v4337_v24 = vmul.f32 %v4335_v35, %v4327_v23 }
0x185e   :  { %4339 = vrot.lane.b32.xlu1 %v4337_v24, %s6191_s5 }
0x18d0   :  { %v4340_v25 = vpop.permute.xlu1 %4339 }
0x18d1   :  { %v4342_v43 = vsel %vm3323_vm1, %v4340_v25, 0.0 }
0x18d2   :  { %4343 = vadd.xlane.f32.xlu0 %v4342_v43 }
0x195f   :  { %v4344_v19 = vpop.xlane.xlu0 %4343 }
0x1960   :  { %v4347_v26 = vadd.f32 %v4346_v63, %v4344_v19 }
0x1962   :  { %4348 = vst [vmem:[#allocation8] sm:$0xff] %v4347_v26 }
0x1963   :  { %6043 = shalt.err (!%p6040_p9)
}
0x1964   :  { %s6044_s14 = scalar_lea.hbm %s6642_s8, 128 }
0x1965   :  { %p6045_p10 = scmp.ne.s32.totalorder %s6642_s8, %s6044_s14  ;;  %p6048_p11 = scmp.lt.u32.totalorder %s6044_s14, %s6642_s8 }
0x1967   :  { %p6050_p12 = pnand %p6048_p11, %p6045_p10 }
0x1969   :  { %6053 = shalt.err (!%p6050_p12)
}
0x196a   :  { %4358 = dma.vmem_to_hbm [thread:$0]  %s4356_s12, 128, %s6642_s8, [#allocation9]  }
0x196b   :  { %6184 = dma.done.wait [#allocation9], 128  }
0x196c   :  { %6185 = vsyncadd [#allocation9], 4294967168 }
0x196d   :  { %4362 = vsyncpa [#allocation9], 1 }
0x196e   :  { %4363 = vsyncmov [#allocation4] }
0x1971   :  { %s4364_s20 = vpop.sfrf %4363 }
0x1972   :  { %p5665_p13 = scmp.ne.s32.totalorder %s4364_s20, 0 }
0x1974   :  { %4368 = shalt.err (%p5665_p13)  }
0x1975   :  { %4370 = vsyncmov [#allocation4 + $0x1] }
0x1978   :  { %s4371_s21 = vpop.sfrf %4370 }
0x1979   :  { %p5666_p0 = scmp.ne.s32.totalorder %s4371_s21, 0 }
0x197b   :  { %4375 = shalt.err (%p5666_p0)  }
0x197c   :  { %4377 = vsyncmov [#allocation4 + $0x2] }
0x197f   :  { %s4378_s22 = vpop.sfrf %4377 }
0x1980   :  { %p5667_p1 = scmp.ne.s32.totalorder %s4378_s22, 0 }
0x1982   :  { %4382 = shalt.err (%p5667_p1)  }
0x1983   :  { %4384 = vsyncmov [#allocation4 + $0x3] }
0x1986   :  { %s4385_s23 = vpop.sfrf %4384 }
0x1987   :  { %p5668_p2 = scmp.ne.s32.totalorder %s4385_s23, 0 }
0x1989   :  { %4389 = shalt.err (%p5668_p2)  }
0x198a   :  { %4391 = vsyncmov [#allocation4 + $0x4] }
0x198d   :  { %s4392_s8 = vpop.sfrf %4391 }
0x198e   :  { %p5669_p3 = scmp.ne.s32.totalorder %s4392_s8, 0 }
0x1990   :  { %4396 = shalt.err (%p5669_p3)  }
0x1991   :  { %4398 = vsyncmov [#allocation4 + $0x5] }
0x1994   :  { %s4399_s24 = vpop.sfrf %4398 }
0x1995   :  { %p5670_p4 = scmp.ne.s32.totalorder %s4399_s24, 0 }
0x1997   :  { %4403 = shalt.err (%p5670_p4)  }
0x1998   :  { %4405 = vsyncmov [#allocation4 + $0x6] }
0x199b   :  { %s4406_s25 = vpop.sfrf %4405 }
0x199c   :  { %p5671_p5 = scmp.ne.s32.totalorder %s4406_s25, 0 }
0x199e   :  { %4410 = shalt.err (%p5671_p5)  }
0x199f   :  { %4412 = vsyncmov [#allocation4 + $0x7] }
0x19a2   :  { %s4413_s26 = vpop.sfrf %4412 }
0x19a3   :  { %p5672_p6 = scmp.ne.s32.totalorder %s4413_s26, 0 }
0x19a5   :  { %4417 = shalt.err (%p5672_p6)  }
0x19a6   :  { %4419 = vsyncmov [#allocation4 + $0x8] }
0x19a9   :  { %s4420_s3 = vpop.sfrf %4419 }
0x19aa   :  { %p5673_p7 = scmp.ne.s32.totalorder %s4420_s3, 0 }
0x19ac   :  { %4424 = shalt.err (%p5673_p7)  }
0x19ad   :  { %4426 = vsyncmov [#allocation4 + $0x9] }
0x19b0   :  { %s4427_s4 = vpop.sfrf %4426 }
0x19b1   :  { %p5674_p8 = scmp.ne.s32.totalorder %s4427_s4, 0 }
0x19b3   :  { %4431 = shalt.err (%p5674_p8)  }
0x19b4   :  { %4433 = vsyncmov [#allocation4 + $0xa] }
0x19b7   :  { %s4434_s27 = vpop.sfrf %4433 }
0x19b8   :  { %p5675_p9 = scmp.ne.s32.totalorder %s4434_s27, 0 }
0x19ba   :  { %4438 = shalt.err (%p5675_p9)  }
0x19bb   :  { %4440 = vsyncmov [#allocation4 + $0xb] }
0x19be   :  { %s4441_s5 = vpop.sfrf %4440 }
0x19bf   :  { %p5676_p10 = scmp.ne.s32.totalorder %s4441_s5, 0 }
0x19c1   :  { %4445 = shalt.err (%p5676_p10)  }
0x19c2   :  { %4447 = vsyncmov [#allocation4 + $0xc] }
0x19c5   :  { %s4448_s28 = vpop.sfrf %4447 }
0x19c6   :  { %p5677_p11 = scmp.ne.s32.totalorder %s4448_s28, 0 }
0x19c8   :  { %4452 = shalt.err (%p5677_p11)  }
0x19c9   :  { %4454 = vsyncmov [#allocation4 + $0xd] }
0x19cc   :  { %s4455_s29 = vpop.sfrf %4454 }
0x19cd   :  { %p5678_p12 = scmp.ne.s32.totalorder %s4455_s29, 0 }
0x19cf   :  { %4459 = shalt.err (%p5678_p12)  }
0x19d0   :  { %4461 = vsyncmov [#allocation4 + $0xe] }
0x19d3   :  { %s4462_s1 = vpop.sfrf %4461 }
0x19d4   :  { %p5679_p13 = scmp.ne.s32.totalorder %s4462_s1, 0 }
0x19d6   :  { %4466 = shalt.err (%p5679_p13)  }
0x19d7   :  { %4468 = vsyncmov [#allocation4 + $0xf] }
0x19da   :  { %s4469_s30 = vpop.sfrf %4468 }
0x19db   :  { %p5680_p0 = scmp.ne.s32.totalorder %s4469_s30, 0 }
0x19dd   :  { %4473 = shalt.err (%p5680_p0)  }
0x19de   :  { %4475 = vsyncmov [#allocation4 + $0x10] }
0x19e1   :  { %s4476_s9 = vpop.sfrf %4475 }
0x19e2   :  { %p5681_p1 = scmp.ne.s32.totalorder %s4476_s9, 0 }
0x19e4   :  { %4480 = shalt.err (%p5681_p1)  }
0x19e5   :  { %4482 = vsyncmov [#allocation4 + $0x11] }
0x19e8   :  { %s4483_s6 = vpop.sfrf %4482 }
0x19e9   :  { %p5682_p2 = scmp.ne.s32.totalorder %s4483_s6, 0 }
0x19eb   :  { %4487 = shalt.err (%p5682_p2)  }
0x19ec   :  { %4489 = vsyncmov [#allocation4 + $0x12] }
0x19ef   :  { %s4490_s10 = vpop.sfrf %4489 }
0x19f0   :  { %p5683_p3 = scmp.ne.s32.totalorder %s4490_s10, 0 }
0x19f2   :  { %4494 = shalt.err (%p5683_p3)  }
0x19f3   :  { %4496 = vsyncmov [#allocation4 + $0x13] }
0x19f6   :  { %s4497_s11 = vpop.sfrf %4496 }
0x19f7   :  { %p5684_p4 = scmp.ne.s32.totalorder %s4497_s11, 0 }
0x19f9   :  { %4501 = shalt.err (%p5684_p4)  }
0x19fa   :  { %4503 = vsyncmov [#allocation4 + $0x14] }
0x19fd   :  { %s4504_s12 = vpop.sfrf %4503 }
0x19fe   :  { %p5685_p5 = scmp.ne.s32.totalorder %s4504_s12, 0 }
0x1a00   :  { %4508 = shalt.err (%p5685_p5)  }
0x1a01   :  { %4510 = vsyncmov [#allocation4 + $0x15] }
0x1a04   :  { %s4511_s2 = vpop.sfrf %4510 }
0x1a05   :  { %p5686_p6 = scmp.ne.s32.totalorder %s4511_s2, 0 }
0x1a07   :  { %4515 = shalt.err (%p5686_p6)  }
0x1a08   :  { %4517 = vsyncmov [#allocation4 + $0x16] }
0x1a0b   :  { %s4518_s13 = vpop.sfrf %4517 }
0x1a0c   :  { %p5687_p7 = scmp.ne.s32.totalorder %s4518_s13, 0 }
0x1a0e   :  { %4522 = shalt.err (%p5687_p7)  }
0x1a0f   :  { %4524 = vsyncmov [#allocation4 + $0x17] }
0x1a12   :  { %s4525_s0 = vpop.sfrf %4524 }
0x1a13   :  { %p5688_p8 = scmp.ne.s32.totalorder %s4525_s0, 0 }
0x1a15   :  { %4529 = shalt.err (%p5688_p8)  }
0x1a16   :  { %4531 = vsyncmov [#allocation4 + $0x18] }
0x1a19   :  { %s4532_s14 = vpop.sfrf %4531 }
0x1a1a   :  { %p5689_p9 = scmp.ne.s32.totalorder %s4532_s14, 0 }
0x1a1c   :  { %4536 = shalt.err (%p5689_p9)  }
0x1a1d   :  { %4538 = vsyncmov [#allocation4 + $0x19] }
0x1a20   :  { %s4539_s15 = vpop.sfrf %4538 }
0x1a21   :  { %p5690_p10 = scmp.ne.s32.totalorder %s4539_s15, 0 }
0x1a23   :  { %4543 = shalt.err (%p5690_p10)  }
0x1a24   :  { %4545 = vsyncmov [#allocation4 + $0x1a] }
0x1a27   :  { %s4546_s16 = vpop.sfrf %4545 }
0x1a28   :  { %p5691_p11 = scmp.ne.s32.totalorder %s4546_s16, 0 }
0x1a2a   :  { %4550 = shalt.err (%p5691_p11)  }
0x1a2b   :  { %4552 = vsyncmov [#allocation4 + $0x1b] }
0x1a2e   :  { %s4553_s7 = vpop.sfrf %4552 }
0x1a2f   :  { %p5692_p12 = scmp.ne.s32.totalorder %s4553_s7, 0 }
0x1a31   :  { %4557 = shalt.err (%p5692_p12)  }
0x1a32   :  { %4559 = vsyncmov [#allocation4 + $0x1c] }
0x1a35   :  { %s4560_s17 = vpop.sfrf %4559 }
0x1a36   :  { %p5693_p13 = scmp.ne.s32.totalorder %s4560_s17, 0 }
0x1a38   :  { %4564 = shalt.err (%p5693_p13)  }
0x1a39   :  { %4566 = vsyncmov [#allocation4 + $0x1d] }
0x1a3c   :  { %s4567_s18 = vpop.sfrf %4566 }
0x1a3d   :  { %p5694_p0 = scmp.ne.s32.totalorder %s4567_s18, 0 }
0x1a3f   :  { %4571 = shalt.err (%p5694_p0)  }
0x1a40   :  { %4573 = vsyncmov [#allocation4 + $0x1e] }
0x1a43   :  { %s4574_s19 = vpop.sfrf %4573 }
0x1a44   :  { %p5695_p1 = scmp.ne.s32.totalorder %s4574_s19, 0 }
0x1a46   :  { %4578 = shalt.err (%p5695_p1)  }
0x1a47   :  { %4580 = vsyncmov [#allocation4 + $0x1f] }
0x1a4a   :  { %s4581_s20 = vpop.sfrf %4580 }
0x1a4b   :  { %p5696_p2 = scmp.ne.s32.totalorder %s4581_s20, 0 }
0x1a4d   :  { %4585 = shalt.err (%p5696_p2)  }
0x1a4e   :  { %4587 = vsyncmov [#allocation4 + $0x20] }
0x1a51   :  { %s4588_s21 = vpop.sfrf %4587 }
0x1a52   :  { %p5697_p3 = scmp.ne.s32.totalorder %s4588_s21, 0 }
0x1a54   :  { %4592 = shalt.err (%p5697_p3)  }
0x1a55   :  { %4594 = vsyncmov [#allocation4 + $0x21] }
0x1a58   :  { %s4595_s22 = vpop.sfrf %4594 }
0x1a59   :  { %p5698_p4 = scmp.ne.s32.totalorder %s4595_s22, 0 }
0x1a5b   :  { %4599 = shalt.err (%p5698_p4)  }
0x1a5c   :  { %4601 = vsyncmov [#allocation4 + $0x22] }
0x1a5f   :  { %s4602_s23 = vpop.sfrf %4601 }
0x1a60   :  { %p5699_p5 = scmp.ne.s32.totalorder %s4602_s23, 0 }
0x1a62   :  { %4606 = shalt.err (%p5699_p5)  }
0x1a63   :  { %4608 = vsyncmov [#allocation4 + $0x23] }
0x1a66   :  { %s4609_s8 = vpop.sfrf %4608 }
0x1a67   :  { %p5700_p6 = scmp.ne.s32.totalorder %s4609_s8, 0 }
0x1a69   :  { %4613 = shalt.err (%p5700_p6)  }
0x1a6a   :  { %4615 = vsyncmov [#allocation4 + $0x24] }
0x1a6d   :  { %s4616_s24 = vpop.sfrf %4615 }
0x1a6e   :  { %p5701_p7 = scmp.ne.s32.totalorder %s4616_s24, 0 }
0x1a70   :  { %4620 = shalt.err (%p5701_p7)  }
0x1a71   :  { %4622 = vsyncmov [#allocation4 + $0x25] }
0x1a74   :  { %s4623_s25 = vpop.sfrf %4622 }
0x1a75   :  { %p5702_p8 = scmp.ne.s32.totalorder %s4623_s25, 0 }
0x1a77   :  { %4627 = shalt.err (%p5702_p8)  }
0x1a78   :  { %4629 = vsyncmov [#allocation4 + $0x26] }
0x1a7b   :  { %s4630_s26 = vpop.sfrf %4629 }
0x1a7c   :  { %p5703_p9 = scmp.ne.s32.totalorder %s4630_s26, 0 }
0x1a7e   :  { %4634 = shalt.err (%p5703_p9)  }
0x1a7f   :  { %4636 = vsyncmov [#allocation4 + $0x27] }
0x1a82   :  { %s4637_s3 = vpop.sfrf %4636 }
0x1a83   :  { %p5704_p10 = scmp.ne.s32.totalorder %s4637_s3, 0 }
0x1a85   :  { %4641 = shalt.err (%p5704_p10)  }
0x1a86   :  { %4643 = vsyncmov [#allocation4 + $0x28] }
0x1a89   :  { %s4644_s4 = vpop.sfrf %4643 }
0x1a8a   :  { %p5705_p11 = scmp.ne.s32.totalorder %s4644_s4, 0 }
0x1a8c   :  { %4648 = shalt.err (%p5705_p11)  }
0x1a8d   :  { %4650 = vsyncmov [#allocation4 + $0x29] }
0x1a90   :  { %s4651_s27 = vpop.sfrf %4650 }
0x1a91   :  { %p5706_p12 = scmp.ne.s32.totalorder %s4651_s27, 0 }
0x1a93   :  { %4655 = shalt.err (%p5706_p12)  }
0x1a94   :  { %4657 = vsyncmov [#allocation4 + $0x2a] }
0x1a97   :  { %s4658_s5 = vpop.sfrf %4657 }
0x1a98   :  { %p5707_p13 = scmp.ne.s32.totalorder %s4658_s5, 0 }
0x1a9a   :  { %4662 = shalt.err (%p5707_p13)  }
0x1a9b   :  { %4664 = vsyncmov [#allocation4 + $0x2b] }
0x1a9e   :  { %s4665_s28 = vpop.sfrf %4664 }
0x1a9f   :  { %p5708_p0 = scmp.ne.s32.totalorder %s4665_s28, 0 }
0x1aa1   :  { %4669 = shalt.err (%p5708_p0)  }
0x1aa2   :  { %4671 = vsyncmov [#allocation4 + $0x2c] }
0x1aa5   :  { %s4672_s29 = vpop.sfrf %4671 }
0x1aa6   :  { %p5709_p1 = scmp.ne.s32.totalorder %s4672_s29, 0 }
0x1aa8   :  { %4676 = shalt.err (%p5709_p1)  }
0x1aa9   :  { %4678 = vsyncmov [#allocation4 + $0x2d] }
0x1aac   :  { %s4679_s1 = vpop.sfrf %4678 }
0x1aad   :  { %p5710_p2 = scmp.ne.s32.totalorder %s4679_s1, 0 }
0x1aaf   :  { %4683 = shalt.err (%p5710_p2)  }
0x1ab0   :  { %4685 = vsyncmov [#allocation4 + $0x2e] }
0x1ab3   :  { %s4686_s30 = vpop.sfrf %4685 }
0x1ab4   :  { %p5711_p3 = scmp.ne.s32.totalorder %s4686_s30, 0 }
0x1ab6   :  { %4690 = shalt.err (%p5711_p3)  }
0x1ab7   :  { %4692 = vsyncmov [#allocation4 + $0x2f] }
0x1aba   :  { %s4693_s9 = vpop.sfrf %4692 }
0x1abb   :  { %p5712_p4 = scmp.ne.s32.totalorder %s4693_s9, 0 }
0x1abd   :  { %4697 = shalt.err (%p5712_p4)  }
0x1abe   :  { %4699 = vsyncmov [#allocation4 + $0x30] }
0x1ac1   :  { %s4700_s6 = vpop.sfrf %4699 }
0x1ac2   :  { %p5713_p5 = scmp.ne.s32.totalorder %s4700_s6, 0 }
0x1ac4   :  { %4704 = shalt.err (%p5713_p5)  }
0x1ac5   :  { %4706 = vsyncmov [#allocation4 + $0x31] }
0x1ac8   :  { %s4707_s10 = vpop.sfrf %4706 }
0x1ac9   :  { %p5714_p6 = scmp.ne.s32.totalorder %s4707_s10, 0 }
0x1acb   :  { %4711 = shalt.err (%p5714_p6)  }
0x1acc   :  { %4713 = vsyncmov [#allocation4 + $0x32] }
0x1acf   :  { %s4714_s11 = vpop.sfrf %4713 }
0x1ad0   :  { %p5715_p7 = scmp.ne.s32.totalorder %s4714_s11, 0 }
0x1ad2   :  { %4718 = shalt.err (%p5715_p7)  }
0x1ad3   :  { %4720 = vsyncmov [#allocation4 + $0x33] }
0x1ad6   :  { %s4721_s12 = vpop.sfrf %4720 }
0x1ad7   :  { %p5716_p8 = scmp.ne.s32.totalorder %s4721_s12, 0 }
0x1ad9   :  { %4725 = shalt.err (%p5716_p8)  }
0x1ada   :  { %4727 = vsyncmov [#allocation4 + $0x34] }
0x1add   :  { %s4728_s2 = vpop.sfrf %4727 }
0x1ade   :  { %p5717_p9 = scmp.ne.s32.totalorder %s4728_s2, 0 }
0x1ae0   :  { %4732 = shalt.err (%p5717_p9)  }
0x1ae1   :  { %4734 = vsyncmov [#allocation4 + $0x35] }
0x1ae4   :  { %s4735_s13 = vpop.sfrf %4734 }
0x1ae5   :  { %p5718_p10 = scmp.ne.s32.totalorder %s4735_s13, 0 }
0x1ae7   :  { %4739 = shalt.err (%p5718_p10)  }
0x1ae8   :  { %4741 = vsyncmov [#allocation4 + $0x36] }
0x1aeb   :  { %s4742_s0 = vpop.sfrf %4741 }
0x1aec   :  { %p5719_p11 = scmp.ne.s32.totalorder %s4742_s0, 0 }
0x1aee   :  { %4746 = shalt.err (%p5719_p11)  }
0x1aef   :  { %4748 = vsyncmov [#allocation4 + $0x37] }
0x1af2   :  { %s4749_s14 = vpop.sfrf %4748 }
0x1af3   :  { %p5720_p12 = scmp.ne.s32.totalorder %s4749_s14, 0 }
0x1af5   :  { %4753 = shalt.err (%p5720_p12)  }
0x1af6   :  { %4755 = vsyncmov [#allocation4 + $0x38] }
0x1af9   :  { %s4756_s15 = vpop.sfrf %4755 }
0x1afa   :  { %p5721_p13 = scmp.ne.s32.totalorder %s4756_s15, 0 }
0x1afc   :  { %4760 = shalt.err (%p5721_p13)  }
0x1afd   :  { %4762 = vsyncmov [#allocation4 + $0x39] }
0x1b00   :  { %s4763_s16 = vpop.sfrf %4762 }
0x1b01   :  { %p5722_p0 = scmp.ne.s32.totalorder %s4763_s16, 0 }
0x1b03   :  { %4767 = shalt.err (%p5722_p0)  }
0x1b04   :  { %4769 = vsyncmov [#allocation4 + $0x3a] }
0x1b07   :  { %s4770_s7 = vpop.sfrf %4769 }
0x1b08   :  { %p5723_p1 = scmp.ne.s32.totalorder %s4770_s7, 0 }
0x1b0a   :  { %4774 = shalt.err (%p5723_p1)  }
0x1b0b   :  { %4776 = vsyncmov [#allocation4 + $0x3b] }
0x1b0e   :  { %s4777_s17 = vpop.sfrf %4776 }
0x1b0f   :  { %p5724_p2 = scmp.ne.s32.totalorder %s4777_s17, 0 }
0x1b11   :  { %4781 = shalt.err (%p5724_p2)  }
0x1b12   :  { %4783 = vsyncmov [#allocation4 + $0x3c] }
0x1b15   :  { %s4784_s18 = vpop.sfrf %4783 }
0x1b16   :  { %p5725_p3 = scmp.ne.s32.totalorder %s4784_s18, 0 }
0x1b18   :  { %4788 = shalt.err (%p5725_p3)  }
0x1b19   :  { %4790 = vsyncmov [#allocation4 + $0x3d] }
0x1b1c   :  { %s4791_s19 = vpop.sfrf %4790 }
0x1b1d   :  { %p5726_p4 = scmp.ne.s32.totalorder %s4791_s19, 0 }
0x1b1f   :  { %4795 = shalt.err (%p5726_p4)  }
0x1b20   :  { %4797 = vsyncmov [#allocation4 + $0x3e] }
0x1b23   :  { %s4798_s20 = vpop.sfrf %4797 }
0x1b24   :  { %p5727_p5 = scmp.ne.s32.totalorder %s4798_s20, 0 }
0x1b26   :  { %4802 = shalt.err (%p5727_p5)  }
0x1b27   :  { %4804 = vsyncmov [#allocation4 + $0x3f] }
0x1b2a   :  { %s4805_s21 = vpop.sfrf %4804 }
0x1b2b   :  { %p5728_p6 = scmp.ne.s32.totalorder %s4805_s21, 0 }
0x1b2d   :  { %4809 = shalt.err (%p5728_p6)  }

</bundles_post_ra>
